<compile_context>
chip_gen: v6e
topology: v6e:2x2x1
jax: 0.10.0
libtpu: 0.0.40
codegen_flags: <defaults>
</compile_context>

<pallas_src>
import jax
import jax.numpy as jnp
import numpy as np
from jax import lax
from jax.experimental import pallas as pl
from jax.experimental.pallas import tpu as pltpu

# Model dimensions (module defaults): d2=120, d1=40, t1=10, t2=5, d3=3, t3=1
D2, D1, T1, T2, D3, T3 = 120, 40, 10, 5, 3, 1
TW_ROWS = 32  # stacked TABL projection: rows 0:15 -> x2, rows 16:31 -> E


def _btabl_kernel(l_ref, tb_ref, x_ref, wcomb_ref, bias_ref, twstack_ref,
                  tw2_ref, out_ref):
    # ---- BL layer: one fused bilinear MXU matmul over the feature axis. ----
    # x block is natural-layout (tile, 400); contracting over axis 1 of both
    # operands puts batch on the lane axis of h without an HBM transpose pass.
    h = lax.dot_general(
        wcomb_ref[...], x_ref[...],
        dimension_numbers=(((1,), (1,)), ((), ())),
        preferred_element_type=jnp.float32)                          # (600, TB)
    h = jnp.maximum(h + bias_ref[...], 0.0)
    # Dropout(p=0.1) is the identity in eval mode.

    # ---- TABL layer: both projections in a single small matmul. ----
    s = jnp.dot(twstack_ref[...], h, preferred_element_type=jnp.float32)  # (32, TB)

    lam = l_ref[0]
    tw2 = tw2_ref[...]                                               # (5, 1)

    logits = []
    for c in range(D3):                                              # unrolled, D3=3
        x2c = s[c * T2:(c + 1) * T2, :]                              # (5, TB)
        ec = s[16 + c * T2:16 + (c + 1) * T2, :]                     # (5, TB)
        # Attention softmax over the 5 time steps (sublanes), per lane (batch).
        m = jnp.max(ec, axis=0, keepdims=True)                       # (1, TB)
        p = jnp.exp(ec - m)
        a = p / jnp.sum(p, axis=0, keepdims=True)                    # exact divide
        x3c = lam * x2c + (1.0 - lam) * (x2c * a)
        yc = jnp.sum(x3c * tw2, axis=0, keepdims=True) + tb_ref[c]   # (1, TB)
        logits.append(yc)

    # ---- 3-class output softmax, single lane-dense (3, TB) store. ----
    y = jnp.concatenate(logits, axis=0)                              # (3, TB)
    ymax = jnp.max(y, axis=0, keepdims=True)
    py = jnp.exp(y - ymax)
    out_ref[...] = py / jnp.sum(py, axis=0, keepdims=True)           # exact divide


def pack_params(params):
    """Repack prepared params into the fused-kernel layout."""
    l, w1, w2, b, tw1, twm, tw2, tb = params
    eye_t2 = jnp.eye(T2, dtype=jnp.float32)
    # W_comb[(d2,t2),(d1,t1)] = W1[d2,d1] * W2[t1,t2]            -> (600, 400)
    wcomb = (w1[:, None, :, None] * w2.T[None, :, None, :]).reshape(D2 * T2, D1 * T1)
    bias = b.reshape(D2 * T2, 1)                                  # (600, 1)
    # TW1_exp[(d3,t2),(d2,t2')] = TW1[d3,d2] * (t2 == t2')        -> (15, 600)
    tw1e = (tw1[:, None, :, None] * eye_t2[None, :, None, :]).reshape(D3 * T2, D2 * T2)
    # Per-class block-diagonal attention mix (E = x2 @ W per class) -> (15, 15)
    twmblk = jnp.kron(jnp.eye(D3, dtype=jnp.float32), twm.T)
    twe = twmblk @ tw1e                                           # (15, 600): E = twe @ h
    pad = jnp.zeros((1, D2 * T2), jnp.float32)
    # Stack so x2 lives in rows 0:15 and E in rows 16:31 (16-sublane aligned).
    twstack = jnp.concatenate([tw1e, pad, twe, pad], axis=0)      # (32, 600)
    tbflat = tb.reshape(D3)                                       # (3,)
    return l, wcomb, bias, twstack, tw2, tbflat


def btabl_forward(x, params, *, batch_tile=1024):
    """x: (B, D1, T1) float32; params = prepare_params(...). Returns (B, D3)."""
    B = x.shape[0]
    batch_tile = max(128, (int(batch_tile) // 128) * 128)
    tile = min(batch_tile, 128 * ((B + 127) // 128))
    n_tiles = (B + tile - 1) // tile
    b_pad = n_tiles * tile

    l, wcomb, bias, twstack, tw2, tbflat = pack_params(params)

    # Natural layout: (B, 40, 10) -> (B, 400) is a free row-major reshape.
    x_flat = x.astype(jnp.float32).reshape(B, D1 * T1)
    if b_pad != B:
        # Only ragged batches pay a pad copy; aligned batches have no pre-pass.
        x_flat = jnp.pad(x_flat, ((0, b_pad - B), (0, 0)))

    def nbytes(a):
        return int(a.size) * a.dtype.itemsize

    cost = pl.CostEstimate(
        flops=2 * b_pad * (D2 * T2 * D1 * T1 + TW_ROWS * D2 * T2),
        transcendentals=b_pad * (D3 * T2 + D3),
        bytes_accessed=nbytes(x_flat) + 4 * D3 * b_pad + nbytes(wcomb)
        + nbytes(twstack) + nbytes(bias),
    )

    out = pl.pallas_call(
        _btabl_kernel,
        out_shape=jax.ShapeDtypeStruct((D3, b_pad), jnp.float32),
        grid=(n_tiles,),
        in_specs=[
            pl.BlockSpec(memory_space=pltpu.MemorySpace.SMEM),        # lambda (1,)
            pl.BlockSpec(memory_space=pltpu.MemorySpace.SMEM),        # TABL bias (3,)
            pl.BlockSpec((tile, D1 * T1), lambda i: (i, 0)),          # x (TB, 400)
            pl.BlockSpec((D2 * T2, D1 * T1), lambda i: (0, 0)),       # W_comb (600, 400)
            pl.BlockSpec((D2 * T2, 1), lambda i: (0, 0)),             # BL bias (600, 1)
            pl.BlockSpec((TW_ROWS, D2 * T2), lambda i: (0, 0)),       # stacked TABL (32, 600)
            pl.BlockSpec((T2, T3), lambda i: (0, 0)),                 # TW2 (5, 1)
        ],
        out_specs=pl.BlockSpec((D3, tile), lambda i: (0, i)),
        compiler_params=pltpu.CompilerParams(
            dimension_semantics=("parallel",),
            vmem_limit_bytes=32 * 1024 * 1024),
        cost_estimate=cost,
    )(l, tbflat, x_flat, wcomb, bias, twstack, tw2)

    return out[:, :B].T                                           # (B, D3)


# ---------------- parameter setup (plain-JAX glue) ----------------

def kaiming_uniform(key, shape):
    # torch.nn.init.kaiming_uniform_(w, nonlinearity='relu') for 2-D tensors.
    fan_in = shape[1]
    bound = np.sqrt(2.0) * np.sqrt(3.0 / fan_in)
    return jax.random.uniform(key, shape, jnp.float32, -bound, bound)


def max_norm(w, max_val=10.0):
    # m_btabl.max_norm_: rescale if Frobenius norm exceeds 10.
    n = jnp.linalg.norm(w)
    scale = jnp.where(n > max_val, jnp.clip(n, 0.0, max_val) / (1e-8 + n), 1.0)
    return w * scale


def init_params(key):
    k1, k2, k3, k4 = jax.random.split(key, 4)
    bl_w1 = kaiming_uniform(k1, (D2, D1))
    bl_w2 = kaiming_uniform(k2, (T1, T2))
    bl_b = jnp.zeros((D2, T2), jnp.float32)
    t_w1 = kaiming_uniform(k3, (D3, D2))
    t_w = jnp.full((T2, T2), 1.0 / T2, jnp.float32)     # TABL.W init = 1/t1
    t_w2 = kaiming_uniform(k4, (T2, T3))
    t_b = jnp.zeros((D3, T3), jnp.float32)
    l = jnp.array([0.5], jnp.float32)
    return l, bl_w1, bl_w2, bl_b, t_w1, t_w, t_w2, t_b


def prepare_params(raw):
    l, bl_w1, bl_w2, bl_b, t_w1, t_w, t_w2, t_b = raw
    # max_norm_ side-effects applied in m_btabl.forward
    bl_w1 = max_norm(bl_w1)
    bl_w2 = max_norm(bl_w2)
    t_w1 = max_norm(t_w1)
    t_w = max_norm(t_w)
    t_w2 = max_norm(t_w2)
    # TABL: clamp lambda into [0, 1]
    l = jnp.clip(l, 0.0, 1.0)
    # TABL: W - W*I + I/t1   (the TABL layer's t1 equals T2 here)
    eye = jnp.eye(T2, dtype=jnp.float32)
    t_wm = t_w - t_w * eye + eye / T2
    return l, bl_w1, bl_w2, bl_b, t_w1, t_wm, t_w2, t_b


# ---------------- pure-JAX reference for validation ----------------

def reference_forward(x, params):
    l, w1, w2, b, tw1, twm, tw2, tb = params
    h = jnp.maximum(jnp.einsum('ij,bjk->bik', w1, x) @ w2 + b, 0.0)
    x2 = jnp.einsum('ij,bjk->bik', tw1, h)
    a = jax.nn.softmax(x2 @ twm, axis=-1)
    x3 = l[0] * x2 + (1.0 - l[0]) * x2 * a
    y = jnp.squeeze(x3 @ tw2 + tb, axis=-1)
    return jax.nn.softmax(y, axis=1)


if __name__ == "__main__":
    key = jax.random.PRNGKey(0)
    kx, kp = jax.random.split(key)
    params = prepare_params(init_params(kp))

    # Small smoke test (single batch tile).
    B = 4
    x = jax.random.normal(kx, (B, D1, T1), jnp.float32)
    out = jax.block_until_ready(btabl_forward(x, params))
    ref = reference_forward(x, params)
    np.testing.assert_allclose(np.asarray(out), np.asarray(ref), rtol=1e-3, atol=2e-3)

    # Multi-tile + ragged-tail check (3 tiles of 128, batch padded 300 -> 384).
    B2 = 300
    x2 = jax.random.normal(jax.random.PRNGKey(1), (B2, D1, T1), jnp.float32)
    out2 = jax.block_until_ready(btabl_forward(x2, params, batch_tile=128))
    ref2 = reference_forward(x2, params)
    np.testing.assert_allclose(np.asarray(out2), np.asarray(ref2), rtol=1e-3, atol=2e-3)

    print("KERNEL_OK")
</pallas_src>

<mosaic_0001>
module attributes {stable_mosaic.version = 11 : i64} {
  func.func @_btabl_kernel(%arg0: i32, %arg1: memref<1xf32, #tpu.memory_space<smem>>, %arg2: memref<3xf32, #tpu.memory_space<smem>>, %arg3: memref<128x400xf32, #tpu.memory_space<vmem>>, %arg4: memref<600x400xf32, #tpu.memory_space<vmem>>, %arg5: memref<600x1xf32, #tpu.memory_space<vmem>>, %arg6: memref<32x600xf32, #tpu.memory_space<vmem>>, %arg7: memref<5x1xf32, #tpu.memory_space<vmem>>, %arg8: memref<3x128xf32, #tpu.memory_space<vmem>>) attributes {dimension_semantics = [#tpu.dimension_semantics<parallel>], iteration_bounds = array<i64: 1>, scalar_prefetch = 0 : i64, scratch_operands = 0 : i64, tpu.core_type = #tpu.core_type<tc>, window_params = [{transform_indices = @transform_0, window_bounds = array<i64: 1>}, {transform_indices = @transform_1, window_bounds = array<i64: 3>}, {transform_indices = @transform_2, window_bounds = array<i64: 128, 400>}, {pipeline_mode = #tpu.pipeline_mode<synchronous>, transform_indices = @transform_3, window_bounds = array<i64: 600, 400>}, {pipeline_mode = #tpu.pipeline_mode<synchronous>, transform_indices = @transform_4, window_bounds = array<i64: 600, 1>}, {pipeline_mode = #tpu.pipeline_mode<synchronous>, transform_indices = @transform_5, window_bounds = array<i64: 32, 600>}, {pipeline_mode = #tpu.pipeline_mode<synchronous>, transform_indices = @transform_6, window_bounds = array<i64: 5, 1>}, {transform_indices = @transform_7, window_bounds = array<i64: 3, 128>}]} {
    %c0 = arith.constant 0 : index
    %c0_0 = arith.constant 0 : index
    %0 = vector.load %arg4[%c0, %c0_0] : memref<600x400xf32, #tpu.memory_space<vmem>>, vector<600x400xf32>
    %c0_1 = arith.constant 0 : index
    %c0_2 = arith.constant 0 : index
    %1 = vector.load %arg3[%c0_1, %c0_2] : memref<128x400xf32, #tpu.memory_space<vmem>>, vector<128x400xf32>
    %cst = arith.constant dense<0.000000e+00> : vector<600x128xf32>
    %2 = tpu.matmul %0, %1, %cst {dimension_numbers = #tpu.dot_dimension_numbers<[1], [1], [0], [0], [0, 0, 1, 0], [], []>} : vector<600x400xf32>, vector<128x400xf32>, vector<600x128xf32> -> vector<600x128xf32>
    %c0_3 = arith.constant 0 : index
    %c0_4 = arith.constant 0 : index
    %3 = vector.load %arg5[%c0_3, %c0_4] : memref<600x1xf32, #tpu.memory_space<vmem>>, vector<600x1xf32>
    %4 = vector.broadcast %3 : vector<600x1xf32> to vector<600x128xf32>
    %5 = arith.addf %2, %4 : vector<600x128xf32>
    %cst_5 = arith.constant 0.000000e+00 : f32
    %6 = vector.broadcast %cst_5 : f32 to vector<600x128xf32>
    %7 = arith.maximumf %5, %6 : vector<600x128xf32>
    %c0_6 = arith.constant 0 : index
    %c0_7 = arith.constant 0 : index
    %8 = vector.load %arg6[%c0_6, %c0_7] : memref<32x600xf32, #tpu.memory_space<vmem>>, vector<32x600xf32>
    %cst_8 = arith.constant dense<0.000000e+00> : vector<32x128xf32>
    %9 = tpu.matmul %8, %7, %cst_8 {dimension_numbers = #tpu.dot_dimension_numbers<[1], [0], [0], [1], [0, 0, 1, 1], [], []>} : vector<32x600xf32>, vector<600x128xf32>, vector<32x128xf32> -> vector<32x128xf32>
    %c0_9 = arith.constant 0 : index
    %10 = memref.load %arg1[%c0_9] : memref<1xf32, #tpu.memory_space<smem>>
    %c0_10 = arith.constant 0 : index
    %c0_11 = arith.constant 0 : index
    %11 = vector.load %arg7[%c0_10, %c0_11] : memref<5x1xf32, #tpu.memory_space<vmem>>, vector<5x1xf32>
    %12 = vector.extract_strided_slice %9 {offsets = [0, 0], sizes = [5, 128], strides = [1, 1]} : vector<32x128xf32> to vector<5x128xf32>
    %13 = vector.extract_strided_slice %9 {offsets = [16, 0], sizes = [5, 128], strides = [1, 1]} : vector<32x128xf32> to vector<5x128xf32>
    %cst_12 = arith.constant dense<0xFF800000> : vector<128xf32>
    %14 = vector.multi_reduction <maximumf>, %13, %cst_12 [0] : vector<5x128xf32> to vector<128xf32>
    %15 = vector.shape_cast %14 : vector<128xf32> to vector<1x128xf32>
    %16 = vector.broadcast %15 : vector<1x128xf32> to vector<5x128xf32>
    %17 = arith.subf %13, %16 : vector<5x128xf32>
    %18 = math.exp %17 : vector<5x128xf32>
    %cst_13 = arith.constant dense<0.000000e+00> : vector<128xf32>
    %19 = vector.multi_reduction <add>, %18, %cst_13 [0] : vector<5x128xf32> to vector<128xf32>
    %20 = vector.shape_cast %19 : vector<128xf32> to vector<1x128xf32>
    %21 = vector.broadcast %20 : vector<1x128xf32> to vector<5x128xf32>
    %22 = arith.divf %18, %21 : vector<5x128xf32>
    %23 = vector.broadcast %10 : f32 to vector<5x128xf32>
    %24 = arith.mulf %23, %12 : vector<5x128xf32>
    %cst_14 = arith.constant 1.000000e+00 : f32
    %25 = arith.subf %cst_14, %10 : f32
    %26 = arith.mulf %12, %22 : vector<5x128xf32>
    %27 = vector.broadcast %25 : f32 to vector<5x128xf32>
    %28 = arith.mulf %27, %26 : vector<5x128xf32>
    %29 = arith.addf %24, %28 : vector<5x128xf32>
    %30 = vector.broadcast %11 : vector<5x1xf32> to vector<5x128xf32>
    %31 = arith.mulf %29, %30 : vector<5x128xf32>
    %cst_15 = arith.constant dense<0.000000e+00> : vector<128xf32>
    %32 = vector.multi_reduction <add>, %31, %cst_15 [0] : vector<5x128xf32> to vector<128xf32>
    %33 = vector.shape_cast %32 : vector<128xf32> to vector<1x128xf32>
    %c0_16 = arith.constant 0 : index
    %34 = memref.load %arg2[%c0_16] : memref<3xf32, #tpu.memory_space<smem>>
    %35 = vector.broadcast %34 : f32 to vector<1x128xf32>
    %36 = arith.addf %33, %35 : vector<1x128xf32>
    %37 = vector.extract_strided_slice %9 {offsets = [5, 0], sizes = [5, 128], strides = [1, 1]} : vector<32x128xf32> to vector<5x128xf32>
    %38 = vector.extract_strided_slice %9 {offsets = [21, 0], sizes = [5, 128], strides = [1, 1]} : vector<32x128xf32> to vector<5x128xf32>
    %cst_17 = arith.constant dense<0xFF800000> : vector<128xf32>
    %39 = vector.multi_reduction <maximumf>, %38, %cst_17 [0] : vector<5x128xf32> to vector<128xf32>
    %40 = vector.shape_cast %39 : vector<128xf32> to vector<1x128xf32>
    %41 = vector.broadcast %40 : vector<1x128xf32> to vector<5x128xf32>
    %42 = arith.subf %38, %41 : vector<5x128xf32>
    %43 = math.exp %42 : vector<5x128xf32>
    %cst_18 = arith.constant dense<0.000000e+00> : vector<128xf32>
    %44 = vector.multi_reduction <add>, %43, %cst_18 [0] : vector<5x128xf32> to vector<128xf32>
    %45 = vector.shape_cast %44 : vector<128xf32> to vector<1x128xf32>
    %46 = vector.broadcast %45 : vector<1x128xf32> to vector<5x128xf32>
    %47 = arith.divf %43, %46 : vector<5x128xf32>
    %48 = vector.broadcast %10 : f32 to vector<5x128xf32>
    %49 = arith.mulf %48, %37 : vector<5x128xf32>
    %cst_19 = arith.constant 1.000000e+00 : f32
    %50 = arith.subf %cst_19, %10 : f32
    %51 = arith.mulf %37, %47 : vector<5x128xf32>
    %52 = vector.broadcast %50 : f32 to vector<5x128xf32>
    %53 = arith.mulf %52, %51 : vector<5x128xf32>
    %54 = arith.addf %49, %53 : vector<5x128xf32>
    %55 = vector.broadcast %11 : vector<5x1xf32> to vector<5x128xf32>
    %56 = arith.mulf %54, %55 : vector<5x128xf32>
    %cst_20 = arith.constant dense<0.000000e+00> : vector<128xf32>
    %57 = vector.multi_reduction <add>, %56, %cst_20 [0] : vector<5x128xf32> to vector<128xf32>
    %58 = vector.shape_cast %57 : vector<128xf32> to vector<1x128xf32>
    %c1 = arith.constant 1 : index
    %59 = memref.load %arg2[%c1] : memref<3xf32, #tpu.memory_space<smem>>
    %60 = vector.broadcast %59 : f32 to vector<1x128xf32>
    %61 = arith.addf %58, %60 : vector<1x128xf32>
    %62 = vector.extract_strided_slice %9 {offsets = [10, 0], sizes = [5, 128], strides = [1, 1]} : vector<32x128xf32> to vector<5x128xf32>
    %63 = vector.extract_strided_slice %9 {offsets = [26, 0], sizes = [5, 128], strides = [1, 1]} : vector<32x128xf32> to vector<5x128xf32>
    %cst_21 = arith.constant dense<0xFF800000> : vector<128xf32>
    %64 = vector.multi_reduction <maximumf>, %63, %cst_21 [0] : vector<5x128xf32> to vector<128xf32>
    %65 = vector.shape_cast %64 : vector<128xf32> to vector<1x128xf32>
    %66 = vector.broadcast %65 : vector<1x128xf32> to vector<5x128xf32>
    %67 = arith.subf %63, %66 : vector<5x128xf32>
    %68 = math.exp %67 : vector<5x128xf32>
    %cst_22 = arith.constant dense<0.000000e+00> : vector<128xf32>
    %69 = vector.multi_reduction <add>, %68, %cst_22 [0] : vector<5x128xf32> to vector<128xf32>
    %70 = vector.shape_cast %69 : vector<128xf32> to vector<1x128xf32>
    %71 = vector.broadcast %70 : vector<1x128xf32> to vector<5x128xf32>
    %72 = arith.divf %68, %71 : vector<5x128xf32>
    %73 = vector.broadcast %10 : f32 to vector<5x128xf32>
    %74 = arith.mulf %73, %62 : vector<5x128xf32>
    %cst_23 = arith.constant 1.000000e+00 : f32
    %75 = arith.subf %cst_23, %10 : f32
    %76 = arith.mulf %62, %72 : vector<5x128xf32>
    %77 = vector.broadcast %75 : f32 to vector<5x128xf32>
    %78 = arith.mulf %77, %76 : vector<5x128xf32>
    %79 = arith.addf %74, %78 : vector<5x128xf32>
    %80 = vector.broadcast %11 : vector<5x1xf32> to vector<5x128xf32>
    %81 = arith.mulf %79, %80 : vector<5x128xf32>
    %cst_24 = arith.constant dense<0.000000e+00> : vector<128xf32>
    %82 = vector.multi_reduction <add>, %81, %cst_24 [0] : vector<5x128xf32> to vector<128xf32>
    %83 = vector.shape_cast %82 : vector<128xf32> to vector<1x128xf32>
    %c2 = arith.constant 2 : index
    %84 = memref.load %arg2[%c2] : memref<3xf32, #tpu.memory_space<smem>>
    %85 = vector.broadcast %84 : f32 to vector<1x128xf32>
    %86 = arith.addf %83, %85 : vector<1x128xf32>
    %87 = tpu.concatenate %36, %61, %86 in 0 : vector<1x128xf32>, vector<1x128xf32>, vector<1x128xf32> -> vector<3x128xf32>
    %cst_25 = arith.constant dense<0xFF800000> : vector<128xf32>
    %88 = vector.multi_reduction <maximumf>, %87, %cst_25 [0] : vector<3x128xf32> to vector<128xf32>
    %89 = vector.shape_cast %88 : vector<128xf32> to vector<1x128xf32>
    %90 = vector.broadcast %89 : vector<1x128xf32> to vector<3x128xf32>
    %91 = arith.subf %87, %90 : vector<3x128xf32>
    %92 = math.exp %91 : vector<3x128xf32>
    %cst_26 = arith.constant dense<0.000000e+00> : vector<128xf32>
    %93 = vector.multi_reduction <add>, %92, %cst_26 [0] : vector<3x128xf32> to vector<128xf32>
    %94 = vector.shape_cast %93 : vector<128xf32> to vector<1x128xf32>
    %95 = vector.broadcast %94 : vector<1x128xf32> to vector<3x128xf32>
    %96 = arith.divf %92, %95 : vector<3x128xf32>
    %c0_27 = arith.constant 0 : index
    %c0_28 = arith.constant 0 : index
    %97 = vector.load %arg8[%c0_27, %c0_28] : memref<3x128xf32, #tpu.memory_space<vmem>>, vector<3x128xf32>
    tpu.vector_store %arg8[%c0_27, %c0_28], %96 {strides = array<i32>} : memref<3x128xf32, #tpu.memory_space<vmem>>, vector<3x128xf32>,
    return
  }
  func.func @transform_0(%arg0: i32) -> i32 {
    %c0_i32 = arith.constant 0 : i32
    %c0_i32_0 = arith.constant 0 : i32
    return %c0_i32 : i32
  }
  func.func @transform_1(%arg0: i32) -> i32 {
    %c0_i32 = arith.constant 0 : i32
    %c0_i32_0 = arith.constant 0 : i32
    return %c0_i32 : i32
  }
  func.func @transform_2(%arg0: i32) -> (i32, i32) {
    %c0_i32 = arith.constant 0 : i32
    %c0_i32_0 = arith.constant 0 : i32
    return %arg0, %c0_i32 : i32, i32
  }
  func.func @transform_3(%arg0: i32) -> (i32, i32) {
    %c0_i32 = arith.constant 0 : i32
    %c0_i32_0 = arith.constant 0 : i32
    %c0_i32_1 = arith.constant 0 : i32
    return %c0_i32, %c0_i32_0 : i32, i32
  }
  func.func @transform_4(%arg0: i32) -> (i32, i32) {
    %c0_i32 = arith.constant 0 : i32
    %c0_i32_0 = arith.constant 0 : i32
    %c0_i32_1 = arith.constant 0 : i32
    return %c0_i32, %c0_i32_0 : i32, i32
  }
  func.func @transform_5(%arg0: i32) -> (i32, i32) {
    %c0_i32 = arith.constant 0 : i32
    %c0_i32_0 = arith.constant 0 : i32
    %c0_i32_1 = arith.constant 0 : i32
    return %c0_i32, %c0_i32_0 : i32, i32
  }
  func.func @transform_6(%arg0: i32) -> (i32, i32) {
    %c0_i32 = arith.constant 0 : i32
    %c0_i32_0 = arith.constant 0 : i32
    %c0_i32_1 = arith.constant 0 : i32
    return %c0_i32, %c0_i32_0 : i32, i32
  }
  func.func @transform_7(%arg0: i32) -> (i32, i32) {
    %c0_i32 = arith.constant 0 : i32
    %c0_i32_0 = arith.constant 0 : i32
    return %c0_i32, %arg0 : i32, i32
  }
}

</mosaic_0001>

<bundles_post_ra>
// kernel: tpu_custom_call.1
= control target key start
LH: loop header
LB: loop body
LE: loop exit
PB: predicated region body
PF: predicated region fallthrough
CT: control target
= control target key end

     0   :  { %13 = vsyncpa [#allocation5], 0  ;;  %s4821_s0 = inlined_call_operand.<no memory space> [shape: f32[1], index: 0, kind: input, shape index: {}]   ;;  %s4822_s1 = inlined_call_operand.vmem [shape: f32[3], index: 1, kind: input, shape index: {}]   ;;  %s4823_s2 = inlined_call_operand.vmem [shape: f32[128,400], index: 2, kind: input, shape index: {}]   ;;  %s4824_s3 = inlined_call_operand.vmem [shape: f32[600,400], index: 3, kind: input, shape index: {}]   ;;  %s4825_s4 = inlined_call_operand.vmem [shape: f32[600,1], index: 4, kind: input, shape index: {}]   ;;  %s4826_s5 = inlined_call_operand.vmem [shape: f32[32,600], index: 5, kind: input, shape index: {}]   ;;  %s4827_s6 = inlined_call_operand.vmem [shape: f32[5,1], index: 6, kind: input, shape index: {}]   ;;  %s4828_s7 = inlined_call_operand.hbm [shape: f32[3,128], index: 7, kind: output, shape index: {}]  }
   0x1   :  { %14 = vsyncpa [#allocation4], 0  ;;  %s23_s26 = sshll.u32 %s4822_s1, 4  ;;  %s24_s26 = int_to_ptr.vmem [resolvable:$true] %s23_s26 }
   0x2   :  { %s2831_s27 = scalar_lea.vmem %s24_s26, 16  ;;  %p2836_p1 = scmp.lt.s32.totalorder %s24_s26, %s24_s26 }
   0x3   :  { %p2832_p0 = scmp.ne.s32.totalorder %s24_s26, %s2831_s27  ;;  %p2837_p2 = scmp.lt.s32.totalorder %s2831_s27, %s2831_s27 }
   0x5   :  { %p2838_p3 = por %p2837_p2, %p2836_p1 }
   0x7   :  { %p2839_p4 = pnand %p2838_p3, %p2832_p0 }
   0x9   :  { %2842 = shalt.err (!%p2839_p4)
}
   0xa   :  { %s2867_s28 = smov [#allocation3]  }
   0xb   :  { %26 = dma.vmem_to_smem %s24_s26, 16, %s2867_s28, [#allocation5]  }
   0xc   :  { %2863 = dma.done.wait [#allocation5], 16  }
   0xd   :  { %2864 = vsyncadd [#allocation5], 4294967280 }
   0xe   :  { %40 = sfence }
   0xf   :  { %v402_v0 = vld [vmem:[%s4823_s2 + $0x1e8] sm:$0xff]  ;;  %v404_v1 = vld [vmem:[%s4823_s2 + $0x1f8] sm:$0xff]  ;;  %vm855_vm0 = vcmask 130048   ;;  %v2868_v3 = vmov 0   ;;  %v401_v4 = vld [vmem:[%s4823_s2 + $0x1e0] sm:$0xff]  ;;  %vm2104_vm1 = vcmask 719872  }
  0x10   :  { %v468_v2 = vld [vmem:[%s4825_s4 + $0x1f8] sm:$0xff]  ;;  %2811 = vset.pattern.permute.xlu0 %v2868_v3  ;;  %1129 = vmatprep.subr.mxu0 %v402_v0  ;;  %v403_v5 = vld [vmem:[%s4823_s2 + $0x1f0] sm:$0xff]  ;;  %v398_v6 = vld [vmem:[%s4823_s2 + $0x1c8] sm:$0xff]  ;;  %vm2478_vm2 = vcmask 1046530   ;;  %vm2419_vm3 = vcmask 1041408   ;;  %vm2374_vm4 = vcmask 1044480  }
  0x11   :  { %2558 = vmatprep.subr.msk.mxu1 %vm855_vm0, %v404_v1  ;;  %797 = vperm.xlu0 %2811, %v468_v2   ;;  %v400_v7 = vld [vmem:[%s4823_s2 + $0x1d8] sm:$0xff]  ;;  %v397_v9 = vld [vmem:[%s4823_s2 + $0x1c0] sm:$0xff]  ;;  %v399_v10 = vld [vmem:[%s4823_s2 + $0x1d0] sm:$0xff]  ;;  %vm2417_vm5 = vcmask 1047557   ;;  %vm2436_vm6 = vcmask 1042432   ;;  %s2396_s26 = ssub.f32 1.0, %s4821_s0 }
  0x12   :  { %1130 = vmatpush1.xpose.msra.mxu0 %v401_v4  ;;  %1570 = vmatpush1.xpose.msra.mxu1 %v403_v5  ;;  %v452_v8 = vld [vmem:[%s4825_s4 + $0x178] sm:$0xff]  ;;  %v394_v11 = vld [vmem:[%s4823_s2 + $0x1a8] sm:$0xff]  ;;  %v467_v13 = vld [vmem:[%s4825_s4 + $0x1f0] sm:$0xff]  ;;  %s2653_s28 = sld [smem:[#allocation3 + $0x1]]  ;;  %vm2520_vm7 = vcmask 1040384   ;;  %s2869_s30 = smov [#allocation6]  }
  0x13   :  { %1131 = vmatprep.subr.mxu0 %v398_v6  ;;  %2559 = vmatprep.subr.msk.mxu1 %vm855_vm0, %v400_v7  ;;  %v396_v12 = vld [vmem:[%s4823_s2 + $0x1b8] sm:$0xff]  ;;  %v466_v14 = vld [vmem:[%s4825_s4 + $0x1e8] sm:$0xff]  ;;  %v451_v15 = vld [vmem:[%s4825_s4 + $0x170] sm:$0xff]  ;;  %s2654_s29 = sld [smem:[#allocation3 + $0x2]]  ;;  %s2549_s8 = sshll.u32 %s2869_s30, 4  ;;  %s2550_s8 = int_to_ptr.vmem [resolvable:$true] %s2549_s8 }
  0x14   :  { %2812 = vset.pattern.permute.xlu1 %v2868_v3  ;;  %v393_v16 = vld [vmem:[%s4823_s2 + $0x1a0] sm:$0xff]  ;;  %v395_v17 = vld [vmem:[%s4823_s2 + $0x1b0] sm:$0xff]  ;;  %v390_v18 = vld [vmem:[%s4823_s2 + $0x188] sm:$0xff]  ;;  %s2843_s9 = scalar_lea.vmem %s2550_s8, 64  ;;  %p2848_p6 = scmp.lt.s32.totalorder %s2550_s8, %s2550_s8 }
  0x15   :  { %717 = vperm.xlu0 %2811, %v452_v8   ;;  %792 = vperm.xlu1 %2812, %v467_v13   ;;  %v392_v19 = vld [vmem:[%s4823_s2 + $0x198] sm:$0xff]  ;;  %v450_v21 = vld [vmem:[%s4825_s4 + $0x168] sm:$0xff]  ;;  %v389_v22 = vld [vmem:[%s4823_s2 + $0x180] sm:$0xff]  ;;  %p2844_p5 = scmp.ne.s32.totalorder %s2550_s8, %s2843_s9  ;;  %p2849_p7 = scmp.lt.s32.totalorder %s2843_s9, %s2843_s9 }
  0x16   :  { %1132 = vmatpush1.xpose.msra.mxu0 %v397_v9  ;;  %1572 = vmatpush1.xpose.msra.mxu1 %v399_v10  ;;  %v436_v20 = vld [vmem:[%s4825_s4 + $0xf8] sm:$0xff]  ;;  %v391_v23 = vld [vmem:[%s4823_s2 + $0x190] sm:$0xff]  ;;  %v386_v24 = vld [vmem:[%s4823_s2 + $0x168] sm:$0xff] }
  0x17   :  { %1133 = vmatprep.subr.mxu0 %v394_v11  ;;  %2560 = vmatprep.subr.msk.mxu1 %vm855_vm0, %v396_v12  ;;  %v388_v25 = vld [vmem:[%s4823_s2 + $0x178] sm:$0xff]  ;;  %v465_v27 = vld [vmem:[%s4825_s4 + $0x1e0] sm:$0xff]  ;;  %v387_v29 = vld [vmem:[%s4823_s2 + $0x170] sm:$0xff]  ;;  %p2850_p8 = por %p2849_p7, %p2848_p6 }
  0x18   :  { %v420_v26 = vld [vmem:[%s4825_s4 + $0x78] sm:$0xff]  ;;  %v385_v28 = vld [vmem:[%s4823_s2 + $0x160] sm:$0xff]  ;;  %v382_v30 = vld [vmem:[%s4823_s2 + $0x148] sm:$0xff] }
  0x19   :  { %787 = vperm.xlu0 %2811, %v466_v14   ;;  %712 = vperm.xlu1 %2812, %v451_v15   ;;  %v384_v31 = vld [vmem:[%s4823_s2 + $0x158] sm:$0xff]  ;;  %v435_v32 = vld [vmem:[%s4825_s4 + $0xf0] sm:$0xff]  ;;  %v449_v33 = vld [vmem:[%s4825_s4 + $0x160] sm:$0xff]  ;;  %p2851_p9 = pnand %p2850_p8, %p2844_p5 }
  0x1a   :  { %1134 = vmatpush1.xpose.msra.mxu0 %v393_v16  ;;  %1574 = vmatpush1.xpose.msra.mxu1 %v395_v17  ;;  %v381_v34 = vld [vmem:[%s4823_s2 + $0x140] sm:$0xff]  ;;  %v383_v35 = vld [vmem:[%s4823_s2 + $0x150] sm:$0xff]  ;;  %v378_v36 = vld [vmem:[%s4823_s2 + $0x128] sm:$0xff] }
  0x1b   :  { %1135 = vmatprep.subr.mxu0 %v390_v18  ;;  %2561 = vmatprep.subr.msk.mxu1 %vm855_vm0, %v392_v19  ;;  %v380_v37 = vld [vmem:[%s4823_s2 + $0x138] sm:$0xff]  ;;  %v419_v38 = vld [vmem:[%s4825_s4 + $0x70] sm:$0xff]  ;;  %v377_v40 = vld [vmem:[%s4823_s2 + $0x120] sm:$0xff] }
  0x1c   :  { %v464_v39 = vld [vmem:[%s4825_s4 + $0x1d8] sm:$0xff]  ;;  %v379_v41 = vld [vmem:[%s4823_s2 + $0x130] sm:$0xff]  ;;  %v374_v42 = vld [vmem:[%s4823_s2 + $0x108] sm:$0xff] }
  0x1d   :  { %637 = vperm.xlu0 %2811, %v436_v20   ;;  %707 = vperm.xlu1 %2812, %v450_v21   ;;  %v376_v43 = vld [vmem:[%s4823_s2 + $0x118] sm:$0xff]  ;;  %v434_v44 = vld [vmem:[%s4825_s4 + $0xe8] sm:$0xff]  ;;  %v373_v46 = vld [vmem:[%s4823_s2 + $0x100] sm:$0xff] }
  0x1e   :  { %1136 = vmatpush1.xpose.msra.mxu0 %v389_v22  ;;  %1576 = vmatpush1.xpose.msra.mxu1 %v391_v23  ;;  %v448_v45 = vld [vmem:[%s4825_s4 + $0x158] sm:$0xff]  ;;  %v375_v47 = vld [vmem:[%s4823_s2 + $0x110] sm:$0xff]  ;;  %v370_v48 = vld [vmem:[%s4823_s2 + $0xe8] sm:$0xff] }
  0x1f   :  { %1137 = vmatprep.subr.mxu0 %v386_v24  ;;  %2562 = vmatprep.subr.msk.mxu1 %vm855_vm0, %v388_v25  ;;  %v372_v49 = vld [vmem:[%s4823_s2 + $0xf8] sm:$0xff]  ;;  %v418_v50 = vld [vmem:[%s4825_s4 + $0x68] sm:$0xff]  ;;  %v463_v51 = vld [vmem:[%s4825_s4 + $0x1d0] sm:$0xff] }
  0x20   :  { %v42_v52 = vld [vmem:[%s4824_s3 + $0x8] sm:$0xff]  ;;  %v44_v53 = vld [vmem:[%s4824_s3 + $0x18] sm:$0xff]  ;;  %v369_v54 = vld [vmem:[%s4823_s2 + $0xe0] sm:$0xff] }
  0x21   :  { %557 = vperm.xlu0 %2811, %v420_v26   ;;  %782 = vperm.xlu1 %2812, %v465_v27   ;;  %v371_v55 = vld [vmem:[%s4823_s2 + $0xf0] sm:$0xff]  ;;  %v366_v56 = vld [vmem:[%s4823_s2 + $0xc8] sm:$0xff]  ;;  %v368_v57 = vld [vmem:[%s4823_s2 + $0xd8] sm:$0xff] }
  0x22   :  { %1138 = vmatpush1.xpose.msra.mxu0 %v385_v28  ;;  %1578 = vmatpush1.xpose.msra.mxu1 %v387_v29  ;;  %v433_v58 = vld [vmem:[%s4825_s4 + $0xe0] sm:$0xff]  ;;  %v447_v59 = vld [vmem:[%s4825_s4 + $0x150] sm:$0xff]  ;;  %v362_v62 = vld [vmem:[%s4823_s2 + $0xa8] sm:$0xff] }
  0x23   :  { %1139 = vmatprep.subr.mxu0 %v382_v30  ;;  %2563 = vmatprep.subr.msk.mxu1 %vm855_vm0, %v384_v31  ;;  %v365_v60 = vld [vmem:[%s4823_s2 + $0xc0] sm:$0xff]  ;;  %v367_v61 = vld [vmem:[%s4823_s2 + $0xd0] sm:$0xff]  ;;  %v364_v63 = vld [vmem:[%s4823_s2 + $0xb8] sm:$0xff] }
  0x24   :  { %1193 = vmatprep.mubr.f32.mxu0 %v42_v52  ;;  %2574 = vmatprep.mubr.msk.f32.mxu1 %vm855_vm0, %v44_v53  ;;  %v417_v0 = vld [vmem:[%s4825_s4 + $0x60] sm:$0xff]  ;;  %v462_v1 = vld [vmem:[%s4825_s4 + $0x1c8] sm:$0xff]  ;;  %v363_v3 = vld [vmem:[%s4823_s2 + $0xb0] sm:$0xff] }
  0x25   :  { %632 = vperm.xlu0 %2811, %v435_v32   ;;  %702 = vperm.xlu1 %2812, %v449_v33   ;;  %v361_v2 = vld [vmem:[%s4823_s2 + $0xa0] sm:$0xff]  ;;  %v358_v4 = vld [vmem:[%s4823_s2 + $0x88] sm:$0xff]  ;;  %v360_v5 = vld [vmem:[%s4823_s2 + $0x98] sm:$0xff] }
  0x26   :  { %1140 = vmatpush1.xpose.msra.mxu0 %v381_v34  ;;  %1580 = vmatpush1.xpose.msra.mxu1 %v383_v35  ;;  %v432_v6 = vld [vmem:[%s4825_s4 + $0xd8] sm:$0xff]  ;;  %v446_v7 = vld [vmem:[%s4825_s4 + $0x148] sm:$0xff]  ;;  %v357_v8 = vld [vmem:[%s4823_s2 + $0x80] sm:$0xff] }
  0x27   :  { %1141 = vmatprep.subr.mxu0 %v378_v36  ;;  %2564 = vmatprep.subr.msk.mxu1 %vm855_vm0, %v380_v37  ;;  %v359_v9 = vld [vmem:[%s4823_s2 + $0x90] sm:$0xff]  ;;  %v354_v10 = vld [vmem:[%s4823_s2 + $0x68] sm:$0xff]  ;;  %v356_v11 = vld [vmem:[%s4823_s2 + $0x78] sm:$0xff] }
  0x28   :  { %v416_v12 = vld [vmem:[%s4825_s4 + $0x58] sm:$0xff]  ;;  %v461_v13 = vld [vmem:[%s4825_s4 + $0x1c0] sm:$0xff]  ;;  %v355_v15 = vld [vmem:[%s4823_s2 + $0x70] sm:$0xff] }
  0x29   :  { %552 = vperm.xlu0 %2811, %v419_v38   ;;  %777 = vperm.xlu1 %2812, %v464_v39   ;;  %v353_v14 = vld [vmem:[%s4823_s2 + $0x60] sm:$0xff]  ;;  %v350_v16 = vld [vmem:[%s4823_s2 + $0x48] sm:$0xff]  ;;  %v352_v17 = vld [vmem:[%s4823_s2 + $0x58] sm:$0xff] }
  0x2a   :  { %1142 = vmatpush1.xpose.msra.mxu0 %v377_v40  ;;  %1582 = vmatpush1.xpose.msra.mxu1 %v379_v41  ;;  %v431_v18 = vld [vmem:[%s4825_s4 + $0xd0] sm:$0xff]  ;;  %v445_v19 = vld [vmem:[%s4825_s4 + $0x140] sm:$0xff]  ;;  %v346_v22 = vld [vmem:[%s4823_s2 + $0x28] sm:$0xff] }
  0x2b   :  { %1143 = vmatprep.subr.mxu0 %v374_v42  ;;  %2565 = vmatprep.subr.msk.mxu1 %vm855_vm0, %v376_v43  ;;  %v349_v20 = vld [vmem:[%s4823_s2 + $0x40] sm:$0xff]  ;;  %v351_v21 = vld [vmem:[%s4823_s2 + $0x50] sm:$0xff]  ;;  %v348_v23 = vld [vmem:[%s4823_s2 + $0x38] sm:$0xff] }
  0x2c   :  { %v415_v24 = vld [vmem:[%s4825_s4 + $0x50] sm:$0xff]  ;;  %v460_v25 = vld [vmem:[%s4825_s4 + $0x1b8] sm:$0xff]  ;;  %v345_v26 = vld [vmem:[%s4823_s2 + $0x20] sm:$0xff] }
  0x2d   :  { %627 = vperm.xlu0 %2811, %v434_v44   ;;  %697 = vperm.xlu1 %2812, %v448_v45   ;;  %v347_v27 = vld [vmem:[%s4823_s2 + $0x30] sm:$0xff]  ;;  %v342_v28 = vld [vmem:[%s4823_s2 + $0x8] sm:$0xff]  ;;  %v344_v29 = vld [vmem:[%s4823_s2 + $0x18] sm:$0xff] }
  0x2e   :  { %1144 = vmatpush1.xpose.msra.mxu0 %v373_v46  ;;  %1584 = vmatpush1.xpose.msra.mxu1 %v375_v47  ;;  %v430_v30 = vld [vmem:[%s4825_s4 + $0xc8] sm:$0xff]  ;;  %v444_v31 = vld [vmem:[%s4825_s4 + $0x138] sm:$0xff]  ;;  %v341_v32 = vld [vmem:[%s4823_s2] sm:$0xff] }
  0x2f   :  { %1145 = vmatprep.subr.mxu0 %v370_v48  ;;  %2566 = vmatprep.subr.msk.mxu1 %vm855_vm0, %v372_v49  ;;  %v343_v33 = vld [vmem:[%s4823_s2 + $0x10] sm:$0xff]  ;;  %v41_v34 = vld [vmem:[%s4824_s3] sm:$0xff]  ;;  %v414_v36 = vld [vmem:[%s4825_s4 + $0x48] sm:$0xff] }
  0x30   :  { %v43_v35 = vld [vmem:[%s4824_s3 + $0x10] sm:$0xff]  ;;  %v46_v37 = vld [vmem:[%s4824_s3 + $0x28] sm:$0xff]  ;;  %v48_v38 = vld [vmem:[%s4824_s3 + $0x38] sm:$0xff] }
  0x31   :  { %547 = vperm.xlu0 %2811, %v418_v50   ;;  %772 = vperm.xlu1 %2812, %v463_v51   ;;  %v459_v39 = vld [vmem:[%s4825_s4 + $0x1b0] sm:$0xff]  ;;  %v45_v40 = vld [vmem:[%s4824_s3 + $0x20] sm:$0xff]  ;;  %v50_v43 = vld [vmem:[%s4824_s3 + $0x48] sm:$0xff] }
  0x32   :  { %1146 = vmatpush1.xpose.msra.mxu0 %v369_v54  ;;  %1586 = vmatpush1.xpose.msra.mxu1 %v371_v55  ;;  %v47_v41 = vld [vmem:[%s4824_s3 + $0x30] sm:$0xff]  ;;  %v429_v42 = vld [vmem:[%s4825_s4 + $0xc0] sm:$0xff]  ;;  %v52_v44 = vld [vmem:[%s4824_s3 + $0x58] sm:$0xff] }
  0x33   :  { %1147 = vmatprep.subr.mxu0 %v366_v56  ;;  %2567 = vmatprep.subr.msk.mxu1 %vm855_vm0, %v368_v57  ;;  %v443_v45 = vld [vmem:[%s4825_s4 + $0x130] sm:$0xff]  ;;  %v49_v46 = vld [vmem:[%s4824_s3 + $0x40] sm:$0xff]  ;;  %v54_v49 = vld [vmem:[%s4824_s3 + $0x68] sm:$0xff] }
  0x34   :  { %v51_v47 = vld [vmem:[%s4824_s3 + $0x50] sm:$0xff]  ;;  %v413_v48 = vld [vmem:[%s4825_s4 + $0x40] sm:$0xff]  ;;  %v56_v50 = vld [vmem:[%s4824_s3 + $0x78] sm:$0xff] }
  0x35   :  { %622 = vperm.xlu0 %2811, %v433_v58   ;;  %692 = vperm.xlu1 %2812, %v447_v59   ;;  %v458_v51 = vld [vmem:[%s4825_s4 + $0x1a8] sm:$0xff]  ;;  %v53_v52 = vld [vmem:[%s4824_s3 + $0x60] sm:$0xff]  ;;  %v55_v53 = vld [vmem:[%s4824_s3 + $0x70] sm:$0xff] }
  0x36   :  { %1148 = vmatpush1.xpose.msra.mxu0 %v365_v60  ;;  %1588 = vmatpush1.xpose.msra.mxu1 %v367_v61  ;;  %v428_v54 = vld [vmem:[%s4825_s4 + $0xb8] sm:$0xff]  ;;  %v58_v55 = vld [vmem:[%s4824_s3 + $0x88] sm:$0xff]  ;;  %v57_v58 = vld [vmem:[%s4824_s3 + $0x80] sm:$0xff] }
  0x37   :  { %1149 = vmatprep.subr.mxu0 %v362_v62  ;;  %2568 = vmatprep.subr.msk.mxu1 %vm855_vm0, %v364_v63  ;;  %v60_v56 = vld [vmem:[%s4824_s3 + $0x98] sm:$0xff]  ;;  %v442_v57 = vld [vmem:[%s4825_s4 + $0x128] sm:$0xff]  ;;  %v59_v59 = vld [vmem:[%s4824_s3 + $0x90] sm:$0xff] }
  0x38   :  { %v412_v60 = vld [vmem:[%s4825_s4 + $0x38] sm:$0xff]  ;;  %v62_v61 = vld [vmem:[%s4824_s3 + $0xa8] sm:$0xff]  ;;  %v457_v63 = vld [vmem:[%s4825_s4 + $0x1a0] sm:$0xff] }
  0x39   :  { %542 = vperm.xlu0 %2811, %v417_v0   ;;  %767 = vperm.xlu1 %2812, %v462_v1   ;;  %v64_v62 = vld [vmem:[%s4824_s3 + $0xb8] sm:$0xff]  ;;  %v61_v0 = vld [vmem:[%s4824_s3 + $0xa0] sm:$0xff]  ;;  %v63_v1 = vld [vmem:[%s4824_s3 + $0xb0] sm:$0xff] }
  0x3a   :  { %1150 = vmatpush1.xpose.msra.mxu0 %v361_v2  ;;  %1590 = vmatpush1.xpose.msra.mxu1 %v363_v3  ;;  %v427_v2 = vld [vmem:[%s4825_s4 + $0xb0] sm:$0xff]  ;;  %v66_v3 = vld [vmem:[%s4824_s3 + $0xc8] sm:$0xff] }
  0x3b   :  { %1151 = vmatprep.subr.mxu0 %v358_v4  ;;  %2569 = vmatprep.subr.msk.mxu1 %vm855_vm0, %v360_v5  ;;  %v68_v4 = vld [vmem:[%s4824_s3 + $0xd8] sm:$0xff]  ;;  %v441_v5 = vld [vmem:[%s4825_s4 + $0x120] sm:$0xff] }
  0x3d   :  { %617 = vperm.xlu0 %2811, %v432_v6   ;;  %687 = vperm.xlu1 %2812, %v446_v7   ;;  %v65_v6 = vld [vmem:[%s4824_s3 + $0xc0] sm:$0xff]  ;;  %v67_v7 = vld [vmem:[%s4824_s3 + $0xd0] sm:$0xff] }
  0x3e   :  { %1152 = vmatpush1.xpose.msra.mxu0 %v357_v8  ;;  %1592 = vmatpush1.xpose.msra.mxu1 %v359_v9  ;;  %v411_v8 = vld [vmem:[%s4825_s4 + $0x30] sm:$0xff]  ;;  %v70_v9 = vld [vmem:[%s4824_s3 + $0xe8] sm:$0xff] }
  0x3f   :  { %1153 = vmatprep.subr.mxu0 %v354_v10  ;;  %2570 = vmatprep.subr.msk.mxu1 %vm855_vm0, %v356_v11  ;;  %v72_v10 = vld [vmem:[%s4824_s3 + $0xf8] sm:$0xff] }
  0x40   :  { %v456_v11 = vld [vmem:[%s4825_s4 + $0x198] sm:$0xff] }
  0x41   :  { %537 = vperm.xlu0 %2811, %v416_v12   ;;  %762 = vperm.xlu1 %2812, %v461_v13   ;;  %v69_v12 = vld [vmem:[%s4824_s3 + $0xe0] sm:$0xff]  ;;  %v71_v13 = vld [vmem:[%s4824_s3 + $0xf0] sm:$0xff] }
  0x42   :  { %1154 = vmatpush1.xpose.msra.mxu0 %v353_v14  ;;  %1594 = vmatpush1.xpose.msra.mxu1 %v355_v15  ;;  %v426_v14 = vld [vmem:[%s4825_s4 + $0xa8] sm:$0xff] }
  0x43   :  { %1155 = vmatprep.subr.mxu0 %v350_v16  ;;  %2571 = vmatprep.subr.msk.mxu1 %vm855_vm0, %v352_v17  ;;  %v74_v15 = vld [vmem:[%s4824_s3 + $0x108] sm:$0xff]  ;;  %v76_v16 = vld [vmem:[%s4824_s3 + $0x118] sm:$0xff] }
  0x44   :  { %v440_v17 = vld [vmem:[%s4825_s4 + $0x118] sm:$0xff] }
  0x45   :  { %612 = vperm.xlu0 %2811, %v431_v18   ;;  %682 = vperm.xlu1 %2812, %v445_v19   ;;  %v73_v18 = vld [vmem:[%s4824_s3 + $0x100] sm:$0xff]  ;;  %v75_v19 = vld [vmem:[%s4824_s3 + $0x110] sm:$0xff] }
  0x46   :  { %1156 = vmatpush1.xpose.msra.mxu0 %v349_v20  ;;  %1596 = vmatpush1.xpose.msra.mxu1 %v351_v21  ;;  %v410_v20 = vld [vmem:[%s4825_s4 + $0x28] sm:$0xff] }
  0x47   :  { %1157 = vmatprep.subr.mxu0 %v346_v22  ;;  %2572 = vmatprep.subr.msk.mxu1 %vm855_vm0, %v348_v23  ;;  %v78_v21 = vld [vmem:[%s4824_s3 + $0x128] sm:$0xff]  ;;  %v80_v22 = vld [vmem:[%s4824_s3 + $0x138] sm:$0xff]  ;;  %v455_v23 = vld [vmem:[%s4825_s4 + $0x190] sm:$0xff] }
  0x49   :  { %532 = vperm.xlu0 %2811, %v415_v24   ;;  %757 = vperm.xlu1 %2812, %v460_v25   ;;  %v77_v24 = vld [vmem:[%s4824_s3 + $0x120] sm:$0xff]  ;;  %v79_v25 = vld [vmem:[%s4824_s3 + $0x130] sm:$0xff] }
  0x4a   :  { %1158 = vmatpush1.xpose.msra.mxu0 %v345_v26  ;;  %1598 = vmatpush1.xpose.msra.mxu1 %v347_v27  ;;  %v425_v26 = vld [vmem:[%s4825_s4 + $0xa0] sm:$0xff]  ;;  %v82_v27 = vld [vmem:[%s4824_s3 + $0x148] sm:$0xff] }
  0x4b   :  { %1159 = vmatprep.subr.mxu0 %v342_v28  ;;  %2573 = vmatprep.subr.msk.mxu1 %vm855_vm0, %v344_v29  ;;  %v84_v28 = vld [vmem:[%s4824_s3 + $0x158] sm:$0xff]  ;;  %v439_v29 = vld [vmem:[%s4825_s4 + $0x110] sm:$0xff] }
  0x4d   :  { %607 = vperm.xlu0 %2811, %v430_v30   ;;  %677 = vperm.xlu1 %2812, %v444_v31   ;;  %v81_v30 = vld [vmem:[%s4824_s3 + $0x140] sm:$0xff]  ;;  %v83_v31 = vld [vmem:[%s4824_s3 + $0x150] sm:$0xff] }
  0x4e   :  { %1160 = vmatpush1.xpose.msra.mxu0 %v341_v32  ;;  %1600 = vmatpush1.xpose.msra.mxu1 %v343_v33  ;;  %v409_v32 = vld [vmem:[%s4825_s4 + $0x20] sm:$0xff]  ;;  %v86_v33 = vld [vmem:[%s4824_s3 + $0x168] sm:$0xff] }
  0x51   :  { %1194 = vmatmul.mubr.f32.vlgmr.msra.gmra.mxu0 %v41_v34  ;;  %1634 = vmatmul.mubr.f32.vlgmr.msra.gmra.mxu1 %v43_v35  ;;  %v88_v34 = vld [vmem:[%s4824_s3 + $0x178] sm:$0xff]  ;;  %v454_v35 = vld [vmem:[%s4825_s4 + $0x188] sm:$0xff] }
  0x52   :  { %527 = vperm.xlu0 %2811, %v414_v36   ;;  %1198 = vmatprep.mubr.f32.mxu0 %v46_v37  ;;  %v85_v36 = vld [vmem:[%s4824_s3 + $0x160] sm:$0xff]  ;;  %v87_v37 = vld [vmem:[%s4824_s3 + $0x170] sm:$0xff] }
  0x53   :  { %2575 = vmatprep.mubr.msk.f32.mxu1 %vm855_vm0, %v48_v38  ;;  %752 = vperm.xlu1 %2812, %v459_v39   ;;  %v424_v38 = vld [vmem:[%s4825_s4 + $0x98] sm:$0xff]  ;;  %v90_v39 = vld [vmem:[%s4824_s3 + $0x188] sm:$0xff] }
  0x55   :  { %1199 = vmatmul.mubr.f32.gmra.mxu0 %v45_v40  ;;  %1639 = vmatmul.mubr.f32.gmra.mxu1 %v47_v41  ;;  %v92_v40 = vld [vmem:[%s4824_s3 + $0x198] sm:$0xff]  ;;  %v438_v41 = vld [vmem:[%s4825_s4 + $0x108] sm:$0xff] }
  0x56   :  { %602 = vperm.xlu0 %2811, %v429_v42   ;;  %1203 = vmatprep.mubr.f32.mxu0 %v50_v43  ;;  %v89_v42 = vld [vmem:[%s4824_s3 + $0x180] sm:$0xff]  ;;  %v91_v43 = vld [vmem:[%s4824_s3 + $0x190] sm:$0xff] }
  0x57   :  { %2576 = vmatprep.mubr.msk.f32.mxu1 %vm855_vm0, %v52_v44  ;;  %672 = vperm.xlu1 %2812, %v443_v45   ;;  %v408_v44 = vld [vmem:[%s4825_s4 + $0x18] sm:$0xff]  ;;  %v94_v45 = vld [vmem:[%s4824_s3 + $0x1a8] sm:$0xff] }
  0x59   :  { %1204 = vmatmul.mubr.f32.gmra.mxu0 %v49_v46  ;;  %1644 = vmatmul.mubr.f32.gmra.mxu1 %v51_v47  ;;  %v96_v46 = vld [vmem:[%s4824_s3 + $0x1b8] sm:$0xff]  ;;  %v453_v47 = vld [vmem:[%s4825_s4 + $0x180] sm:$0xff] }
  0x5a   :  { %522 = vperm.xlu0 %2811, %v413_v48   ;;  %1208 = vmatprep.mubr.f32.mxu0 %v54_v49  ;;  %v93_v48 = vld [vmem:[%s4824_s3 + $0x1a0] sm:$0xff]  ;;  %v95_v49 = vld [vmem:[%s4824_s3 + $0x1b0] sm:$0xff] }
  0x5b   :  { %2577 = vmatprep.mubr.msk.f32.mxu1 %vm855_vm0, %v56_v50  ;;  %747 = vperm.xlu1 %2812, %v458_v51   ;;  %v423_v50 = vld [vmem:[%s4825_s4 + $0x90] sm:$0xff]  ;;  %v98_v51 = vld [vmem:[%s4824_s3 + $0x1c8] sm:$0xff] }
  0x5d   :  { %1209 = vmatmul.mubr.f32.gmra.mxu0 %v53_v52  ;;  %1649 = vmatmul.mubr.f32.gmra.mxu1 %v55_v53  ;;  %v100_v52 = vld [vmem:[%s4824_s3 + $0x1d8] sm:$0xff]  ;;  %v437_v53 = vld [vmem:[%s4825_s4 + $0x100] sm:$0xff] }
  0x5e   :  { %597 = vperm.xlu0 %2811, %v428_v54   ;;  %1213 = vmatprep.mubr.f32.mxu0 %v58_v55  ;;  %v97_v54 = vld [vmem:[%s4824_s3 + $0x1c0] sm:$0xff]  ;;  %v99_v55 = vld [vmem:[%s4824_s3 + $0x1d0] sm:$0xff] }
  0x5f   :  { %2578 = vmatprep.mubr.msk.f32.mxu1 %vm855_vm0, %v60_v56  ;;  %667 = vperm.xlu1 %2812, %v442_v57   ;;  %v407_v56 = vld [vmem:[%s4825_s4 + $0x10] sm:$0xff]  ;;  %v102_v57 = vld [vmem:[%s4824_s3 + $0x1e8] sm:$0xff] }
  0x61   :  { %1214 = vmatmul.mubr.f32.gmra.mxu0 %v57_v58  ;;  %1654 = vmatmul.mubr.f32.gmra.mxu1 %v59_v59  ;;  %v104_v58 = vld [vmem:[%s4824_s3 + $0x1f8] sm:$0xff]  ;;  %v479_v59 = vld [vmem:[%s4825_s4 + $0x250] sm:$0xff] }
  0x62   :  { %517 = vperm.xlu0 %2811, %v412_v60   ;;  %1218 = vmatprep.mubr.f32.mxu0 %v62_v61  ;;  %v101_v60 = vld [vmem:[%s4824_s3 + $0x1e0] sm:$0xff]  ;;  %v103_v61 = vld [vmem:[%s4824_s3 + $0x1f0] sm:$0xff] }
  0x63   :  { %2579 = vmatprep.mubr.msk.f32.mxu1 %vm855_vm0, %v64_v62  ;;  %742 = vperm.xlu1 %2812, %v457_v63   ;;  %v478_v62 = vld [vmem:[%s4825_s4 + $0x248] sm:$0xff] }
  0x64   :  { %v106_v63 = vld [vmem:[%s4824_s3 + $0x208] sm:$0xff] }
  0x65   :  { %1219 = vmatmul.mubr.f32.gmra.mxu0 %v61_v0  ;;  %1659 = vmatmul.mubr.f32.gmra.mxu1 %v63_v1  ;;  %v108_v1 = vld [vmem:[%s4824_s3 + $0x218] sm:$0xff] }
  0x66   :  { %592 = vperm.xlu0 %2811, %v427_v2   ;;  %1223 = vmatprep.mubr.f32.mxu0 %v66_v3  ;;  %v422_v2 = vld [vmem:[%s4825_s4 + $0x88] sm:$0xff]  ;;  %v105_v3 = vld [vmem:[%s4824_s3 + $0x200] sm:$0xff] }
  0x67   :  { %2580 = vmatprep.mubr.msk.f32.mxu1 %vm855_vm0, %v68_v4  ;;  %662 = vperm.xlu1 %2812, %v441_v5   ;;  %v107_v4 = vld [vmem:[%s4824_s3 + $0x210] sm:$0xff]  ;;  %v421_v5 = vld [vmem:[%s4825_s4 + $0x80] sm:$0xff] }
  0x69   :  { %1224 = vmatmul.mubr.f32.gmra.mxu0 %v65_v6  ;;  %1664 = vmatmul.mubr.f32.gmra.mxu1 %v67_v7  ;;  %v110_v6 = vld [vmem:[%s4824_s3 + $0x228] sm:$0xff] }
  0x6a   :  { %512 = vperm.xlu0 %2811, %v411_v8   ;;  %1228 = vmatprep.mubr.f32.mxu0 %v70_v9  ;;  %v112_v8 = vld [vmem:[%s4824_s3 + $0x238] sm:$0xff] }
  0x6b   :  { %2581 = vmatprep.mubr.msk.f32.mxu1 %vm855_vm0, %v72_v10  ;;  %737 = vperm.xlu1 %2812, %v456_v11   ;;  %v406_v10 = vld [vmem:[%s4825_s4 + $0x8] sm:$0xff]  ;;  %v109_v11 = vld [vmem:[%s4824_s3 + $0x220] sm:$0xff] }
  0x6d   :  { %1229 = vmatmul.mubr.f32.gmra.mxu0 %v69_v12  ;;  %1669 = vmatmul.mubr.f32.gmra.mxu1 %v71_v13  ;;  %v111_v12 = vld [vmem:[%s4824_s3 + $0x230] sm:$0xff]  ;;  %v405_v13 = vld [vmem:[%s4825_s4] sm:$0xff] }
  0x6e   :  { %587 = vperm.xlu0 %2811, %v426_v14   ;;  %1233 = vmatprep.mubr.f32.mxu0 %v74_v15  ;;  %v114_v14 = vld [vmem:[%s4824_s3 + $0x248] sm:$0xff] }
  0x6f   :  { %2582 = vmatprep.mubr.msk.f32.mxu1 %vm855_vm0, %v76_v16  ;;  %657 = vperm.xlu1 %2812, %v440_v17   ;;  %v116_v16 = vld [vmem:[%s4824_s3 + $0x258] sm:$0xff] }
  0x71   :  { %1234 = vmatmul.mubr.f32.gmra.mxu0 %v73_v18  ;;  %1674 = vmatmul.mubr.f32.gmra.mxu1 %v75_v19  ;;  %v113_v18 = vld [vmem:[%s4824_s3 + $0x240] sm:$0xff]  ;;  %v115_v19 = vld [vmem:[%s4824_s3 + $0x250] sm:$0xff] }
  0x72   :  { %507 = vperm.xlu0 %2811, %v410_v20   ;;  %1238 = vmatprep.mubr.f32.mxu0 %v78_v21  ;;  %v118_v20 = vld [vmem:[%s4824_s3 + $0x268] sm:$0xff]  ;;  %v120_v21 = vld [vmem:[%s4824_s3 + $0x278] sm:$0xff] }
  0x73   :  { %2583 = vmatprep.mubr.msk.f32.mxu1 %vm855_vm0, %v80_v22  ;;  %732 = vperm.xlu1 %2812, %v455_v23  }
  0x75   :  { %1239 = vmatmul.mubr.f32.gmra.mxu0 %v77_v24  ;;  %1679 = vmatmul.mubr.f32.gmra.mxu1 %v79_v25  ;;  %v117_v24 = vld [vmem:[%s4824_s3 + $0x260] sm:$0xff]  ;;  %v119_v25 = vld [vmem:[%s4824_s3 + $0x270] sm:$0xff] }
  0x76   :  { %582 = vperm.xlu0 %2811, %v425_v26   ;;  %1243 = vmatprep.mubr.f32.mxu0 %v82_v27  ;;  %v122_v26 = vld [vmem:[%s4824_s3 + $0x288] sm:$0xff]  ;;  %v124_v27 = vld [vmem:[%s4824_s3 + $0x298] sm:$0xff] }
  0x77   :  { %2584 = vmatprep.mubr.msk.f32.mxu1 %vm855_vm0, %v84_v28  ;;  %652 = vperm.xlu1 %2812, %v439_v29  }
  0x79   :  { %1244 = vmatmul.mubr.f32.gmra.mxu0 %v81_v30  ;;  %1684 = vmatmul.mubr.f32.gmra.mxu1 %v83_v31  ;;  %v121_v30 = vld [vmem:[%s4824_s3 + $0x280] sm:$0xff]  ;;  %v123_v31 = vld [vmem:[%s4824_s3 + $0x290] sm:$0xff] }
  0x7a   :  { %502 = vperm.xlu0 %2811, %v409_v32   ;;  %1248 = vmatprep.mubr.f32.mxu0 %v86_v33  ;;  %v126_v32 = vld [vmem:[%s4824_s3 + $0x2a8] sm:$0xff]  ;;  %v128_v33 = vld [vmem:[%s4824_s3 + $0x2b8] sm:$0xff] }
  0x7b   :  { %2585 = vmatprep.mubr.msk.f32.mxu1 %vm855_vm0, %v88_v34  ;;  %727 = vperm.xlu1 %2812, %v454_v35  }
  0x7d   :  { %1249 = vmatmul.mubr.f32.gmra.mxu0 %v85_v36  ;;  %1689 = vmatmul.mubr.f32.gmra.mxu1 %v87_v37  ;;  %v125_v36 = vld [vmem:[%s4824_s3 + $0x2a0] sm:$0xff]  ;;  %v127_v37 = vld [vmem:[%s4824_s3 + $0x2b0] sm:$0xff] }
  0x7e   :  { %577 = vperm.xlu0 %2811, %v424_v38   ;;  %1253 = vmatprep.mubr.f32.mxu0 %v90_v39  ;;  %v130_v38 = vld [vmem:[%s4824_s3 + $0x2c8] sm:$0xff]  ;;  %v132_v39 = vld [vmem:[%s4824_s3 + $0x2d8] sm:$0xff] }
  0x7f   :  { %2586 = vmatprep.mubr.msk.f32.mxu1 %vm855_vm0, %v92_v40  ;;  %647 = vperm.xlu1 %2812, %v438_v41  }
  0x81   :  { %1254 = vmatmul.mubr.f32.gmra.mxu0 %v89_v42  ;;  %1694 = vmatmul.mubr.f32.gmra.mxu1 %v91_v43  ;;  %v129_v42 = vld [vmem:[%s4824_s3 + $0x2c0] sm:$0xff]  ;;  %v131_v43 = vld [vmem:[%s4824_s3 + $0x2d0] sm:$0xff] }
  0x82   :  { %497 = vperm.xlu0 %2811, %v408_v44   ;;  %1258 = vmatprep.mubr.f32.mxu0 %v94_v45  ;;  %v134_v44 = vld [vmem:[%s4824_s3 + $0x2e8] sm:$0xff]  ;;  %v136_v45 = vld [vmem:[%s4824_s3 + $0x2f8] sm:$0xff] }
  0x83   :  { %2587 = vmatprep.mubr.msk.f32.mxu1 %vm855_vm0, %v96_v46  ;;  %722 = vperm.xlu1 %2812, %v453_v47  }
  0x85   :  { %1259 = vmatmul.mubr.f32.gmra.mxu0 %v93_v48  ;;  %1699 = vmatmul.mubr.f32.gmra.mxu1 %v95_v49  ;;  %v133_v48 = vld [vmem:[%s4824_s3 + $0x2e0] sm:$0xff]  ;;  %v135_v49 = vld [vmem:[%s4824_s3 + $0x2f0] sm:$0xff] }
  0x86   :  { %572 = vperm.xlu0 %2811, %v423_v50   ;;  %1263 = vmatprep.mubr.f32.mxu0 %v98_v51  ;;  %v138_v50 = vld [vmem:[%s4824_s3 + $0x308] sm:$0xff]  ;;  %v140_v51 = vld [vmem:[%s4824_s3 + $0x318] sm:$0xff] }
  0x87   :  { %2588 = vmatprep.mubr.msk.f32.mxu1 %vm855_vm0, %v100_v52  ;;  %642 = vperm.xlu1 %2812, %v437_v53  }
  0x89   :  { %1264 = vmatmul.mubr.f32.gmra.mxu0 %v97_v54  ;;  %1704 = vmatmul.mubr.f32.gmra.mxu1 %v99_v55  ;;  %v477_v54 = vld [vmem:[%s4825_s4 + $0x240] sm:$0xff] }
  0x8a   :  { %492 = vperm.xlu0 %2811, %v407_v56   ;;  %1268 = vmatprep.mubr.f32.mxu0 %v102_v57  ;;  %v137_v55 = vld [vmem:[%s4824_s3 + $0x300] sm:$0xff]  ;;  %v139_v56 = vld [vmem:[%s4824_s3 + $0x310] sm:$0xff]  ;;  %v142_v57 = vld [vmem:[%s4824_s3 + $0x328] sm:$0xff] }
  0x8b   :  { %2589 = vmatprep.mubr.msk.f32.mxu1 %vm855_vm0, %v104_v58  ;;  %852 = vperm.xlu1 %2812, %v479_v59   ;;  %v144_v58 = vld [vmem:[%s4824_s3 + $0x338] sm:$0xff] }
  0x8c   :  { %v3518_v0 = vpop.permute.xlu0 %797 }
  0x8d   :  { %4829 = vst [vmem:[#allocation9_spill] sm:$0xff] %v3518_v0  ;;  %1269 = vmatmul.mubr.f32.gmra.mxu0 %v101_v60  ;;  %1709 = vmatmul.mubr.f32.gmra.mxu1 %v103_v61  ;;  %v476_v61 = vld [vmem:[%s4825_s4 + $0x238] sm:$0xff] }
  0x8e   :  { %847 = vperm.xlu0 %2811, %v478_v62   ;;  %1273 = vmatprep.mubr.f32.mxu0 %v106_v63  ;;  %v141_v62 = vld [vmem:[%s4824_s3 + $0x320] sm:$0xff]  ;;  %v143_v63 = vld [vmem:[%s4824_s3 + $0x330] sm:$0xff] }
  0x8f   :  { %2590 = vmatprep.mubr.msk.f32.mxu1 %vm855_vm0, %v108_v1  ;;  %567 = vperm.xlu1 %2812, %v422_v2   ;;  %v475_v1 = vld [vmem:[%s4825_s4 + $0x230] sm:$0xff]  ;;  %v146_v2 = vld [vmem:[%s4824_s3 + $0x348] sm:$0xff] }
  0x90   :  { %v3539_v7 = vpop.permute.xlu0 %717  ;;  %v3544_v9 = vpop.permute.xlu1 %792 }
  0x91   :  { %4830 = vst [vmem:[#allocation10_spill] sm:$0xff] %v3539_v7  ;;  %4831 = vst [vmem:[#allocation11_spill] sm:$0xff] %v3544_v9  ;;  %1274 = vmatmul.mubr.f32.gmra.mxu0 %v105_v3  ;;  %1714 = vmatmul.mubr.f32.gmra.mxu1 %v107_v4  ;;  %v148_v3 = vld [vmem:[%s4824_s3 + $0x358] sm:$0xff] }
  0x92   :  { %562 = vperm.xlu0 %2811, %v421_v5   ;;  %1278 = vmatprep.mubr.f32.mxu0 %v110_v6  ;;  %v474_v6 = vld [vmem:[%s4825_s4 + $0x228] sm:$0xff] }
  0x93   :  { %2591 = vmatprep.mubr.msk.f32.mxu1 %vm855_vm0, %v112_v8  ;;  %487 = vperm.xlu1 %2812, %v406_v10   ;;  %v145_v8 = vld [vmem:[%s4824_s3 + $0x340] sm:$0xff]  ;;  %v147_v10 = vld [vmem:[%s4824_s3 + $0x350] sm:$0xff] }
  0x94   :  { %v3562_v15 = vpop.permute.xlu0 %787  ;;  %v3567_v17 = vpop.permute.xlu1 %712 }
  0x95   :  { %4832 = vst [vmem:[#allocation12_spill] sm:$0xff] %v3562_v15  ;;  %4833 = vst [vmem:[#allocation13_spill] sm:$0xff] %v3567_v17  ;;  %1279 = vmatmul.mubr.f32.gmra.mxu0 %v109_v11  ;;  %1719 = vmatmul.mubr.f32.gmra.mxu1 %v111_v12  ;;  %v473_v11 = vld [vmem:[%s4825_s4 + $0x220] sm:$0xff]  ;;  %v150_v12 = vld [vmem:[%s4824_s3 + $0x368] sm:$0xff] }
  0x96   :  { %482 = vperm.xlu0 %2811, %v405_v13   ;;  %1283 = vmatprep.mubr.f32.mxu0 %v114_v14  ;;  %v152_v13 = vld [vmem:[%s4824_s3 + $0x378] sm:$0xff] }
  0x97   :  { %2592 = vmatprep.mubr.msk.f32.mxu1 %vm855_vm0, %v116_v16  ;;  %842 = vperm.xlu1 %2812, %v477_v54   ;;  %v163_v54 = vld [vmem:[%s4824_s3 + $0x3d0] sm:$0xff] }
  0x98   :  { %v3582_v22 = vpop.permute.xlu0 %637  ;;  %v3584_v23 = vpop.permute.xlu1 %707 }
  0x99   :  { %4834 = vst [vmem:[#allocation14_spill] sm:$0xff] %v3584_v23  ;;  %1284 = vmatmul.mubr.f32.gmra.mxu0 %v113_v18  ;;  %1724 = vmatmul.mubr.f32.gmra.mxu1 %v115_v19  ;;  %v472_v18 = vld [vmem:[%s4825_s4 + $0x218] sm:$0xff]  ;;  %v149_v19 = vld [vmem:[%s4824_s3 + $0x360] sm:$0xff] }
  0x9a   :  { %1288 = vmatprep.mubr.f32.mxu0 %v118_v20  ;;  %2593 = vmatprep.mubr.msk.f32.mxu1 %vm855_vm0, %v120_v21  ;;  %v151_v20 = vld [vmem:[%s4824_s3 + $0x370] sm:$0xff] }
  0x9b   :  { %832 = vperm.xlu0 %2811, %v475_v1   ;;  %837 = vperm.xlu1 %2812, %v476_v61   ;;  %v471_v21 = vld [vmem:[%s4825_s4 + $0x210] sm:$0xff]  ;;  %v165_v61 = vld [vmem:[%s4824_s3 + $0x3e0] sm:$0xff]  ;;  %v172_v1 = vld [vmem:[%s4824_s3 + $0x418] sm:$0xff] }
  0x9c   :  { %v3599_v28 = vpop.permute.xlu0 %557  ;;  %v3601_v29 = vpop.permute.xlu1 %782 }
  0x9d   :  { %4835 = vst [vmem:[#allocation15_spill] sm:$0xff] %v3601_v29  ;;  %1289 = vmatmul.mubr.f32.gmra.mxu0 %v117_v24  ;;  %1729 = vmatmul.mubr.f32.gmra.mxu1 %v119_v25  ;;  %v154_v24 = vld [vmem:[%s4824_s3 + $0x388] sm:$0xff]  ;;  %v156_v25 = vld [vmem:[%s4824_s3 + $0x398] sm:$0xff]  ;;  %v239_v29 = vld [vmem:[%s4824_s3 + $0x630] sm:$0xff] }
  0x9e   :  { %1293 = vmatprep.mubr.f32.mxu0 %v122_v26  ;;  %2594 = vmatprep.mubr.msk.f32.mxu1 %vm855_vm0, %v124_v27 }
  0x9f   :  { %822 = vperm.xlu0 %2811, %v473_v11   ;;  %827 = vperm.xlu1 %2812, %v474_v6   ;;  %v171_v6 = vld [vmem:[%s4824_s3 + $0x410] sm:$0xff]  ;;  %v176_v11 = vld [vmem:[%s4824_s3 + $0x438] sm:$0xff] }
  0xa0   :  { %v3616_v34 = vpop.permute.xlu0 %632  ;;  %v3618_v35 = vpop.permute.xlu1 %702 }
  0xa1   :  { %4836 = vst [vmem:[#allocation16_spill] sm:$0xff] %v3618_v35  ;;  %1294 = vmatmul.mubr.f32.gmra.mxu0 %v121_v30  ;;  %1734 = vmatmul.mubr.f32.gmra.mxu1 %v123_v31  ;;  %v470_v30 = vld [vmem:[%s4825_s4 + $0x208] sm:$0xff]  ;;  %v153_v31 = vld [vmem:[%s4824_s3 + $0x380] sm:$0xff] }
  0xa2   :  { %1298 = vmatprep.mubr.f32.mxu0 %v126_v32  ;;  %2595 = vmatprep.mubr.msk.f32.mxu1 %vm855_vm0, %v128_v33  ;;  %v155_v32 = vld [vmem:[%s4824_s3 + $0x390] sm:$0xff]  ;;  %v469_v33 = vld [vmem:[%s4825_s4 + $0x200] sm:$0xff] }
  0xa3   :  { %812 = vperm.xlu0 %2811, %v471_v21   ;;  %817 = vperm.xlu1 %2812, %v472_v18   ;;  %v175_v18 = vld [vmem:[%s4824_s3 + $0x430] sm:$0xff]  ;;  %v180_v21 = vld [vmem:[%s4824_s3 + $0x458] sm:$0xff] }
  0xa4   :  { %v3633_v40 = vpop.permute.xlu0 %552  ;;  %v3635_v41 = vpop.permute.xlu1 %777 }
  0xa5   :  { %4837 = vst [vmem:[#allocation17_spill] sm:$0xff] %v3635_v41  ;;  %1299 = vmatmul.mubr.f32.gmra.mxu0 %v125_v36  ;;  %1739 = vmatmul.mubr.f32.gmra.mxu1 %v127_v37  ;;  %v158_v36 = vld [vmem:[%s4824_s3 + $0x3a8] sm:$0xff]  ;;  %v160_v37 = vld [vmem:[%s4824_s3 + $0x3b8] sm:$0xff]  ;;  %v237_v41 = vld [vmem:[%s4824_s3 + $0x620] sm:$0xff] }
  0xa6   :  { %1303 = vmatprep.mubr.f32.mxu0 %v130_v38  ;;  %2596 = vmatprep.mubr.msk.f32.mxu1 %vm855_vm0, %v132_v39 }
  0xa7   :  { %802 = vperm.xlu0 %2811, %v469_v33   ;;  %807 = vperm.xlu1 %2812, %v470_v30   ;;  %v179_v30 = vld [vmem:[%s4824_s3 + $0x450] sm:$0xff]  ;;  %v184_v33 = vld [vmem:[%s4824_s3 + $0x478] sm:$0xff] }
  0xa8   :  { %v3650_v46 = vpop.permute.xlu0 %627  ;;  %v3652_v47 = vpop.permute.xlu1 %697 }
  0xa9   :  { %4838 = vst [vmem:[#allocation18_spill] sm:$0xff] %v3652_v47  ;;  %1304 = vmatmul.mubr.f32.gmra.mxu0 %v129_v42  ;;  %1744 = vmatmul.mubr.f32.gmra.mxu1 %v131_v43  ;;  %v2373_v42 = vld [vmem:[%s4827_s6] sm:$0x1f] }
  0xaa   :  { %1308 = vmatprep.mubr.f32.mxu0 %v134_v44  ;;  %2597 = vmatprep.mubr.msk.f32.mxu1 %vm855_vm0, %v136_v45  ;;  %v157_v43 = vld [vmem:[%s4824_s3 + $0x3a0] sm:$0xff]  ;;  %v159_v44 = vld [vmem:[%s4824_s3 + $0x3b0] sm:$0xff]  ;;  %v162_v45 = vld [vmem:[%s4824_s3 + $0x3c8] sm:$0xff] }
  0xab   :  { %2403 = vperm.xlu1 %2812, %v2373_v42   ;;  %v183_v42 = vld [vmem:[%s4824_s3 + $0x470] sm:$0xff] }
  0xac   :  { %v3667_v52 = vpop.permute.xlu0 %547  ;;  %v3669_v53 = vpop.permute.xlu1 %772 }
  0xad   :  { %4839 = vst [vmem:[#allocation19_spill] sm:$0xff] %v3669_v53  ;;  %1309 = vmatmul.mubr.f32.gmra.mxu0 %v133_v48  ;;  %1749 = vmatmul.mubr.f32.gmra.mxu1 %v135_v49  ;;  %v164_v48 = vld [vmem:[%s4824_s3 + $0x3d8] sm:$0xff] }
  0xae   :  { %1313 = vmatprep.mubr.f32.mxu0 %v138_v50  ;;  %2598 = vmatprep.mubr.msk.f32.mxu1 %vm855_vm0, %v140_v51  ;;  %v161_v51 = vld [vmem:[%s4824_s3 + $0x3c0] sm:$0xff] }
  0xb0   :  { %v3687_v59 = vpop.permute.xlu0 %622  ;;  %v3689_v60 = vpop.permute.xlu1 %692 }
  0xb1   :  { %4840 = vst [vmem:[#allocation20_spill] sm:$0xff] %v3689_v60  ;;  %1314 = vmatmul.mubr.f32.gmra.mxu0 %v137_v55  ;;  %1754 = vmatmul.mubr.f32.gmra.mxu1 %v139_v56  ;;  %v166_v55 = vld [vmem:[%s4824_s3 + $0x3e8] sm:$0xff]  ;;  %v168_v56 = vld [vmem:[%s4824_s3 + $0x3f8] sm:$0xff] }
  0xb2   :  { %1318 = vmatprep.mubr.f32.mxu0 %v142_v57  ;;  %2599 = vmatprep.mubr.msk.f32.mxu1 %vm855_vm0, %v144_v58 }
  0xb4   :  { %v3710_v4 = vpop.permute.xlu0 %542  ;;  %v3712_v5 = vpop.permute.xlu1 %767 }
  0xb5   :  { %4841 = vst [vmem:[#allocation21_spill] sm:$0xff] %v3712_v5  ;;  %1319 = vmatmul.mubr.f32.gmra.mxu0 %v141_v62  ;;  %1759 = vmatmul.mubr.f32.gmra.mxu1 %v143_v63  ;;  %v167_v62 = vld [vmem:[%s4824_s3 + $0x3f0] sm:$0xff]  ;;  %v170_v63 = vld [vmem:[%s4824_s3 + $0x408] sm:$0xff] }
  0xb6   :  { %1323 = vmatprep.mubr.f32.mxu0 %v146_v2  ;;  %2600 = vmatprep.mubr.msk.f32.mxu1 %vm855_vm0, %v148_v3  ;;  %v169_v3 = vld [vmem:[%s4824_s3 + $0x400] sm:$0xff]  ;;  %v234_v5 = vld [vmem:[%s4824_s3 + $0x608] sm:$0xff] }
  0xb8   :  { %v3733_v14 = vpop.permute.xlu0 %617  ;;  %v3735_v16 = vpop.permute.xlu1 %687 }
  0xb9   :  { %4842 = vst [vmem:[#allocation22_spill] sm:$0xff] %v3735_v16  ;;  %1324 = vmatmul.mubr.f32.gmra.mxu0 %v145_v8  ;;  %1764 = vmatmul.mubr.f32.gmra.mxu1 %v147_v10  ;;  %v174_v10 = vld [vmem:[%s4824_s3 + $0x428] sm:$0xff] }
  0xba   :  { %1328 = vmatprep.mubr.f32.mxu0 %v150_v12  ;;  %2601 = vmatprep.mubr.msk.f32.mxu1 %vm855_vm0, %v152_v13  ;;  %v173_v13 = vld [vmem:[%s4824_s3 + $0x420] sm:$0xff] }
  0xbc   :  { %v3756_v26 = vpop.permute.xlu0 %537  ;;  %v3758_v27 = vpop.permute.xlu1 %762 }
  0xbd   :  { %4843 = vst [vmem:[#allocation23_spill] sm:$0xff] %v3758_v27  ;;  %1329 = vmatmul.mubr.f32.gmra.mxu0 %v149_v19  ;;  %1769 = vmatmul.mubr.f32.gmra.mxu1 %v151_v20  ;;  %v178_v20 = vld [vmem:[%s4824_s3 + $0x448] sm:$0xff]  ;;  %v231_v27 = vld [vmem:[%s4824_s3 + $0x5f0] sm:$0xff] }
  0xbe   :  { %1333 = vmatprep.mubr.f32.mxu0 %v154_v24  ;;  %2602 = vmatprep.mubr.msk.f32.mxu1 %vm855_vm0, %v156_v25  ;;  %v177_v25 = vld [vmem:[%s4824_s3 + $0x440] sm:$0xff] }
  0xc0   :  { %v3779_v38 = vpop.permute.xlu0 %612  ;;  %v3781_v39 = vpop.permute.xlu1 %682 }
  0xc1   :  { %4844 = vst [vmem:[#allocation24_spill] sm:$0xff] %v3781_v39  ;;  %1334 = vmatmul.mubr.f32.gmra.mxu0 %v153_v31  ;;  %1774 = vmatmul.mubr.f32.gmra.mxu1 %v155_v32  ;;  %v182_v32 = vld [vmem:[%s4824_s3 + $0x468] sm:$0xff] }
  0xc2   :  { %1338 = vmatprep.mubr.f32.mxu0 %v158_v36  ;;  %2603 = vmatprep.mubr.msk.f32.mxu1 %vm855_vm0, %v160_v37  ;;  %v181_v37 = vld [vmem:[%s4824_s3 + $0x460] sm:$0xff] }
  0xc4   :  { %v3799_v49 = vpop.permute.xlu0 %532  ;;  %v3801_v50 = vpop.permute.xlu1 %757 }
  0xc5   :  { %4845 = vst [vmem:[#allocation25_spill] sm:$0xff] %v3801_v50  ;;  %1339 = vmatmul.mubr.f32.gmra.mxu0 %v157_v43  ;;  %1779 = vmatmul.mubr.f32.gmra.mxu1 %v159_v44  ;;  %v186_v44 = vld [vmem:[%s4824_s3 + $0x488] sm:$0xff] }
  0xc6   :  { %1343 = vmatprep.mubr.f32.mxu0 %v162_v45  ;;  %2604 = vmatprep.mubr.msk.f32.mxu1 %vm855_vm0, %v164_v48  ;;  %v188_v45 = vld [vmem:[%s4824_s3 + $0x498] sm:$0xff]  ;;  %v230_v50 = vld [vmem:[%s4824_s3 + $0x5e8] sm:$0xff] }
  0xc8   :  { %v3816_v57 = vpop.permute.xlu0 %607  ;;  %v3818_v58 = vpop.permute.xlu1 %677 }
  0xc9   :  { %4846 = vst [vmem:[#allocation26_spill] sm:$0xff] %v3818_v58  ;;  %1344 = vmatmul.mubr.f32.gmra.mxu0 %v161_v51  ;;  %1784 = vmatmul.mubr.f32.gmra.mxu1 %v163_v54  ;;  %v185_v51 = vld [vmem:[%s4824_s3 + $0x480] sm:$0xff]  ;;  %v187_v54 = vld [vmem:[%s4824_s3 + $0x490] sm:$0xff] }
  0xca   :  { %1348 = vmatprep.mubr.f32.mxu0 %v166_v55  ;;  %2605 = vmatprep.mubr.msk.f32.mxu1 %vm855_vm0, %v168_v56  ;;  %v190_v56 = vld [vmem:[%s4824_s3 + $0x4a8] sm:$0xff] }
  0xcd   :  { %v3833_v2 = vpop.permute.xlu0 %527  ;;  %1349 = vmatmul.mubr.f32.gmra.mxu0 %v165_v61  ;;  %1789 = vmatmul.mubr.f32.gmra.mxu1 %v167_v62  ;;  %v192_v61 = vld [vmem:[%s4824_s3 + $0x4b8] sm:$0xff] }
  0xce   :  { %1353 = vmatprep.mubr.f32.mxu0 %v170_v63  ;;  %2606 = vmatprep.mubr.msk.f32.mxu1 %vm855_vm0, %v172_v1  ;;  %v3842_v8 = vpop.permute.xlu1 %752  ;;  %v189_v63 = vld [vmem:[%s4824_s3 + $0x4a0] sm:$0xff]  ;;  %v191_v1 = vld [vmem:[%s4824_s3 + $0x4b0] sm:$0xff] }
  0xcf   :  { %4847 = vst [vmem:[#allocation27_spill] sm:$0xff] %v3842_v8  ;;  %v226_v8 = vld [vmem:[%s4824_s3 + $0x5c8] sm:$0xff] }
  0xd1   :  { %v3850_v12 = vpop.permute.xlu0 %602  ;;  %1354 = vmatmul.mubr.f32.gmra.mxu0 %v169_v3  ;;  %1794 = vmatmul.mubr.f32.gmra.mxu1 %v171_v6  ;;  %v194_v6 = vld [vmem:[%s4824_s3 + $0x4c8] sm:$0xff] }
  0xd2   :  { %1358 = vmatprep.mubr.f32.mxu0 %v174_v10  ;;  %2607 = vmatprep.mubr.msk.f32.mxu1 %vm855_vm0, %v176_v11  ;;  %v3859_v19 = vpop.permute.xlu1 %672  ;;  %v196_v10 = vld [vmem:[%s4824_s3 + $0x4d8] sm:$0xff] }
  0xd3   :  { %4848 = vst [vmem:[#allocation28_spill] sm:$0xff] %v3859_v19 }
  0xd5   :  { %v3867_v24 = vpop.permute.xlu0 %522  ;;  %1359 = vmatmul.mubr.f32.gmra.mxu0 %v173_v13  ;;  %1799 = vmatmul.mubr.f32.gmra.mxu1 %v175_v18  ;;  %v193_v13 = vld [vmem:[%s4824_s3 + $0x4c0] sm:$0xff]  ;;  %v195_v18 = vld [vmem:[%s4824_s3 + $0x4d0] sm:$0xff] }
  0xd6   :  { %1363 = vmatprep.mubr.f32.mxu0 %v178_v20  ;;  %2608 = vmatprep.mubr.msk.f32.mxu1 %vm855_vm0, %v180_v21  ;;  %v3876_v31 = vpop.permute.xlu1 %747  ;;  %v198_v21 = vld [vmem:[%s4824_s3 + $0x4e8] sm:$0xff] }
  0xd7   :  { %4849 = vst [vmem:[#allocation29_spill] sm:$0xff] %v3876_v31 }
  0xd9   :  { %v3884_v36 = vpop.permute.xlu0 %597  ;;  %1364 = vmatmul.mubr.f32.gmra.mxu0 %v177_v25  ;;  %1804 = vmatmul.mubr.f32.gmra.mxu1 %v179_v30  ;;  %v200_v25 = vld [vmem:[%s4824_s3 + $0x4f8] sm:$0xff] }
  0xda   :  { %1368 = vmatprep.mubr.f32.mxu0 %v182_v32  ;;  %2609 = vmatprep.mubr.msk.f32.mxu1 %vm855_vm0, %v184_v33  ;;  %v3893_v43 = vpop.permute.xlu1 %667  ;;  %v197_v32 = vld [vmem:[%s4824_s3 + $0x4e0] sm:$0xff]  ;;  %v199_v33 = vld [vmem:[%s4824_s3 + $0x4f0] sm:$0xff] }
  0xdd   :  { %v3901_v48 = vpop.permute.xlu0 %517  ;;  %1369 = vmatmul.mubr.f32.gmra.mxu0 %v181_v37  ;;  %1809 = vmatmul.mubr.f32.gmra.mxu1 %v183_v42  ;;  %v202_v42 = vld [vmem:[%s4824_s3 + $0x508] sm:$0xff] }
  0xde   :  { %1373 = vmatprep.mubr.f32.mxu0 %v186_v44  ;;  %2610 = vmatprep.mubr.msk.f32.mxu1 %vm855_vm0, %v188_v45  ;;  %v3910_v55 = vpop.permute.xlu1 %742  ;;  %v204_v44 = vld [vmem:[%s4824_s3 + $0x518] sm:$0xff] }
  0xdf   :  { %4850 = vst [vmem:[#allocation30_spill] sm:$0xff] %v3910_v55  ;;  %v243_v55 = vld [vmem:[%s4824_s3 + $0x650] sm:$0xff] }
  0xe1   :  { %v3918_v62 = vpop.permute.xlu0 %592  ;;  %1374 = vmatmul.mubr.f32.gmra.mxu0 %v185_v51  ;;  %1814 = vmatmul.mubr.f32.gmra.mxu1 %v187_v54  ;;  %v201_v51 = vld [vmem:[%s4824_s3 + $0x500] sm:$0xff]  ;;  %v203_v54 = vld [vmem:[%s4824_s3 + $0x510] sm:$0xff] }
  0xe2   :  { %1378 = vmatprep.mubr.f32.mxu0 %v190_v56  ;;  %2611 = vmatprep.mubr.msk.f32.mxu1 %vm855_vm0, %v192_v61  ;;  %v3927_v3 = vpop.permute.xlu1 %662  ;;  %v206_v61 = vld [vmem:[%s4824_s3 + $0x528] sm:$0xff] }
  0xe5   :  { %v3935_v11 = vpop.permute.xlu0 %512  ;;  %1379 = vmatmul.mubr.f32.gmra.mxu0 %v189_v63  ;;  %1819 = vmatmul.mubr.f32.gmra.mxu1 %v191_v1  ;;  %v208_v63 = vld [vmem:[%s4824_s3 + $0x538] sm:$0xff] }
  0xe6   :  { %1383 = vmatprep.mubr.f32.mxu0 %v194_v6  ;;  %2612 = vmatprep.mubr.msk.f32.mxu1 %vm855_vm0, %v196_v10  ;;  %v3944_v20 = vpop.permute.xlu1 %737  ;;  %v205_v6 = vld [vmem:[%s4824_s3 + $0x520] sm:$0xff]  ;;  %v207_v10 = vld [vmem:[%s4824_s3 + $0x530] sm:$0xff] }
  0xe7   :  { %4851 = vst [vmem:[#allocation31_spill] sm:$0xff] %v3944_v20 }
  0xe9   :  { %v3952_v30 = vpop.permute.xlu0 %587  ;;  %1384 = vmatmul.mubr.f32.gmra.mxu0 %v193_v13  ;;  %1824 = vmatmul.mubr.f32.gmra.mxu1 %v195_v18  ;;  %v210_v18 = vld [vmem:[%s4824_s3 + $0x548] sm:$0xff] }
  0xea   :  { %1388 = vmatprep.mubr.f32.mxu0 %v198_v21  ;;  %2613 = vmatprep.mubr.msk.f32.mxu1 %vm855_vm0, %v200_v25  ;;  %v3961_v37 = vpop.permute.xlu1 %657  ;;  %v212_v21 = vld [vmem:[%s4824_s3 + $0x558] sm:$0xff] }
  0xed   :  { %v3969_v45 = vpop.permute.xlu0 %507  ;;  %1389 = vmatmul.mubr.f32.gmra.mxu0 %v197_v32  ;;  %1829 = vmatmul.mubr.f32.gmra.mxu1 %v199_v33  ;;  %v209_v32 = vld [vmem:[%s4824_s3 + $0x540] sm:$0xff]  ;;  %v211_v33 = vld [vmem:[%s4824_s3 + $0x550] sm:$0xff] }
  0xee   :  { %1393 = vmatprep.mubr.f32.mxu0 %v202_v42  ;;  %2614 = vmatprep.mubr.msk.f32.mxu1 %vm855_vm0, %v204_v44  ;;  %v3978_v56 = vpop.permute.xlu1 %732  ;;  %v214_v44 = vld [vmem:[%s4824_s3 + $0x568] sm:$0xff] }
  0xef   :  { %4852 = vst [vmem:[#allocation32_spill] sm:$0xff] %v3978_v56 }
  0xf1   :  { %v3986_v1 = vpop.permute.xlu0 %582  ;;  %1394 = vmatmul.mubr.f32.gmra.mxu0 %v201_v51  ;;  %1834 = vmatmul.mubr.f32.gmra.mxu1 %v203_v54  ;;  %v216_v51 = vld [vmem:[%s4824_s3 + $0x578] sm:$0xff] }
  0xf2   :  { %1398 = vmatprep.mubr.f32.mxu0 %v206_v61  ;;  %2615 = vmatprep.mubr.msk.f32.mxu1 %vm855_vm0, %v208_v63  ;;  %v3995_v13 = vpop.permute.xlu1 %652  ;;  %v213_v61 = vld [vmem:[%s4824_s3 + $0x560] sm:$0xff]  ;;  %v215_v63 = vld [vmem:[%s4824_s3 + $0x570] sm:$0xff] }
  0xf5   :  { %v4003_v25 = vpop.permute.xlu0 %502  ;;  %1399 = vmatmul.mubr.f32.gmra.mxu0 %v205_v6  ;;  %1839 = vmatmul.mubr.f32.gmra.mxu1 %v207_v10  ;;  %v218_v10 = vld [vmem:[%s4824_s3 + $0x588] sm:$0xff] }
  0xf6   :  { %1403 = vmatprep.mubr.f32.mxu0 %v210_v18  ;;  %2616 = vmatprep.mubr.msk.f32.mxu1 %vm855_vm0, %v212_v21  ;;  %v4012_v42 = vpop.permute.xlu1 %727  ;;  %v220_v18 = vld [vmem:[%s4824_s3 + $0x598] sm:$0xff] }
  0xf7   :  { %4853 = vst [vmem:[#allocation33_spill] sm:$0xff] %v4012_v42 }
  0xf9   :  { %v4020_v54 = vpop.permute.xlu0 %577  ;;  %1404 = vmatmul.mubr.f32.gmra.mxu0 %v209_v32  ;;  %1844 = vmatmul.mubr.f32.gmra.mxu1 %v211_v33  ;;  %v217_v32 = vld [vmem:[%s4824_s3 + $0x580] sm:$0xff]  ;;  %v219_v33 = vld [vmem:[%s4824_s3 + $0x590] sm:$0xff] }
  0xfa   :  { %1408 = vmatprep.mubr.f32.mxu0 %v214_v44  ;;  %2617 = vmatprep.mubr.msk.f32.mxu1 %vm855_vm0, %v216_v51  ;;  %v4029_v6 = vpop.permute.xlu1 %647  ;;  %v222_v51 = vld [vmem:[%s4824_s3 + $0x5a8] sm:$0xff] }
  0xfd   :  { %v4037_v21 = vpop.permute.xlu0 %497  ;;  %1409 = vmatmul.mubr.f32.gmra.mxu0 %v213_v61  ;;  %1849 = vmatmul.mubr.f32.gmra.mxu1 %v215_v63  ;;  %v224_v61 = vld [vmem:[%s4824_s3 + $0x5b8] sm:$0xff] }
  0xfe   :  { %1413 = vmatprep.mubr.f32.mxu0 %v218_v10  ;;  %2618 = vmatprep.mubr.msk.f32.mxu1 %vm855_vm0, %v220_v18  ;;  %v4046_v44 = vpop.permute.xlu1 %722  ;;  %v221_v10 = vld [vmem:[%s4824_s3 + $0x5a0] sm:$0xff]  ;;  %v223_v18 = vld [vmem:[%s4824_s3 + $0x5b0] sm:$0xff] }
  0xff   :  { %4854 = vst [vmem:[#allocation34_spill] sm:$0xff] %v4046_v44 }
 0x101   :  { %v4054_v63 = vpop.permute.xlu0 %572  ;;  %1414 = vmatmul.mubr.f32.gmra.mxu0 %v217_v32  ;;  %1854 = vmatmul.mubr.f32.gmra.mxu1 %v219_v33  ;;  %v228_v32 = vld [vmem:[%s4824_s3 + $0x5d8] sm:$0xff] }
 0x102   :  { %1418 = vmatprep.mubr.f32.mxu0 %v222_v51  ;;  %2619 = vmatprep.mubr.msk.f32.mxu1 %vm855_vm0, %v224_v61  ;;  %v4063_v31 = vpop.permute.xlu1 %642  ;;  %v225_v51 = vld [vmem:[%s4824_s3 + $0x5c0] sm:$0xff]  ;;  %v227_v61 = vld [vmem:[%s4824_s3 + $0x5d0] sm:$0xff] }
 0x105   :  { %v493_v33 = vpop.permute.xlu0 %492  ;;  %1419 = vmatmul.mubr.f32.gmra.mxu0 %v221_v10  ;;  %1859 = vmatmul.mubr.f32.gmra.mxu1 %v223_v18  ;;  %v232_v10 = vld [vmem:[%s4824_s3 + $0x5f8] sm:$0xff] }
 0x106   :  { %1423 = vmatprep.mubr.f32.mxu0 %v226_v8  ;;  %2620 = vmatprep.mubr.msk.f32.mxu1 %vm855_vm0, %v228_v32  ;;  %v4084_v18 = vpop.permute.xlu1 %852  ;;  %v229_v32 = vld [vmem:[%s4824_s3 + $0x5e0] sm:$0xff] }
 0x107   :  { %4855 = vst [vmem:[#allocation35_spill] sm:$0xff] %v4084_v18  ;;  %v235_v18 = vld [vmem:[%s4824_s3 + $0x610] sm:$0xff] }
 0x109   :  { %v4086_v8 = vpop.permute.xlu0 %847  ;;  %1424 = vmatmul.mubr.f32.gmra.mxu0 %v225_v51  ;;  %1864 = vmatmul.mubr.f32.gmra.mxu1 %v227_v61  ;;  %v236_v51 = vld [vmem:[%s4824_s3 + $0x618] sm:$0xff] }
 0x10a   :  { %4856 = vst [vmem:[#allocation36_spill] sm:$0xff] %v4086_v8  ;;  %1428 = vmatprep.mubr.f32.mxu0 %v230_v50  ;;  %2621 = vmatprep.mubr.msk.f32.mxu1 %vm855_vm0, %v232_v10  ;;  %v4103_v50 = vpop.permute.xlu1 %567  ;;  %v233_v10 = vld [vmem:[%s4824_s3 + $0x600] sm:$0xff]  ;;  %v238_v8 = vld [vmem:[%s4824_s3 + $0x628] sm:$0xff] }
 0x10d   :  { %v4101_v61 = vpop.permute.xlu0 %562  ;;  %1429 = vmatmul.mubr.f32.gmra.mxu0 %v229_v32  ;;  %1869 = vmatmul.mubr.f32.gmra.mxu1 %v231_v27  ;;  %v240_v27 = vld [vmem:[%s4824_s3 + $0x638] sm:$0xff] }
 0x10e   :  { %1433 = vmatprep.mubr.f32.mxu0 %v234_v5  ;;  %2622 = vmatprep.mubr.msk.f32.mxu1 %vm855_vm0, %v236_v51  ;;  %v488_v15 = vpop.permute.xlu1 %487 }
 0x111   :  { %v483_v32 = vpop.permute.xlu0 %482  ;;  %v1195_v5 = vpop.f32.mrf.mxu0  ;;  %1434 = vmatmul.mubr.f32.gmra.mxu0 %v233_v10  ;;  %1874 = vmatmul.mubr.f32.gmra.mxu1 %v235_v18  ;;  %v242_v10 = vld [vmem:[%s4824_s3 + $0x648] sm:$0xff]  ;;  %v244_v18 = vld [vmem:[%s4824_s3 + $0x658] sm:$0xff] }
 0x112   :  { %v1196_v51 = vadd.f32 %v1195_v5, %v483_v32  ;;  %v1635_v53 = vpop.f32.mrf.mxu1  ;;  %1438 = vmatprep.mubr.f32.mxu0 %v238_v8  ;;  %2623 = vmatprep.mubr.msk.f32.mxu1 %vm855_vm0, %v240_v27 }
 0x113   :  { %v1197_v0 = vpop.f32.mrf.mxu0 }
 0x114   :  { %v4131_v8 = vadd.f32 %v1635_v53, %v1196_v51  ;;  %v1637_v27 = vpop.f32.mrf.mxu1  ;;  %v241_v0 = vld [vmem:[%s4824_s3 + $0x640] sm:$0xff]  ;;  %v246_v53 = vld [vmem:[%s4824_s3 + $0x668] sm:$0xff] }
 0x115   :  { %v1200_v32 = vpop.f32.mrf.mxu0  ;;  %1439 = vmatmul.mubr.f32.gmra.mxu0 %v237_v41  ;;  %1879 = vmatmul.mubr.f32.gmra.mxu1 %v239_v29  ;;  %v247_v27 = vld [vmem:[%s4824_s3 + $0x670] sm:$0xff] }
 0x116   :  { %4857 = vst [vmem:[#allocation37_spill] sm:$0xff] %v4131_v8  ;;  %v1201_v5 = vadd.f32 %v1200_v32, %v488_v15  ;;  %v1640_v9 = vpop.f32.mrf.mxu1  ;;  %1443 = vmatprep.mubr.f32.mxu0 %v242_v10  ;;  %2624 = vmatprep.mubr.msk.f32.mxu1 %vm855_vm0, %v244_v18  ;;  %v248_v15 = vld [vmem:[%s4824_s3 + $0x678] sm:$0xff] }
 0x117   :  { %v1202_v20 = vpop.f32.mrf.mxu0 }
 0x118   :  { %v4146_v29 = vadd.f32 %v1640_v9, %v1201_v5  ;;  %v1642_v41 = vpop.f32.mrf.mxu1  ;;  %v245_v20 = vld [vmem:[%s4824_s3 + $0x660] sm:$0xff]  ;;  %v250_v9 = vld [vmem:[%s4824_s3 + $0x688] sm:$0xff] }
 0x119   :  { %v1205_v51 = vpop.f32.mrf.mxu0  ;;  %1444 = vmatmul.mubr.f32.gmra.mxu0 %v241_v0  ;;  %1884 = vmatmul.mubr.f32.gmra.mxu1 %v243_v55  ;;  %v252_v55 = vld [vmem:[%s4824_s3 + $0x698] sm:$0xff]  ;;  %v249_v41 = vld [vmem:[%s4824_s3 + $0x680] sm:$0xff] }
 0x11a   :  { %4858 = vst [vmem:[#allocation38_spill] sm:$0xff] %v4146_v29  ;;  %v1206_v10 = vadd.f32 %v1205_v51, %v493_v33  ;;  %v1645_v18 = vpop.f32.mrf.mxu1  ;;  %1448 = vmatprep.mubr.f32.mxu0 %v246_v53  ;;  %2625 = vmatprep.mubr.msk.f32.mxu1 %vm855_vm0, %v248_v15  ;;  %v251_v51 = vld [vmem:[%s4824_s3 + $0x690] sm:$0xff] }
 0x11b   :  { %v1207_v32 = vpop.f32.mrf.mxu0 }
 0x11c   :  { %v4161_v33 = vadd.f32 %v1645_v18, %v1206_v10  ;;  %v1647_v5 = vpop.f32.mrf.mxu1  ;;  %v254_v18 = vld [vmem:[%s4824_s3 + $0x6a8] sm:$0xff] }
 0x11d   :  { %v1210_v0 = vpop.f32.mrf.mxu0  ;;  %1449 = vmatmul.mubr.f32.gmra.mxu0 %v245_v20  ;;  %1889 = vmatmul.mubr.f32.gmra.mxu1 %v247_v27  ;;  %v253_v5 = vld [vmem:[%s4824_s3 + $0x6a0] sm:$0xff] }
 0x11e   :  { %4859 = vst [vmem:[#allocation39_spill] sm:$0xff] %v4161_v33  ;;  %v1211_v53 = vadd.f32 %v1210_v0, %v4037_v21  ;;  %v1650_v15 = vpop.f32.mrf.mxu1  ;;  %1453 = vmatprep.mubr.f32.mxu0 %v250_v9  ;;  %2626 = vmatprep.mubr.msk.f32.mxu1 %vm855_vm0, %v252_v55  ;;  %v256_v21 = vld [vmem:[%s4824_s3 + $0x6b8] sm:$0xff]  ;;  %v255_v0 = vld [vmem:[%s4824_s3 + $0x6b0] sm:$0xff] }
 0x11f   :  { %v1212_v10 = vpop.f32.mrf.mxu0 }
 0x120   :  { %v4177_v20 = vadd.f32 %v1650_v15, %v1211_v53  ;;  %v1652_v27 = vpop.f32.mrf.mxu1  ;;  %v258_v15 = vld [vmem:[%s4824_s3 + $0x6c8] sm:$0xff] }
 0x121   :  { %v1215_v32 = vpop.f32.mrf.mxu0  ;;  %1454 = vmatmul.mubr.f32.gmra.mxu0 %v249_v41  ;;  %1894 = vmatmul.mubr.f32.gmra.mxu1 %v251_v51  ;;  %v257_v27 = vld [vmem:[%s4824_s3 + $0x6c0] sm:$0xff] }
 0x122   :  { %4860 = vst [vmem:[#allocation40_spill] sm:$0xff] %v4177_v20  ;;  %v1216_v9 = vadd.f32 %v1215_v32, %v4003_v25  ;;  %v1655_v55 = vpop.f32.mrf.mxu1  ;;  %1458 = vmatprep.mubr.f32.mxu0 %v254_v18  ;;  %2627 = vmatprep.mubr.msk.f32.mxu1 %vm855_vm0, %v256_v21  ;;  %v260_v25 = vld [vmem:[%s4824_s3 + $0x6d8] sm:$0xff]  ;;  %v259_v32 = vld [vmem:[%s4824_s3 + $0x6d0] sm:$0xff] }
 0x123   :  { %v1217_v53 = vpop.f32.mrf.mxu0 }
 0x124   :  { %v4193_v41 = vadd.f32 %v1655_v55, %v1216_v9  ;;  %v1657_v51 = vpop.f32.mrf.mxu1  ;;  %v262_v55 = vld [vmem:[%s4824_s3 + $0x6e8] sm:$0xff] }
 0x125   :  { %v1220_v10 = vpop.f32.mrf.mxu0  ;;  %1459 = vmatmul.mubr.f32.gmra.mxu0 %v253_v5  ;;  %1899 = vmatmul.mubr.f32.gmra.mxu1 %v255_v0  ;;  %v261_v51 = vld [vmem:[%s4824_s3 + $0x6e0] sm:$0xff] }
 0x126   :  { %4861 = vst [vmem:[#allocation41_spill] sm:$0xff] %v4193_v41  ;;  %v1221_v18 = vadd.f32 %v1220_v10, %v3969_v45  ;;  %v1660_v21 = vpop.f32.mrf.mxu1  ;;  %1463 = vmatprep.mubr.f32.mxu0 %v258_v15  ;;  %2628 = vmatprep.mubr.msk.f32.mxu1 %vm855_vm0, %v260_v25  ;;  %v264_v45 = vld [vmem:[%s4824_s3 + $0x6f8] sm:$0xff]  ;;  %v263_v10 = vld [vmem:[%s4824_s3 + $0x6f0] sm:$0xff] }
 0x127   :  { %v1222_v9 = vpop.f32.mrf.mxu0 }
 0x128   :  { %v4209_v5 = vadd.f32 %v1660_v21, %v1221_v18  ;;  %v1662_v0 = vpop.f32.mrf.mxu1  ;;  %v266_v21 = vld [vmem:[%s4824_s3 + $0x708] sm:$0xff] }
 0x129   :  { %v1225_v53 = vpop.f32.mrf.mxu0  ;;  %1464 = vmatmul.mubr.f32.gmra.mxu0 %v257_v27  ;;  %1904 = vmatmul.mubr.f32.gmra.mxu1 %v259_v32  ;;  %v265_v0 = vld [vmem:[%s4824_s3 + $0x700] sm:$0xff] }
 0x12a   :  { %v1226_v15 = vadd.f32 %v1225_v53, %v3935_v11  ;;  %v1665_v25 = vpop.f32.mrf.mxu1  ;;  %1468 = vmatprep.mubr.f32.mxu0 %v262_v55  ;;  %2629 = vmatprep.mubr.msk.f32.mxu1 %vm855_vm0, %v264_v45  ;;  %v268_v11 = vld [vmem:[%s4824_s3 + $0x718] sm:$0xff]  ;;  %v267_v53 = vld [vmem:[%s4824_s3 + $0x710] sm:$0xff] }
 0x12b   :  { %v1227_v18 = vpop.f32.mrf.mxu0 }
 0x12c   :  { %v4225_v27 = vadd.f32 %v1665_v25, %v1226_v15  ;;  %v1667_v32 = vpop.f32.mrf.mxu1  ;;  %v270_v25 = vld [vmem:[%s4824_s3 + $0x728] sm:$0xff] }
 0x12d   :  { %v1230_v9 = vpop.f32.mrf.mxu0  ;;  %1469 = vmatmul.mubr.f32.gmra.mxu0 %v261_v51  ;;  %1909 = vmatmul.mubr.f32.gmra.mxu1 %v263_v10  ;;  %v269_v32 = vld [vmem:[%s4824_s3 + $0x720] sm:$0xff] }
 0x12e   :  { %v1231_v55 = vadd.f32 %v1230_v9, %v3901_v48  ;;  %v1670_v45 = vpop.f32.mrf.mxu1  ;;  %1473 = vmatprep.mubr.f32.mxu0 %v266_v21  ;;  %2630 = vmatprep.mubr.msk.f32.mxu1 %vm855_vm0, %v268_v11  ;;  %v272_v48 = vld [vmem:[%s4824_s3 + $0x738] sm:$0xff]  ;;  %v271_v9 = vld [vmem:[%s4824_s3 + $0x730] sm:$0xff] }
 0x12f   :  { %v1232_v15 = vpop.f32.mrf.mxu0 }
 0x130   :  { %v4241_v51 = vadd.f32 %v1670_v45, %v1231_v55  ;;  %v1672_v10 = vpop.f32.mrf.mxu1  ;;  %v274_v45 = vld [vmem:[%s4824_s3 + $0x748] sm:$0xff] }
 0x131   :  { %v1235_v18 = vpop.f32.mrf.mxu0  ;;  %1474 = vmatmul.mubr.f32.gmra.mxu0 %v265_v0  ;;  %1914 = vmatmul.mubr.f32.gmra.mxu1 %v267_v53  ;;  %v273_v10 = vld [vmem:[%s4824_s3 + $0x740] sm:$0xff] }
 0x132   :  { %v1236_v21 = vadd.f32 %v1235_v18, %v3867_v24  ;;  %v1675_v11 = vpop.f32.mrf.mxu1  ;;  %1478 = vmatprep.mubr.f32.mxu0 %v270_v25  ;;  %2631 = vmatprep.mubr.msk.f32.mxu1 %vm855_vm0, %v272_v48  ;;  %v276_v24 = vld [vmem:[%s4824_s3 + $0x758] sm:$0xff]  ;;  %v275_v18 = vld [vmem:[%s4824_s3 + $0x750] sm:$0xff] }
 0x133   :  { %v1237_v55 = vpop.f32.mrf.mxu0 }
 0x134   :  { %v4257_v0 = vadd.f32 %v1675_v11, %v1236_v21  ;;  %v1677_v53 = vpop.f32.mrf.mxu1  ;;  %v278_v11 = vld [vmem:[%s4824_s3 + $0x768] sm:$0xff] }
 0x135   :  { %v1240_v15 = vpop.f32.mrf.mxu0  ;;  %1479 = vmatmul.mubr.f32.gmra.mxu0 %v269_v32  ;;  %1919 = vmatmul.mubr.f32.gmra.mxu1 %v271_v9  ;;  %v277_v53 = vld [vmem:[%s4824_s3 + $0x760] sm:$0xff] }
 0x136   :  { %v1241_v25 = vadd.f32 %v1240_v15, %v3833_v2  ;;  %v1680_v48 = vpop.f32.mrf.mxu1  ;;  %1483 = vmatprep.mubr.f32.mxu0 %v274_v45  ;;  %2632 = vmatprep.mubr.msk.f32.mxu1 %vm855_vm0, %v276_v24  ;;  %v280_v2 = vld [vmem:[%s4824_s3 + $0x778] sm:$0xff]  ;;  %v279_v15 = vld [vmem:[%s4824_s3 + $0x770] sm:$0xff] }
 0x137   :  { %v1242_v21 = vpop.f32.mrf.mxu0 }
 0x138   :  { %v4273_v32 = vadd.f32 %v1680_v48, %v1241_v25  ;;  %v1682_v9 = vpop.f32.mrf.mxu1  ;;  %v282_v48 = vld [vmem:[%s4824_s3 + $0x788] sm:$0xff] }
 0x139   :  { %v1245_v55 = vpop.f32.mrf.mxu0  ;;  %1484 = vmatmul.mubr.f32.gmra.mxu0 %v273_v10  ;;  %1924 = vmatmul.mubr.f32.gmra.mxu1 %v275_v18  ;;  %v281_v9 = vld [vmem:[%s4824_s3 + $0x780] sm:$0xff] }
 0x13a   :  { %v1246_v45 = vadd.f32 %v1245_v55, %v3799_v49  ;;  %v1685_v24 = vpop.f32.mrf.mxu1  ;;  %1488 = vmatprep.mubr.f32.mxu0 %v278_v11  ;;  %2633 = vmatprep.mubr.msk.f32.mxu1 %vm855_vm0, %v280_v2  ;;  %v284_v49 = vld [vmem:[%s4824_s3 + $0x798] sm:$0xff]  ;;  %v283_v55 = vld [vmem:[%s4824_s3 + $0x790] sm:$0xff] }
 0x13b   :  { %v1247_v25 = vpop.f32.mrf.mxu0 }
 0x13c   :  { %v4289_v10 = vadd.f32 %v1685_v24, %v1246_v45  ;;  %v1687_v18 = vpop.f32.mrf.mxu1  ;;  %v286_v24 = vld [vmem:[%s4824_s3 + $0x7a8] sm:$0xff] }
 0x13d   :  { %v1250_v21 = vpop.f32.mrf.mxu0  ;;  %1489 = vmatmul.mubr.f32.gmra.mxu0 %v277_v53  ;;  %1929 = vmatmul.mubr.f32.gmra.mxu1 %v279_v15  ;;  %v285_v18 = vld [vmem:[%s4824_s3 + $0x7a0] sm:$0xff] }
 0x13e   :  { %v1251_v11 = vadd.f32 %v1250_v21, %v3756_v26  ;;  %v1690_v2 = vpop.f32.mrf.mxu1  ;;  %1493 = vmatprep.mubr.f32.mxu0 %v282_v48  ;;  %2634 = vmatprep.mubr.msk.f32.mxu1 %vm855_vm0, %v284_v49  ;;  %v288_v26 = vld [vmem:[%s4824_s3 + $0x7b8] sm:$0xff]  ;;  %v287_v21 = vld [vmem:[%s4824_s3 + $0x7b0] sm:$0xff] }
 0x13f   :  { %v1252_v45 = vpop.f32.mrf.mxu0 }
 0x140   :  { %v4305_v53 = vadd.f32 %v1690_v2, %v1251_v11  ;;  %v1692_v15 = vpop.f32.mrf.mxu1  ;;  %v290_v2 = vld [vmem:[%s4824_s3 + $0x7c8] sm:$0xff] }
 0x141   :  { %v1255_v25 = vpop.f32.mrf.mxu0  ;;  %1494 = vmatmul.mubr.f32.gmra.mxu0 %v281_v9  ;;  %1934 = vmatmul.mubr.f32.gmra.mxu1 %v283_v55  ;;  %v289_v15 = vld [vmem:[%s4824_s3 + $0x7c0] sm:$0xff] }
 0x142   :  { %v1256_v48 = vadd.f32 %v1255_v25, %v3710_v4  ;;  %v1695_v49 = vpop.f32.mrf.mxu1  ;;  %1498 = vmatprep.mubr.f32.mxu0 %v286_v24  ;;  %2635 = vmatprep.mubr.msk.f32.mxu1 %vm855_vm0, %v288_v26  ;;  %v292_v4 = vld [vmem:[%s4824_s3 + $0x7d8] sm:$0xff]  ;;  %v291_v25 = vld [vmem:[%s4824_s3 + $0x7d0] sm:$0xff] }
 0x143   :  { %v1257_v11 = vpop.f32.mrf.mxu0 }
 0x144   :  { %v4321_v9 = vadd.f32 %v1695_v49, %v1256_v48  ;;  %v1697_v55 = vpop.f32.mrf.mxu1  ;;  %v294_v49 = vld [vmem:[%s4824_s3 + $0x7e8] sm:$0xff] }
 0x145   :  { %v1260_v45 = vpop.f32.mrf.mxu0  ;;  %1499 = vmatmul.mubr.f32.gmra.mxu0 %v285_v18  ;;  %1939 = vmatmul.mubr.f32.gmra.mxu1 %v287_v21  ;;  %v293_v55 = vld [vmem:[%s4824_s3 + $0x7e0] sm:$0xff] }
 0x146   :  { %v1261_v24 = vadd.f32 %v1260_v45, %v3667_v52  ;;  %v1700_v26 = vpop.f32.mrf.mxu1  ;;  %1503 = vmatprep.mubr.f32.mxu0 %v290_v2  ;;  %2636 = vmatprep.mubr.msk.f32.mxu1 %vm855_vm0, %v292_v4  ;;  %v296_v52 = vld [vmem:[%s4824_s3 + $0x7f8] sm:$0xff]  ;;  %v295_v45 = vld [vmem:[%s4824_s3 + $0x7f0] sm:$0xff] }
 0x147   :  { %v1262_v48 = vpop.f32.mrf.mxu0 }
 0x148   :  { %v4337_v18 = vadd.f32 %v1700_v26, %v1261_v24  ;;  %v1702_v21 = vpop.f32.mrf.mxu1  ;;  %v298_v26 = vld [vmem:[%s4824_s3 + $0x808] sm:$0xff] }
 0x149   :  { %v1265_v11 = vpop.f32.mrf.mxu0  ;;  %1504 = vmatmul.mubr.f32.gmra.mxu0 %v289_v15  ;;  %1944 = vmatmul.mubr.f32.gmra.mxu1 %v291_v25  ;;  %v297_v21 = vld [vmem:[%s4824_s3 + $0x800] sm:$0xff] }
 0x14a   :  { %v1266_v2 = vadd.f32 %v1265_v11, %v3633_v40  ;;  %v1705_v4 = vpop.f32.mrf.mxu1  ;;  %1508 = vmatprep.mubr.f32.mxu0 %v294_v49  ;;  %2637 = vmatprep.mubr.msk.f32.mxu1 %vm855_vm0, %v296_v52  ;;  %v300_v40 = vld [vmem:[%s4824_s3 + $0x818] sm:$0xff]  ;;  %v299_v11 = vld [vmem:[%s4824_s3 + $0x810] sm:$0xff] }
 0x14b   :  { %v1267_v24 = vpop.f32.mrf.mxu0 }
 0x14c   :  { %v4353_v15 = vadd.f32 %v1705_v4, %v1266_v2  ;;  %v1707_v25 = vpop.f32.mrf.mxu1  ;;  %v302_v4 = vld [vmem:[%s4824_s3 + $0x828] sm:$0xff] }
 0x14d   :  { %v1270_v48 = vpop.f32.mrf.mxu0  ;;  %1509 = vmatmul.mubr.f32.gmra.mxu0 %v293_v55  ;;  %1949 = vmatmul.mubr.f32.gmra.mxu1 %v295_v45  ;;  %v301_v25 = vld [vmem:[%s4824_s3 + $0x820] sm:$0xff] }
 0x14e   :  { %v1271_v49 = vadd.f32 %v1270_v48, %v3599_v28  ;;  %v1710_v52 = vpop.f32.mrf.mxu1  ;;  %1513 = vmatprep.mubr.f32.mxu0 %v298_v26  ;;  %2638 = vmatprep.mubr.msk.f32.mxu1 %vm855_vm0, %v300_v40  ;;  %v304_v28 = vld [vmem:[%s4824_s3 + $0x838] sm:$0xff]  ;;  %v303_v48 = vld [vmem:[%s4824_s3 + $0x830] sm:$0xff] }
 0x14f   :  { %v1272_v2 = vpop.f32.mrf.mxu0 }
 0x150   :  { %v4369_v55 = vadd.f32 %v1710_v52, %v1271_v49  ;;  %v1712_v45 = vpop.f32.mrf.mxu1  ;;  %v306_v52 = vld [vmem:[%s4824_s3 + $0x848] sm:$0xff] }
 0x151   :  { %v1275_v24 = vpop.f32.mrf.mxu0  ;;  %1514 = vmatmul.mubr.f32.gmra.mxu0 %v297_v21  ;;  %1954 = vmatmul.mubr.f32.gmra.mxu1 %v299_v11  ;;  %v305_v45 = vld [vmem:[%s4824_s3 + $0x840] sm:$0xff] }
 0x152   :  { %v1276_v26 = vadd.f32 %v1275_v24, %v4101_v61  ;;  %v1715_v40 = vpop.f32.mrf.mxu1  ;;  %1518 = vmatprep.mubr.f32.mxu0 %v302_v4  ;;  %2639 = vmatprep.mubr.msk.f32.mxu1 %vm855_vm0, %v304_v28  ;;  %v308_v61 = vld [vmem:[%s4824_s3 + $0x858] sm:$0xff]  ;;  %v307_v24 = vld [vmem:[%s4824_s3 + $0x850] sm:$0xff] }
 0x153   :  { %v1277_v49 = vpop.f32.mrf.mxu0 }
 0x154   :  { %v4385_v21 = vadd.f32 %v1715_v40, %v1276_v26  ;;  %v1717_v11 = vpop.f32.mrf.mxu1  ;;  %v310_v40 = vld [vmem:[%s4824_s3 + $0x868] sm:$0xff] }
 0x155   :  { %v1280_v2 = vpop.f32.mrf.mxu0  ;;  %1519 = vmatmul.mubr.f32.gmra.mxu0 %v301_v25  ;;  %1959 = vmatmul.mubr.f32.gmra.mxu1 %v303_v48  ;;  %v309_v11 = vld [vmem:[%s4824_s3 + $0x860] sm:$0xff] }
 0x156   :  { %4862 = vst [vmem:[#allocation42_spill] sm:$0xff] %v4385_v21  ;;  %v1281_v4 = vadd.f32 %v1280_v2, %v4103_v50  ;;  %v1720_v28 = vpop.f32.mrf.mxu1  ;;  %1523 = vmatprep.mubr.f32.mxu0 %v306_v52  ;;  %2640 = vmatprep.mubr.msk.f32.mxu1 %vm855_vm0, %v308_v61  ;;  %v312_v50 = vld [vmem:[%s4824_s3 + $0x878] sm:$0xff]  ;;  %v311_v2 = vld [vmem:[%s4824_s3 + $0x870] sm:$0xff] }
 0x157   :  { %v1282_v26 = vpop.f32.mrf.mxu0 }
 0x158   :  { %v4401_v25 = vadd.f32 %v1720_v28, %v1281_v4  ;;  %v1722_v48 = vpop.f32.mrf.mxu1  ;;  %v314_v28 = vld [vmem:[%s4824_s3 + $0x888] sm:$0xff] }
 0x159   :  { %v1285_v49 = vpop.f32.mrf.mxu0  ;;  %1524 = vmatmul.mubr.f32.gmra.mxu0 %v305_v45  ;;  %1964 = vmatmul.mubr.f32.gmra.mxu1 %v307_v24  ;;  %v313_v48 = vld [vmem:[%s4824_s3 + $0x880] sm:$0xff] }
 0x15a   :  { %4863 = vst [vmem:[#allocation43_spill] sm:$0xff] %v4401_v25  ;;  %v1286_v52 = vadd.f32 %v1285_v49, %v4054_v63  ;;  %v1725_v61 = vpop.f32.mrf.mxu1  ;;  %1528 = vmatprep.mubr.f32.mxu0 %v310_v40  ;;  %2641 = vmatprep.mubr.msk.f32.mxu1 %vm855_vm0, %v312_v50  ;;  %v316_v63 = vld [vmem:[%s4824_s3 + $0x898] sm:$0xff]  ;;  %v315_v49 = vld [vmem:[%s4824_s3 + $0x890] sm:$0xff] }
 0x15b   :  { %v1287_v4 = vpop.f32.mrf.mxu0 }
 0x15c   :  { %v4417_v45 = vadd.f32 %v1725_v61, %v1286_v52  ;;  %v1727_v24 = vpop.f32.mrf.mxu1  ;;  %v318_v61 = vld [vmem:[%s4824_s3 + $0x8a8] sm:$0xff] }
 0x15d   :  { %v1290_v26 = vpop.f32.mrf.mxu0  ;;  %1529 = vmatmul.mubr.f32.gmra.mxu0 %v309_v11  ;;  %1969 = vmatmul.mubr.f32.gmra.mxu1 %v311_v2  ;;  %v317_v24 = vld [vmem:[%s4824_s3 + $0x8a0] sm:$0xff] }
 0x15e   :  { %4864 = vst [vmem:[#allocation44_spill] sm:$0xff] %v4417_v45  ;;  %v1291_v40 = vadd.f32 %v1290_v26, %v4020_v54  ;;  %v1730_v50 = vpop.f32.mrf.mxu1  ;;  %1533 = vmatprep.mubr.f32.mxu0 %v314_v28  ;;  %2642 = vmatprep.mubr.msk.f32.mxu1 %vm855_vm0, %v316_v63  ;;  %v320_v54 = vld [vmem:[%s4824_s3 + $0x8b8] sm:$0xff]  ;;  %v319_v26 = vld [vmem:[%s4824_s3 + $0x8b0] sm:$0xff] }
 0x15f   :  { %v1292_v52 = vpop.f32.mrf.mxu0 }
 0x160   :  { %v4433_v11 = vadd.f32 %v1730_v50, %v1291_v40  ;;  %v1732_v2 = vpop.f32.mrf.mxu1  ;;  %v322_v50 = vld [vmem:[%s4824_s3 + $0x8c8] sm:$0xff] }
 0x161   :  { %v1295_v4 = vpop.f32.mrf.mxu0  ;;  %1534 = vmatmul.mubr.f32.gmra.mxu0 %v313_v48  ;;  %1974 = vmatmul.mubr.f32.gmra.mxu1 %v315_v49  ;;  %v323_v2 = vld [vmem:[%s4824_s3 + $0x8d0] sm:$0xff] }
 0x162   :  { %4865 = vst [vmem:[#allocation45_spill] sm:$0xff] %v4433_v11  ;;  %v1296_v28 = vadd.f32 %v1295_v4, %v3986_v1  ;;  %v1735_v63 = vpop.f32.mrf.mxu1  ;;  %1538 = vmatprep.mubr.f32.mxu0 %v318_v61  ;;  %2643 = vmatprep.mubr.msk.f32.mxu1 %vm855_vm0, %v320_v54  ;;  %v324_v1 = vld [vmem:[%s4824_s3 + $0x8d8] sm:$0xff]  ;;  %v321_v54 = vld [vmem:[%s4824_s3 + $0x8c0] sm:$0xff] }
 0x163   :  { %v1297_v40 = vpop.f32.mrf.mxu0 }
 0x164   :  { %v4449_v48 = vadd.f32 %v1735_v63, %v1296_v28  ;;  %v1737_v49 = vpop.f32.mrf.mxu1  ;;  %v326_v28 = vld [vmem:[%s4824_s3 + $0x8e8] sm:$0xff]  ;;  %v328_v63 = vld [vmem:[%s4824_s3 + $0x8f8] sm:$0xff] }
 0x165   :  { %v4451_v52 = vpop.f32.mrf.mxu0  ;;  %1539 = vmatmul.mubr.f32.gmra.mxu0 %v317_v24  ;;  %1979 = vmatmul.mubr.f32.gmra.mxu1 %v319_v26 }
 0x166   :  { %v4453_v61 = vpop.f32.mrf.mxu1  ;;  %1543 = vmatprep.mubr.f32.mxu0 %v322_v50  ;;  %2644 = vmatprep.mubr.msk.f32.mxu1 %vm855_vm0, %v324_v1  ;;  %v325_v50 = vld [vmem:[%s4824_s3 + $0x8e0] sm:$0xff]  ;;  %v327_v1 = vld [vmem:[%s4824_s3 + $0x8f0] sm:$0xff] }
 0x167   :  { %v1302_v4 = vpop.f32.mrf.mxu0 }
 0x168   :  { %v1742_v24 = vpop.f32.mrf.mxu1  ;;  %v330_v4 = vld [vmem:[%s4824_s3 + $0x908] sm:$0xff] }
 0x169   :  { %v4468_v26 = vpop.f32.mrf.mxu0  ;;  %1544 = vmatmul.mubr.f32.gmra.mxu0 %v321_v54  ;;  %1984 = vmatmul.mubr.f32.gmra.mxu1 %v323_v2  ;;  %v332_v54 = vld [vmem:[%s4824_s3 + $0x918] sm:$0xff] }
 0x16a   :  { %v4470_v40 = vpop.f32.mrf.mxu1  ;;  %1548 = vmatprep.mubr.f32.mxu0 %v326_v28  ;;  %2645 = vmatprep.mubr.msk.f32.mxu1 %vm855_vm0, %v328_v63  ;;  %v329_v63 = vld [vmem:[%s4824_s3 + $0x900] sm:$0xff] }
 0x16b   :  { %v1307_v49 = vpop.f32.mrf.mxu0 }
 0x16c   :  { %v1747_v2 = vpop.f32.mrf.mxu1  ;;  %v331_v49 = vld [vmem:[%s4824_s3 + $0x910] sm:$0xff] }
 0x16d   :  { %v4485_v28 = vpop.f32.mrf.mxu0  ;;  %1549 = vmatmul.mubr.f32.gmra.mxu0 %v325_v50  ;;  %1989 = vmatmul.mubr.f32.gmra.mxu1 %v327_v1  ;;  %v334_v2 = vld [vmem:[%s4824_s3 + $0x928] sm:$0xff]  ;;  %v336_v50 = vld [vmem:[%s4824_s3 + $0x938] sm:$0xff] }
 0x16e   :  { %v4487_v24 = vpop.f32.mrf.mxu1  ;;  %1553 = vmatprep.mubr.f32.mxu0 %v330_v4  ;;  %2646 = vmatprep.mubr.msk.f32.mxu1 %vm855_vm0, %v332_v54  ;;  %v335_v54 = vld [vmem:[%s4824_s3 + $0x930] sm:$0xff] }
 0x16f   :  { %v1312_v56 = vpop.f32.mrf.mxu0 }
 0x170   :  { %v1752_v1 = vpop.f32.mrf.mxu1  ;;  %v333_v56 = vld [vmem:[%s4824_s3 + $0x920] sm:$0xff] }
 0x171   :  { %v4502_v4 = vpop.f32.mrf.mxu0  ;;  %1554 = vmatmul.mubr.f32.gmra.mxu0 %v329_v63  ;;  %1994 = vmatmul.mubr.f32.gmra.mxu1 %v331_v49  ;;  %v338_v1 = vld [vmem:[%s4824_s3 + $0x948] sm:$0xff]  ;;  %v340_v63 = vld [vmem:[%s4824_s3 + $0x958] sm:$0xff] }
 0x172   :  { %v4504_v42 = vpop.f32.mrf.mxu1  ;;  %1558 = vmatprep.mubr.f32.mxu0 %v334_v2  ;;  %2647 = vmatprep.mubr.msk.f32.mxu1 %vm855_vm0, %v336_v50  ;;  %v337_v50 = vld [vmem:[%s4824_s3 + $0x940] sm:$0xff] }
 0x173   :  { %v1317_v44 = vpop.f32.mrf.mxu0 }
 0x174   :  { %v1757_v49 = vpop.f32.mrf.mxu1  ;;  %v339_v44 = vld [vmem:[%s4824_s3 + $0x950] sm:$0xff] }
 0x175   :  { %v1320_v2 = vpop.f32.mrf.mxu0  ;;  %1559 = vmatmul.mubr.f32.gmra.mxu0 %v333_v56  ;;  %1999 = vmatmul.mubr.f32.gmra.mxu1 %v335_v54 }
 0x176   :  { %v4519_v7 = vpop.f32.mrf.mxu1  ;;  %1563 = vmatprep.mubr.f32.mxu0 %v338_v1  ;;  %2648 = vmatprep.mubr.msk.f32.mxu1 %vm855_vm0, %v340_v63 }
 0x177   :  { %v1322_v17 = vpop.f32.mrf.mxu0 }
 0x178   :  { %v1762_v23 = vpop.f32.mrf.mxu1 }
 0x179   :  { %v1325_v35 = vpop.f32.mrf.mxu0  ;;  %1564 = vmatmul.mubr.f32.gmra.mxu0 %v337_v50  ;;  %2004 = vmatmul.mubr.f32.gmra.mxu1 %v339_v44 }
 0x17a   :  { %v1765_v56 = vpop.f32.mrf.mxu1 }
 0x17b   :  { %v1327_v54 = vpop.f32.mrf.mxu0 }
 0x17c   :  { %v1767_v49 = vpop.f32.mrf.mxu1 }
 0x17d   :  { %v1330_v47 = vpop.f32.mrf.mxu0 }
 0x17e   :  { %v1770_v1 = vpop.f32.mrf.mxu1 }
 0x17f   :  { %v1332_v60 = vpop.f32.mrf.mxu0 }
 0x180   :  { %v1772_v16 = vpop.f32.mrf.mxu1 }
 0x181   :  { %v1335_v39 = vpop.f32.mrf.mxu0 }
 0x182   :  { %v1775_v8 = vpop.f32.mrf.mxu1 }
 0x183   :  { %v1337_v21 = vpop.f32.mrf.mxu0 }
 0x184   :  { %v1777_v63 = vpop.f32.mrf.mxu1  ;;  %v1336_v21 = vadd.f32 %v1335_v39, %v3687_v59  ;;  %v2023_v39 = vmax.f32 %v4353_v15, 0.0 }
 0x185   :  { %v1340_v29 = vpop.f32.mrf.mxu0 }
 0x186   :  { %v1780_v58 = vpop.f32.mrf.mxu1  ;;  %v1341_v49 = vadd.f32 %v1340_v29, %v3650_v46  ;;  %v1776_v29 = vadd.f32 %v1775_v8, %v1336_v21  ;;  %v1316_v8 = vadd.f32 %v4502_v4, %v3850_v12  ;;  %v2020_v12 = vmax.f32 %v4305_v53, 0.0 }
 0x187   :  { %v1342_v25 = vpop.f32.mrf.mxu0 }
 0x188   :  { %v1782_v33 = vpop.f32.mrf.mxu1  ;;  %v1781_v41 = vadd.f32 %v1780_v58, %v1341_v49 }
 0x189   :  { %v1345_v17 = vpop.f32.mrf.mxu0  ;;  %v1331_v33 = vadd.f32 %v1330_v47, %v3733_v14  ;;  %v1321_v47 = vadd.f32 %v1320_v2, %v3816_v57  ;;  %v2021_v57 = vmax.f32 %v4321_v9, 0.0  ;;  %v1756_v9 = vadd.f32 %v4504_v42, %v1316_v8  ;;  %v4869_v8 = vld [vmem:[#allocation40_spill] sm:$0xff] }
 0x18a   :  { %v1785_v23 = vpop.f32.mrf.mxu1  ;;  %v1346_v50 = vadd.f32 %v1345_v17, %v3616_v34  ;;  %v2038_v58 = vmax.f32 %v1781_v41, 0.0  ;;  %v2018_v42 = vmax.f32 %v4273_v32, 0.0  ;;  %v2016_v32 = vmax.f32 %v4241_v51, 0.0 }
 0x18b   :  { %v1347_v45 = vpop.f32.mrf.mxu0  ;;  %v1771_v14 = vadd.f32 %v1770_v1, %v1331_v33  ;;  %v2033_v33 = vmax.f32 %v1756_v9, 0.0  ;;  %v2029_v51 = vmax.f32 %v4449_v48, 0.0 }
 0x18c   :  { %v1787_v44 = vpop.f32.mrf.mxu1  ;;  %v1786_v63 = vadd.f32 %v1785_v23, %v1346_v50  ;;  %v2037_v23 = vmax.f32 %v1776_v29, 0.0 }
 0x18d   :  { %v1350_v54 = vpop.f32.mrf.mxu0  ;;  %v2024_v44 = vmax.f32 %v4369_v55, 0.0  ;;  %v2036_v2 = vmax.f32 %v1771_v14, 0.0  ;;  %v4866_v14 = vld [vmem:[#allocation41_spill] sm:$0xff] }
 0x18e   :  { %v1351_v60 = vadd.f32 %v1350_v54, %v3582_v22  ;;  %v1790_v16 = vpop.f32.mrf.mxu1  ;;  %v1326_v22 = vadd.f32 %v1325_v35, %v3779_v38  ;;  %v2022_v35 = vmax.f32 %v4337_v18, 0.0  ;;  %v1761_v18 = vadd.f32 %v4519_v7, %v1321_v47 }
 0x18f   :  { %v1352_v20 = vpop.f32.mrf.mxu0  ;;  %v2019_v7 = vmax.f32 %v4289_v10, 0.0 }
 0x190   :  { %v1791_v19 = vadd.f32 %v1790_v16, %v1351_v60  ;;  %v1792_v11 = vpop.f32.mrf.mxu1  ;;  %v2039_v20 = vmax.f32 %v1786_v63, 0.0  ;;  %v1766_v55 = vadd.f32 %v1765_v56, %v1326_v22  ;;  %v1306_v56 = vadd.f32 %v4468_v26, %v3918_v62 }
 0x191   :  { %v1355_v25 = vpop.f32.mrf.mxu0  ;;  %v2034_v21 = vmax.f32 %v1761_v18, 0.0 }
 0x192   :  { %v2040_v45 = vmax.f32 %v1791_v19, 0.0  ;;  %v1356_v34 = vadd.f32 %v1355_v25, %v4063_v31  ;;  %v1795_v17 = vpop.f32.mrf.mxu1  ;;  %v2035_v60 = vmax.f32 %v1766_v55, 0.0  ;;  %v1746_v25 = vadd.f32 %v4470_v40, %v1306_v56  ;;  %v4874_v56 = vld [vmem:[#allocation38_spill] sm:$0xff] }
 0x193   :  { %v1357_v46 = vpop.f32.mrf.mxu0  ;;  %v2010_v9 = vmax.f32 %v4874_v56, 0.0  ;;  %v4883_v56 = vld [vmem:[#allocation13_spill] sm:$0xff] }
 0x194   :  { %v4536_v54 = vadd.f32 %v1795_v17, %v1356_v34  ;;  %v1797_v59 = vpop.f32.mrf.mxu1  ;;  %2655 = vmatprep.subr.mxu0 %v2040_v45  ;;  %v2031_v40 = vmax.f32 %v1746_v25, 0.0 }
 0x195   :  { %v1360_v11 = vpop.f32.mrf.mxu0  ;;  %2656 = vmatpush3.msra.mxu0 %v2024_v44 }
 0x196   :  { %v1361_v19 = vadd.f32 %v1360_v11, %v4029_v6  ;;  %v1800_v31 = vpop.f32.mrf.mxu1  ;;  %2657 = vmatprep.subr.mxu0 %v2039_v20  ;;  %v1311_v6 = vadd.f32 %v4485_v28, %v3884_v36 }
 0x197   :  { %v1362_v38 = vpop.f32.mrf.mxu0  ;;  %2658 = vmatpush3.msra.mxu0 %v2023_v39 }
 0x198   :  { %v4544_v15 = vadd.f32 %v1800_v31, %v1361_v19  ;;  %v1802_v50 = vpop.f32.mrf.mxu1  ;;  %2659 = vmatprep.subr.mxu0 %v2038_v58  ;;  %v1751_v53 = vadd.f32 %v4487_v24, %v1311_v6  ;;  %v2013_v58 = vmax.f32 %v4866_v14, 0.0  ;;  %v4867_v19 = vld [vmem:[#allocation45_spill] sm:$0xff]  ;;  %v2087_v14 = vld [vmem:[%s4826_s5 + $0x18] sm:$0xff] }
 0x199   :  { %v1365_v41 = vpop.f32.mrf.mxu0  ;;  %2660 = vmatpush3.msra.mxu0 %v2022_v35  ;;  %v2028_v31 = vmax.f32 %v4867_v19, 0.0  ;;  %v4868_v35 = vld [vmem:[#allocation28_spill] sm:$0xff]  ;;  %2266 = vmatprep.mubr.f32.mxu1 %v2087_v14 }
 0x19a   :  { %v1366_v1 = vadd.f32 %v1365_v41, %v3995_v13  ;;  %v1805_v49 = vpop.f32.mrf.mxu1  ;;  %2661 = vmatprep.subr.mxu0 %v2037_v23  ;;  %v1301_v13 = vadd.f32 %v4451_v52, %v3952_v30  ;;  %v2017_v30 = vmax.f32 %v4257_v0, 0.0  ;;  %v2015_v0 = vmax.f32 %v4225_v27, 0.0  ;;  %v4870_v23 = vld [vmem:[#allocation44_spill] sm:$0xff]  ;;  %v4871_v41 = vld [vmem:[#allocation39_spill] sm:$0xff] }
 0x19b   :  { %v1367_v4 = vpop.f32.mrf.mxu0  ;;  %2662 = vmatpush3.msra.mxu0 %v2021_v57  ;;  %v2027_v48 = vmax.f32 %v4870_v23, 0.0  ;;  %v2011_v6 = vmax.f32 %v4871_v41, 0.0 }
 0x19c   :  { %v4555_v16 = vadd.f32 %v1805_v49, %v1366_v1  ;;  %v1807_v36 = vpop.f32.mrf.mxu1  ;;  %2663 = vmatprep.subr.mxu0 %v2036_v2  ;;  %v1741_v24 = vadd.f32 %v4453_v61, %v1301_v13  ;;  %v4872_v2 = vld [vmem:[#allocation43_spill] sm:$0xff]  ;;  %v4873_v49 = vld [vmem:[#allocation26_spill] sm:$0xff] }
 0x19d   :  { %v1370_v28 = vpop.f32.mrf.mxu0  ;;  %2664 = vmatpush3.msra.mxu0 %v2020_v12  ;;  %v2026_v1 = vmax.f32 %v4872_v2, 0.0  ;;  %v4875_v36 = vld [vmem:[#allocation42_spill] sm:$0xff] }
 0x19e   :  { %v1371_v63 = vadd.f32 %v1370_v28, %v3961_v37  ;;  %v1810_v62 = vpop.f32.mrf.mxu1  ;;  %2665 = vmatprep.subr.mxu0 %v2035_v60  ;;  %v2032_v37 = vmax.f32 %v1751_v53, 0.0  ;;  %v2030_v20 = vmax.f32 %v1741_v24, 0.0  ;;  %v4876_v53 = vld [vmem:[#allocation37_spill] sm:$0xff] }
 0x19f   :  { %v1372_v26 = vpop.f32.mrf.mxu0  ;;  %2666 = vmatpush3.msra.mxu0 %v2019_v7  ;;  %v2025_v7 = vmax.f32 %v4875_v36, 0.0  ;;  %v2095_v36 = vld [vmem:[%s4826_s5 + $0x58] sm:$0xff] }
 0x1a0   :  { %v4564_v10 = vadd.f32 %v1810_v62, %v1371_v63  ;;  %v1812_v45 = vpop.f32.mrf.mxu1  ;;  %2667 = vmatprep.subr.mxu0 %v2034_v21  ;;  %v2009_v21 = vmax.f32 %v4876_v53, 0.0  ;;  %v4877_v62 = vld [vmem:[#allocation24_spill] sm:$0xff] }
 0x1a1   :  { %v1375_v52 = vpop.f32.mrf.mxu0  ;;  %2668 = vmatpush3.msra.mxu0 %v2018_v42 }
 0x1a2   :  { %v1376_v34 = vadd.f32 %v1375_v52, %v3927_v3  ;;  %v1815_v17 = vpop.f32.mrf.mxu1  ;;  %2669 = vmatprep.subr.mxu0 %v2033_v33  ;;  %v2014_v3 = vmax.f32 %v4209_v5, 0.0  ;;  %v2012_v5 = vmax.f32 %v4869_v8, 0.0  ;;  %v4878_v52 = vld [vmem:[#allocation22_spill] sm:$0xff] }
 0x1a3   :  { %v1377_v44 = vpop.f32.mrf.mxu0  ;;  %2670 = vmatpush3.msra.mxu0 %v2017_v30 }
 0x1a4   :  { %v4570_v46 = vadd.f32 %v1815_v17, %v1376_v34  ;;  %v1817_v22 = vpop.f32.mrf.mxu1  ;;  %2671 = vmatprep.subr.mxu0 %v2032_v37 }
 0x1a5   :  { %v1380_v29 = vpop.f32.mrf.mxu0  ;;  %2672 = vmatpush3.msra.mxu0 %v2016_v32 }
 0x1a6   :  { %v1381_v61 = vadd.f32 %v1380_v29, %v3893_v43  ;;  %v1820_v59 = vpop.f32.mrf.mxu1  ;;  %2673 = vmatprep.subr.mxu0 %v2031_v40  ;;  %v4879_v40 = vld [vmem:[#allocation20_spill] sm:$0xff] }
 0x1a7   :  { %v1382_v39 = vpop.f32.mrf.mxu0  ;;  %2674 = vmatpush3.msra.mxu0 %v2015_v0 }
 0x1a8   :  { %v4576_v11 = vadd.f32 %v1820_v59, %v1381_v61  ;;  %v1822_v47 = vpop.f32.mrf.mxu1  ;;  %2675 = vmatprep.subr.mxu0 %v2030_v20 }
 0x1a9   :  { %v1385_v27 = vpop.f32.mrf.mxu0  ;;  %2676 = vmatpush3.msra.mxu0 %v2014_v3  ;;  %v4880_v3 = vld [vmem:[#allocation18_spill] sm:$0xff] }
 0x1aa   :  { %v1386_v43 = vadd.f32 %v1385_v27, %v4868_v35  ;;  %v1825_v38 = vpop.f32.mrf.mxu1  ;;  %2677 = vmatprep.subr.mxu0 %v2029_v51  ;;  %v2085_v47 = vld [vmem:[%s4826_s5 + $0x8] sm:$0xff]  ;;  %v2084_v27 = vld [vmem:[%s4826_s5] sm:$0xff] }
 0x1ab   :  { %v1387_v55 = vpop.f32.mrf.mxu0  ;;  %2678 = vmatpush3.msra.mxu0 %v2013_v58  ;;  %2181 = vmatprep.mubr.f32.mxu0 %v2085_v47 }
 0x1ac   :  { %v4583_v50 = vadd.f32 %v1825_v38, %v1386_v43  ;;  %v1827_v57 = vpop.f32.mrf.mxu1  ;;  %2679 = vmatprep.subr.mxu0 %v2028_v31  ;;  %v4881_v43 = vld [vmem:[#allocation16_spill] sm:$0xff] }
 0x1ad   :  { %v1390_v18 = vpop.f32.mrf.mxu0  ;;  %2680 = vmatpush3.msra.mxu0 %v2012_v5  ;;  %v4882_v57 = vld [vmem:[#allocation14_spill] sm:$0xff] }
 0x1ae   :  { %v1391_v12 = vadd.f32 %v1390_v18, %v4873_v49  ;;  %v1830_v4 = vpop.f32.mrf.mxu1  ;;  %2681 = vmatprep.subr.mxu0 %v2027_v48  ;;  %v2090_v18 = vld [vmem:[%s4826_s5 + $0x30] sm:$0xff] }
 0x1af   :  { %v1392_v60 = vpop.f32.mrf.mxu0  ;;  %2682 = vmatpush3.msra.mxu0 %v2011_v6 }
 0x1b0   :  { %v4590_v28 = vadd.f32 %v1830_v4, %v1391_v12  ;;  %v1832_v13 = vpop.f32.mrf.mxu1  ;;  %2683 = vmatprep.subr.mxu0 %v2026_v1  ;;  %v2089_v1 = vld [vmem:[%s4826_s5 + $0x28] sm:$0xff] }
 0x1b1   :  { %v1395_v63 = vpop.f32.mrf.mxu0  ;;  %2684 = vmatpush3.msra.mxu0 %v2010_v9  ;;  %v2094_v13 = vld [vmem:[%s4826_s5 + $0x50] sm:$0xff] }
 0x1b2   :  { %v1396_v42 = vadd.f32 %v1395_v63, %v4877_v62  ;;  %v1835_v26 = vpop.f32.mrf.mxu1  ;;  %2685 = vmatprep.subr.mxu0 %v2025_v7  ;;  %v4884_v62 = vld [vmem:[#allocation10_spill] sm:$0xff] }
 0x1b3   :  { %v1397_v25 = vpop.f32.mrf.mxu0  ;;  %2686 = vmatpush3.msra.mxu0 %v2009_v21 }
 0x1b4   :  { %v4594_v33 = vadd.f32 %v1835_v26, %v1396_v42  ;;  %v1837_v45 = vpop.f32.mrf.mxu1  ;;  %2182 = vmatmul.mubr.f32.vlgmr.msra.gmra.mxu0 %v2084_v27  ;;  %v2100_v25 = vld [vmem:[%s4826_s5 + $0x80] sm:$0xff] }
 0x1b5   :  { %v1400_v30 = vpop.f32.mrf.mxu0  ;;  %2186 = vmatprep.mubr.f32.mxu0 %v2090_v18  ;;  %v4887_v27 = vld [vmem:[#allocation32_spill] sm:$0xff] }
 0x1b6   :  { %v1401_v24 = vadd.f32 %v1400_v30, %v4878_v52  ;;  %v1840_v37 = vpop.f32.mrf.mxu1  ;;  %v2099_v30 = vld [vmem:[%s4826_s5 + $0x78] sm:$0xff] }
 0x1b7   :  { %v1402_v34 = vpop.f32.mrf.mxu0 }
 0x1b8   :  { %v4597_v17 = vadd.f32 %v1840_v37, %v1401_v24  ;;  %v1842_v32 = vpop.f32.mrf.mxu1  ;;  %2187 = vmatmul.mubr.f32.gmra.mxu0 %v2089_v1  ;;  %v4885_v34 = vld [vmem:[#allocation34_spill] sm:$0xff] }
 0x1b9   :  { %v1405_v44 = vpop.f32.mrf.mxu0  ;;  %2191 = vmatprep.mubr.f32.mxu0 %v2095_v36  ;;  %v4889_v1 = vld [vmem:[#allocation30_spill] sm:$0xff] }
 0x1ba   :  { %v1406_v22 = vadd.f32 %v1405_v44, %v4879_v40  ;;  %v1845_v0 = vpop.f32.mrf.mxu1 }
 0x1bb   :  { %v1407_v29 = vpop.f32.mrf.mxu0 }
 0x1bc   :  { %v4600_v20 = vadd.f32 %v1845_v0, %v1406_v22  ;;  %v1847_v61 = vpop.f32.mrf.mxu1  ;;  %2192 = vmatmul.mubr.f32.gmra.mxu0 %v2094_v13 }
 0x1bd   :  { %v1410_v59 = vpop.f32.mrf.mxu0  ;;  %2196 = vmatprep.mubr.f32.mxu0 %v2100_v25  ;;  %v2088_v61 = vld [vmem:[%s4826_s5 + $0x20] sm:$0xff] }
 0x1be   :  { %v1411_v39 = vadd.f32 %v1410_v59, %v4880_v3  ;;  %v1850_v51 = vpop.f32.mrf.mxu1  ;;  %v4886_v59 = vld [vmem:[#allocation33_spill] sm:$0xff] }
 0x1bf   :  { %v1412_v58 = vpop.f32.mrf.mxu0 }
 0x1c0   :  { %v4612_v19 = vadd.f32 %v1850_v51, %v1411_v39  ;;  %v1852_v31 = vpop.f32.mrf.mxu1  ;;  %2197 = vmatmul.mubr.f32.gmra.mxu0 %v2099_v30 }
 0x1c1   :  { %v1415_v35 = vpop.f32.mrf.mxu0  ;;  %2780 = vmatprep.mubr.msk.f32.mxu0 %vm2104_vm1, %v2088_v61 }
 0x1c2   :  { %v1416_v38 = vadd.f32 %v1415_v35, %v4881_v43  ;;  %v1855_v8 = vpop.f32.mrf.mxu1 }
 0x1c3   :  { %v1417_v5 = vpop.f32.mrf.mxu0 }
 0x1c4   :  { %v4615_v55 = vadd.f32 %v1855_v8, %v1416_v38  ;;  %v1857_v23 = vpop.f32.mrf.mxu1 }
 0x1c5   :  { %v1420_v48 = vpop.f32.mrf.mxu0  ;;  %v4888_v23 = vld [vmem:[#allocation31_spill] sm:$0xff] }
 0x1c6   :  { %v1421_v41 = vadd.f32 %v1420_v48, %v4882_v57  ;;  %v1860_v6 = vpop.f32.mrf.mxu1 }
 0x1c7   :  { %v1422_v2 = vpop.f32.mrf.mxu0 }
 0x1c8   :  { %v4624_v49 = vadd.f32 %v1860_v6, %v1421_v41  ;;  %v1862_v12 = vpop.f32.mrf.mxu1 }
 0x1c9   :  { %v1425_v4 = vpop.f32.mrf.mxu0 }
 0x1ca   :  { %v1426_v9 = vadd.f32 %v1425_v4, %v4883_v56  ;;  %v1865_v60 = vpop.f32.mrf.mxu1 }
 0x1cb   :  { %v1427_v7 = vpop.f32.mrf.mxu0 }
 0x1cc   :  { %v4633_v53 = vadd.f32 %v1865_v60, %v1426_v9  ;;  %v1867_v21 = vpop.f32.mrf.mxu1 }
 0x1cd   :  { %v1430_v63 = vpop.f32.mrf.mxu0 }
 0x1ce   :  { %v1431_v42 = vadd.f32 %v1430_v63, %v4884_v62  ;;  %v1870_v26 = vpop.f32.mrf.mxu1 }
 0x1cf   :  { %v1432_v45 = vpop.f32.mrf.mxu0 }
 0x1d0   :  { %v4642_v52 = vadd.f32 %v1870_v26, %v1431_v42  ;;  %v1872_v24 = vpop.f32.mrf.mxu1 }
 0x1d1   :  { %v1435_v37 = vpop.f32.mrf.mxu0 }
 0x1d2   :  { %v1436_v32 = vadd.f32 %v1435_v37, %v4885_v34  ;;  %v1875_v44 = vpop.f32.mrf.mxu1 }
 0x1d3   :  { %v1437_v40 = vpop.f32.mrf.mxu0 }
 0x1d4   :  { %v4645_v22 = vadd.f32 %v1875_v44, %v1436_v32  ;;  %v1877_v0 = vpop.f32.mrf.mxu1 }
 0x1d5   :  { %v1440_v29 = vpop.f32.mrf.mxu0 }
 0x1d6   :  { %v1441_v3 = vadd.f32 %v1440_v29, %v4886_v59  ;;  %v1880_v39 = vpop.f32.mrf.mxu1 }
 0x1d7   :  { %v1442_v51 = vpop.f32.mrf.mxu0 }
 0x1d8   :  { %v4652_v47 = vadd.f32 %v1880_v39, %v1441_v3  ;;  %v1882_v14 = vpop.f32.mrf.mxu1 }
 0x1d9   :  { %v1445_v58 = vpop.f32.mrf.mxu0 }
 0x1da   :  { %v1446_v31 = vadd.f32 %v1445_v58, %v4887_v27  ;;  %v1885_v35 = vpop.f32.mrf.mxu1 }
 0x1db   :  { %v1447_v43 = vpop.f32.mrf.mxu0 }
 0x1dc   :  { %v4655_v38 = vadd.f32 %v1885_v35, %v1446_v31  ;;  %v1887_v8 = vpop.f32.mrf.mxu1 }
 0x1dd   :  { %v1450_v5 = vpop.f32.mrf.mxu0 }
 0x1de   :  { %v1451_v48 = vadd.f32 %v1450_v5, %v4888_v23  ;;  %v1890_v57 = vpop.f32.mrf.mxu1 }
 0x1df   :  { %v1452_v41 = vpop.f32.mrf.mxu0 }
 0x1e0   :  { %v4658_v6 = vadd.f32 %v1890_v57, %v1451_v48  ;;  %v1892_v18 = vpop.f32.mrf.mxu1 }
 0x1e1   :  { %v1455_v2 = vpop.f32.mrf.mxu0 }
 0x1e2   :  { %v1456_v12 = vadd.f32 %v1455_v2, %v4889_v1  ;;  %v1895_v4 = vpop.f32.mrf.mxu1 }
 0x1e3   :  { %v1457_v56 = vpop.f32.mrf.mxu0 }
 0x1e4   :  { %v4661_v9 = vadd.f32 %v1895_v4, %v1456_v12  ;;  %v1897_v60 = vpop.f32.mrf.mxu1  ;;  %v4890_v12 = vld [vmem:[#allocation11_spill] sm:$0xff] }
 0x1e5   :  { %v4663_v36 = vpop.f32.mrf.mxu0 }
 0x1e6   :  { %v4665_v7 = vpop.f32.mrf.mxu1 }
 0x1e7   :  { %v1462_v13 = vpop.f32.mrf.mxu0 }
 0x1e8   :  { %v1902_v21 = vpop.f32.mrf.mxu1  ;;  %v4891_v13 = vld [vmem:[#allocation12_spill] sm:$0xff] }
 0x1e9   :  { %v4667_v63 = vpop.f32.mrf.mxu0 }
 0x1ea   :  { %v4669_v62 = vpop.f32.mrf.mxu1 }
 0x1eb   :  { %v1467_v42 = vpop.f32.mrf.mxu0 }
 0x1ec   :  { %v1907_v26 = vpop.f32.mrf.mxu1  ;;  %v4892_v42 = vld [vmem:[#allocation9_spill] sm:$0xff] }
 0x1ed   :  { %v4671_v25 = vpop.f32.mrf.mxu0 }
 0x1ee   :  { %v4673_v45 = vpop.f32.mrf.mxu1 }
 0x1ef   :  { %v1472_v30 = vpop.f32.mrf.mxu0 }
 0x1f0   :  { %v1912_v24 = vpop.f32.mrf.mxu1 }
 0x1f1   :  { %v1475_v37 = vpop.f32.mrf.mxu0 }
 0x1f2   :  { %v4675_v34 = vpop.f32.mrf.mxu1 }
 0x1f3   :  { %v1477_v32 = vpop.f32.mrf.mxu0 }
 0x1f4   :  { %v1917_v44 = vpop.f32.mrf.mxu1  ;;  %v4893_v32 = vld [vmem:[#allocation15_spill] sm:$0xff] }
 0x1f5   :  { %v1480_v40 = vpop.f32.mrf.mxu0 }
 0x1f6   :  { %v4677_v0 = vpop.f32.mrf.mxu1 }
 0x1f7   :  { %v1482_v29 = vpop.f32.mrf.mxu0 }
 0x1f8   :  { %v1922_v61 = vpop.f32.mrf.mxu1 }
 0x1f9   :  { %v1485_v59 = vpop.f32.mrf.mxu0 }
 0x1fa   :  { %v1925_v3 = vpop.f32.mrf.mxu1 }
 0x1fb   :  { %v1487_v39 = vpop.f32.mrf.mxu0 }
 0x1fc   :  { %v1927_v51 = vpop.f32.mrf.mxu1 }
 0x1fd   :  { %v1490_v14 = vpop.f32.mrf.mxu0 }
 0x1fe   :  { %v1930_v58 = vpop.f32.mrf.mxu1 }
 0x1ff   :  { %v1492_v27 = vpop.f32.mrf.mxu0 }
 0x200   :  { %v1932_v31 = vpop.f32.mrf.mxu1  ;;  %v4894_v27 = vld [vmem:[#allocation17_spill] sm:$0xff] }
 0x201   :  { %v1495_v35 = vpop.f32.mrf.mxu0  ;;  %v1491_v31 = vadd.f32 %v1490_v14, %v4894_v27 }
 0x202   :  { %v1935_v43 = vpop.f32.mrf.mxu1  ;;  %v1496_v44 = vadd.f32 %v1495_v35, %v4893_v32 }
 0x203   :  { %v1497_v8 = vpop.f32.mrf.mxu0 }
 0x204   :  { %v1937_v5 = vpop.f32.mrf.mxu1 }
 0x205   :  { %v1500_v23 = vpop.f32.mrf.mxu0 }
 0x206   :  { %v1940_v48 = vpop.f32.mrf.mxu1  ;;  %v1501_v21 = vadd.f32 %v1500_v23, %v4891_v13 }
 0x207   :  { %v1502_v57 = vpop.f32.mrf.mxu0 }
 0x208   :  { %v1942_v41 = vpop.f32.mrf.mxu1  ;;  %v1941_v8 = vadd.f32 %v1940_v48, %v1501_v21  ;;  %v1931_v48 = vadd.f32 %v1930_v58, %v1491_v31 }
 0x209   :  { %v1505_v18 = vpop.f32.mrf.mxu0  ;;  %v2056_v41 = vmax.f32 %v4642_v52, 0.0  ;;  %v2054_v52 = vmax.f32 %v4624_v49, 0.0 }
 0x20a   :  { %v1945_v2 = vpop.f32.mrf.mxu1  ;;  %v1506_v4 = vadd.f32 %v1505_v18, %v4890_v12  ;;  %v4895_v18 = vld [vmem:[#allocation19_spill] sm:$0xff]  ;;  %v1936_v12 = vadd.f32 %v1935_v43, %v1496_v44  ;;  %v2070_v13 = vmax.f32 %v1941_v8, 0.0 }
 0x20b   :  { %v1507_v1 = vpop.f32.mrf.mxu0 }
 0x20c   :  { %v1947_v56 = vpop.f32.mrf.mxu1  ;;  %v1946_v29 = vadd.f32 %v1945_v2, %v1506_v4  ;;  %v1486_v1 = vadd.f32 %v1485_v59, %v4895_v18  ;;  %v2055_v2 = vmax.f32 %v4633_v53, 0.0  ;;  %v4897_v59 = vld [vmem:[#allocation23_spill] sm:$0xff] }
 0x20d   :  { %v1510_v60 = vpop.f32.mrf.mxu0  ;;  %v1476_v43 = vadd.f32 %v1475_v37, %v4897_v59  ;;  %v2052_v37 = vmax.f32 %v4612_v19, 0.0  ;;  %v2045_v59 = vmax.f32 %v4570_v46, 0.0  ;;  %v2058_v46 = vmax.f32 %v4652_v47, 0.0 }
 0x20e   :  { %v1511_v26 = vadd.f32 %v1510_v60, %v4892_v42  ;;  %v1950_v30 = vpop.f32.mrf.mxu1  ;;  %v2071_v56 = vmax.f32 %v1946_v29, 0.0  ;;  %v4896_v60 = vld [vmem:[#allocation21_spill] sm:$0xff]  ;;  %v2068_v29 = vmax.f32 %v1931_v48, 0.0 }
 0x20f   :  { %v1512_v24 = vpop.f32.mrf.mxu0  ;;  %v1481_v14 = vadd.f32 %v1480_v40, %v4896_v60  ;;  %v4898_v40 = vld [vmem:[#allocation25_spill] sm:$0xff] }
 0x210   :  { %v1951_v61 = vadd.f32 %v1950_v30, %v1511_v26  ;;  %v1952_v39 = vpop.f32.mrf.mxu1  ;;  %v1926_v26 = vadd.f32 %v1925_v3, %v1486_v1  ;;  %v2069_v30 = vmax.f32 %v1936_v12, 0.0  ;;  %v2053_v24 = vmax.f32 %v4615_v55, 0.0 }
 0x211   :  { %v4683_v51 = vpop.f32.mrf.mxu0  ;;  %v1471_v58 = vadd.f32 %v4671_v25, %v4898_v40  ;;  %v1921_v44 = vadd.f32 %v4677_v0, %v1481_v14  ;;  %v1916_v55 = vadd.f32 %v4675_v34, %v1476_v43  ;;  %v2051_v25 = vmax.f32 %v4600_v20, 0.0  ;;  %v4900_v0 = vld [vmem:[#allocation29_spill] sm:$0xff] }
 0x212   :  { %v2072_v5 = vmax.f32 %v1951_v61, 0.0  ;;  %v4686_v57 = vpop.f32.mrf.mxu1  ;;  %v4899_v61 = vld [vmem:[#allocation27_spill] sm:$0xff]  ;;  %v2067_v27 = vmax.f32 %v1926_v26, 0.0  ;;  %v2049_v12 = vmax.f32 %v4594_v33, 0.0  ;;  %v2047_v14 = vmax.f32 %v4583_v50, 0.0 }
 0x213   :  { %v1517_v23 = vpop.f32.mrf.mxu0  ;;  %v1466_v39 = vadd.f32 %v4667_v63, %v4899_v61  ;;  %v1911_v19 = vadd.f32 %v4673_v45, %v1471_v58  ;;  %v2050_v63 = vmax.f32 %v4597_v17, 0.0  ;;  %v2065_v1 = vmax.f32 %v1916_v55, 0.0 }
 0x214   :  { %2699 = vmatprep.subr.mxu1 %v2072_v5  ;;  %v1957_v35 = vpop.f32.mrf.mxu1  ;;  %v1461_v5 = vadd.f32 %v4663_v36, %v4900_v0  ;;  %v2048_v17 = vmax.f32 %v4590_v28, 0.0  ;;  %v2061_v28 = vmax.f32 %v4661_v9, 0.0  ;;  %v2060_v50 = vmax.f32 %v4658_v6, 0.0 }
 0x215   :  { %v4691_v4 = vpop.f32.mrf.mxu0  ;;  %2700 = vmatpush3.msra.mxu1 %v2056_v41  ;;  %v2066_v41 = vmax.f32 %v1921_v44, 0.0  ;;  %v1906_v18 = vadd.f32 %v4669_v62, %v1466_v39  ;;  %v2064_v45 = vmax.f32 %v1911_v19, 0.0  ;;  %v2043_v9 = vmax.f32 %v4555_v16, 0.0  ;;  %v843_v44 = vpop.permute.xlu1 %842  ;;  %v2086_v16 = vld [vmem:[%s4826_s5 + $0x10] sm:$0xff] }
 0x216   :  { %2701 = vmatprep.subr.mxu1 %v2071_v56  ;;  %v4694_v21 = vpop.f32.mrf.mxu1  ;;  %v1901_v36 = vadd.f32 %v4665_v7, %v1461_v5  ;;  %v2046_v7 = vmax.f32 %v4576_v11, 0.0  ;;  %v2059_v11 = vmax.f32 %v4655_v38, 0.0  ;;  %v2042_v6 = vmax.f32 %v4544_v15, 0.0  ;;  %v2092_v15 = vld [vmem:[%s4826_s5 + $0x40] sm:$0xff] }
 0x217   :  { %v1522_v42 = vpop.f32.mrf.mxu0  ;;  %2702 = vmatpush3.msra.mxu1 %v2055_v2  ;;  %v2063_v60 = vmax.f32 %v1906_v18, 0.0  ;;  %v2041_v38 = vmax.f32 %v4536_v54, 0.0  ;;  %v2091_v54 = vld [vmem:[%s4826_s5 + $0x38] sm:$0xff] }
 0x218   :  { %2703 = vmatprep.subr.mxu1 %v2070_v13  ;;  %v1962_v53 = vpop.f32.mrf.mxu1  ;;  %v2062_v33 = vmax.f32 %v1901_v36, 0.0  ;;  %v4901_v5 = vld [vmem:[#allocation36_spill] sm:$0xff]  ;;  %v2102_v36 = vld [vmem:[%s4826_s5 + $0x90] sm:$0xff] }
 0x219   :  { %v4699_v32 = vpop.f32.mrf.mxu0  ;;  %2704 = vmatpush3.msra.mxu1 %v2054_v52 }
 0x21a   :  { %2705 = vmatprep.subr.mxu1 %v2069_v30  ;;  %v4704_v49 = vpop.f32.mrf.mxu1  ;;  %v2044_v30 = vmax.f32 %v4564_v10, 0.0  ;;  %v2057_v10 = vmax.f32 %v4645_v22, 0.0  ;;  %v838_v22 = vpop.permute.xlu1 %837 }
 0x21b   :  { %v1527_v3 = vpop.f32.mrf.mxu0  ;;  %2706 = vmatpush3.msra.mxu1 %v2053_v24 }
 0x21c   :  { %2707 = vmatprep.subr.mxu1 %v2068_v29  ;;  %v1967_v31 = vpop.f32.mrf.mxu1 }
 0x21d   :  { %v4711_v8 = vpop.f32.mrf.mxu0  ;;  %2708 = vmatpush3.msra.mxu1 %v2052_v37  ;;  %v2097_v31 = vld [vmem:[%s4826_s5 + $0x68] sm:$0xff] }
 0x21e   :  { %2709 = vmatprep.subr.mxu1 %v2067_v27  ;;  %v4716_v23 = vpop.f32.mrf.mxu1 }
 0x21f   :  { %v1532_v34 = vpop.f32.mrf.mxu0  ;;  %2710 = vmatpush3.msra.mxu1 %v2051_v25  ;;  %v833_v25 = vpop.permute.xlu0 %832 }
 0x220   :  { %2711 = vmatprep.subr.mxu1 %v2066_v41  ;;  %v1972_v20 = vpop.f32.mrf.mxu1  ;;  %v2096_v34 = vld [vmem:[%s4826_s5 + $0x60] sm:$0xff] }
 0x221   :  { %v4721_v56 = vpop.f32.mrf.mxu0  ;;  %2712 = vmatpush3.msra.mxu1 %v2050_v63 }
 0x222   :  { %2713 = vmatprep.subr.mxu1 %v2065_v1  ;;  %v4724_v35 = vpop.f32.mrf.mxu1  ;;  %v4902_v1 = vld [vmem:[#allocation35_spill] sm:$0xff] }
 0x223   :  { %v1537_v2 = vpop.f32.mrf.mxu0  ;;  %2714 = vmatpush3.msra.mxu1 %v2049_v12 }
 0x224   :  { %2715 = vmatprep.subr.mxu1 %v2064_v45  ;;  %v1977_v62 = vpop.f32.mrf.mxu1  ;;  %v828_v45 = vpop.permute.xlu1 %827 }
 0x225   :  { %v4728_v48 = vpop.f32.mrf.mxu0  ;;  %2716 = vmatpush3.msra.mxu1 %v2048_v17 }
 0x226   :  { %2717 = vmatprep.subr.mxu1 %v2063_v60  ;;  %v4730_v13 = vpop.f32.mrf.mxu1 }
 0x227   :  { %v1542_v52 = vpop.f32.mrf.mxu0  ;;  %2718 = vmatpush3.msra.mxu1 %v2047_v14 }
 0x228   :  { %2719 = vmatprep.subr.mxu1 %v2062_v33  ;;  %v1982_v42 = vpop.f32.mrf.mxu1  ;;  %v823_v33 = vpop.permute.xlu0 %822 }
 0x229   :  { %v1545_v43 = vpop.f32.mrf.mxu0  ;;  %2720 = vmatpush3.msra.mxu1 %v2046_v7  ;;  %v1541_v42 = vadd.f32 %v4728_v48, %v828_v45 }
 0x22a   :  { %2721 = vmatprep.subr.mxu1 %v2061_v28  ;;  %v4736_v26 = vpop.f32.mrf.mxu1  ;;  %v1546_v7 = vadd.f32 %v1545_v43, %v833_v25 }
 0x22b   :  { %v1547_v53 = vpop.f32.mrf.mxu0  ;;  %2722 = vmatpush3.msra.mxu1 %v2045_v59  ;;  %v1981_v48 = vadd.f32 %v4730_v13, %v1541_v42 }
 0x22c   :  { %2723 = vmatprep.subr.mxu1 %v2060_v50  ;;  %v1987_v24 = vpop.f32.mrf.mxu1  ;;  %v1536_v53 = vadd.f32 %v4721_v56, %v823_v33 }
 0x22d   :  { %v1550_v40 = vpop.f32.mrf.mxu0  ;;  %2724 = vmatpush3.msra.mxu1 %v2044_v30  ;;  %v818_v30 = vpop.permute.xlu1 %817  ;;  %v2078_v13 = vmax.f32 %v1981_v48, 0.0 }
 0x22e   :  { %2725 = vmatprep.subr.mxu1 %v2059_v11  ;;  %v1990_v58 = vpop.f32.mrf.mxu1  ;;  %v1551_v2 = vadd.f32 %v1550_v40, %v838_v22  ;;  %v1986_v11 = vadd.f32 %v4736_v26, %v1546_v7  ;;  %v1531_v43 = vadd.f32 %v4711_v8, %v818_v30  ;;  %v1976_v56 = vadd.f32 %v4724_v35, %v1536_v53 }
 0x22f   :  { %v1552_v29 = vpop.f32.mrf.mxu0  ;;  %2726 = vmatpush3.msra.mxu1 %v2043_v9  ;;  %v813_v9 = vpop.permute.xlu0 %812 }
 0x230   :  { %2727 = vmatprep.subr.mxu1 %v2058_v46  ;;  %v1992_v37 = vpop.f32.mrf.mxu1  ;;  %v1991_v59 = vadd.f32 %v1990_v58, %v1551_v2  ;;  %v1526_v46 = vadd.f32 %v4699_v32, %v813_v9  ;;  %v2079_v26 = vmax.f32 %v1986_v11, 0.0  ;;  %v1971_v8 = vadd.f32 %v4716_v23, %v1531_v43  ;;  %v2101_v23 = vld [vmem:[%s4826_s5 + $0x88] sm:$0xff] }
 0x231   :  { %v1555_v3 = vpop.f32.mrf.mxu0  ;;  %2728 = vmatpush3.msra.mxu1 %v2042_v6  ;;  %v808_v58 = vpop.permute.xlu1 %807  ;;  %v2077_v29 = vmax.f32 %v1976_v56, 0.0 }
 0x232   :  { %2729 = vmatprep.subr.mxu1 %v2057_v10  ;;  %v1995_v47 = vpop.f32.mrf.mxu1  ;;  %v1556_v18 = vadd.f32 %v1555_v3, %v843_v44  ;;  %v2080_v40 = vmax.f32 %v1991_v59, 0.0  ;;  %v1521_v6 = vadd.f32 %v4691_v4, %v808_v58  ;;  %v1966_v35 = vadd.f32 %v4704_v49, %v1526_v46  ;;  %v2093_v3 = vld [vmem:[%s4826_s5 + $0x48] sm:$0xff] }
 0x233   :  { %v1557_v61 = vpop.f32.mrf.mxu0  ;;  %2730 = vmatpush3.msra.mxu1 %v2041_v38  ;;  %v803_v44 = vpop.permute.xlu0 %802  ;;  %v2076_v4 = vmax.f32 %v1971_v8, 0.0  ;;  %v2098_v38 = vld [vmem:[%s4826_s5 + $0x70] sm:$0xff] }
 0x234   :  { %v1997_v39 = vpop.f32.mrf.mxu1  ;;  %2267 = vmatmul.mubr.f32.vlgmr.msra.gmra.mxu1 %v2086_v16  ;;  %v1996_v52 = vadd.f32 %v1995_v47, %v1556_v18  ;;  %v1516_v32 = vadd.f32 %v4683_v51, %v803_v44  ;;  %v1961_v10 = vadd.f32 %v4694_v21, %v1521_v6  ;;  %v2075_v37 = vmax.f32 %v1966_v35, 0.0 }
 0x235   :  { %v1560_v55 = vpop.f32.mrf.mxu0  ;;  %2271 = vmatprep.mubr.f32.mxu1 %v2092_v15 }
 0x236   :  { %v2000_v27 = vpop.f32.mrf.mxu1  ;;  %v1561_v19 = vadd.f32 %v1560_v55, %v4901_v5  ;;  %v2081_v24 = vmax.f32 %v1996_v52, 0.0  ;;  %v1956_v51 = vadd.f32 %v4686_v57, %v1516_v32  ;;  %v2074_v49 = vmax.f32 %v1961_v10, 0.0  ;;  %v2103_v57 = vld [vmem:[%s4826_s5 + $0x98] sm:$0xff] }
 0x237   :  { %v1562_v0 = vpop.f32.mrf.mxu0 }
 0x238   :  { %v2002_v41 = vpop.f32.mrf.mxu1  ;;  %2272 = vmatmul.mubr.f32.gmra.mxu1 %v2091_v54  ;;  %v2001_v60 = vadd.f32 %v2000_v27, %v1561_v19  ;;  %v2073_v21 = vmax.f32 %v1956_v51, 0.0 }
 0x239   :  { %v1565_v63 = vpop.f32.mrf.mxu0  ;;  %2276 = vmatprep.mubr.f32.mxu1 %v2097_v31 }
 0x23a   :  { %v1566_v20 = vadd.f32 %v1565_v63, %v4902_v1  ;;  %v2005_v12 = vpop.f32.mrf.mxu1  ;;  %v2082_v50 = vmax.f32 %v2001_v60, 0.0 }
 0x23b   :  { %v1567_v17 = vpop.f32.mrf.mxu0 }
 0x23c   :  { %v2006_v62 = vadd.f32 %v2005_v12, %v1566_v20  ;;  %2277 = vmatmul.mubr.f32.gmra.mxu1 %v2096_v34  ;;  %v2007_v14 = vpop.f32.mrf.mxu1 }
 0x23d   :  { %2281 = vmatprep.mubr.f32.mxu1 %v2102_v36 }
 0x23e   :  { %v2083_v28 = vmax.f32 %v2006_v62, 0.0 }
 0x240   :  { %2758 = vmatprep.subr.mxu0 %v2083_v28  ;;  %2786 = vmatprep.subr.mxu1 %v2083_v28 }
 0x241   :  { %2759 = vmatpush3.msra.mxu0 %v2083_v28  ;;  %2797 = vmatpush3.msra.mxu1 %v2083_v28 }
 0x242   :  { %2760 = vmatprep.subr.mxu0 %v2082_v50  ;;  %2787 = vmatprep.subr.mxu1 %v2082_v50 }
 0x243   :  { %2761 = vmatpush3.msra.mxu0 %v2082_v50  ;;  %2798 = vmatpush3.msra.mxu1 %v2082_v50 }
 0x244   :  { %2762 = vmatprep.subr.mxu0 %v2081_v24  ;;  %2788 = vmatprep.subr.mxu1 %v2081_v24 }
 0x245   :  { %2763 = vmatpush3.msra.mxu0 %v2081_v24  ;;  %2799 = vmatpush3.msra.mxu1 %v2081_v24 }
 0x246   :  { %2764 = vmatprep.subr.mxu0 %v2080_v40  ;;  %2789 = vmatprep.subr.mxu1 %v2080_v40 }
 0x247   :  { %2765 = vmatpush3.msra.mxu0 %v2080_v40  ;;  %2800 = vmatpush3.msra.mxu1 %v2080_v40 }
 0x248   :  { %2766 = vmatprep.subr.mxu0 %v2079_v26  ;;  %2790 = vmatprep.subr.mxu1 %v2079_v26 }
 0x249   :  { %2767 = vmatpush3.msra.mxu0 %v2079_v26  ;;  %2801 = vmatpush3.msra.mxu1 %v2079_v26 }
 0x24a   :  { %2768 = vmatprep.subr.mxu0 %v2078_v13  ;;  %2791 = vmatprep.subr.mxu1 %v2078_v13 }
 0x24b   :  { %2769 = vmatpush3.msra.mxu0 %v2078_v13  ;;  %2802 = vmatpush3.msra.mxu1 %v2078_v13 }
 0x24c   :  { %2770 = vmatprep.subr.mxu0 %v2077_v29  ;;  %2792 = vmatprep.subr.mxu1 %v2077_v29 }
 0x24d   :  { %2771 = vmatpush3.msra.mxu0 %v2077_v29  ;;  %2803 = vmatpush3.msra.mxu1 %v2077_v29 }
 0x24e   :  { %2772 = vmatprep.subr.mxu0 %v2076_v4  ;;  %2793 = vmatprep.subr.mxu1 %v2076_v4 }
 0x24f   :  { %2773 = vmatpush3.msra.mxu0 %v2076_v4  ;;  %2804 = vmatpush3.msra.mxu1 %v2076_v4 }
 0x250   :  { %2282 = vmatmul.mubr.f32.gmra.mxu1 %v2101_v23  ;;  %2774 = vmatprep.subr.mxu0 %v2075_v37 }
 0x251   :  { %2794 = vmatprep.subr.mxu1 %v2075_v37  ;;  %2775 = vmatpush3.msra.mxu0 %v2075_v37 }
 0x252   :  { %2805 = vmatpush3.msra.mxu1 %v2075_v37  ;;  %2776 = vmatprep.subr.mxu0 %v2074_v49 }
 0x253   :  { %2795 = vmatprep.subr.mxu1 %v2074_v49  ;;  %2777 = vmatpush3.msra.mxu0 %v2074_v49 }
 0x254   :  { %2806 = vmatpush3.msra.mxu1 %v2074_v49  ;;  %2778 = vmatprep.subr.mxu0 %v2073_v21 }
 0x255   :  { %2796 = vmatprep.subr.mxu1 %v2073_v21  ;;  %2779 = vmatpush3.msra.mxu0 %v2073_v21 }
 0x256   :  { %2807 = vmatpush3.msra.mxu1 %v2073_v21  ;;  %2783 = vmatprep.mubr.msk.f32.mxu1 %vm2104_vm1, %v2098_v38 }
 0x257   :  { %2784 = vmatmul.mubr.msk.f32.vlgmr.msra.gmra.mxu1 %vm2104_vm1, %v2103_v57  ;;  %2781 = vmatmul.mubr.msk.f32.vlgmr.msra.gmra.mxu0 %vm2104_vm1, %v2093_v3 }
 0x274   :  { %v2687_v16 = vpop.f32.mrf.mxu0 }
 0x276   :  { %v2688_v47 = vpop.f32.mrf.mxu0 }
 0x277   :  { %v2689_v15 = vadd.f32 %v2688_v47, %v2687_v16 }
 0x278   :  { %v2690_v61 = vpop.f32.mrf.mxu0 }
 0x27a   :  { %v2691_v39 = vpop.f32.mrf.mxu0 }
 0x27b   :  { %v2692_v22 = vadd.f32 %v2691_v39, %v2690_v61 }
 0x27c   :  { %v2693_v41 = vpop.f32.mrf.mxu0 }
 0x27e   :  { %v2694_v63 = vpop.f32.mrf.mxu0 }
 0x27f   :  { %v2695_v2 = vadd.f32 %v2694_v63, %v2693_v41 }
 0x280   :  { %v2696_v18 = vpop.f32.mrf.mxu0 }
 0x282   :  { %v2697_v20 = vpop.f32.mrf.mxu0 }
 0x283   :  { %v2698_v36 = vadd.f32 %v2697_v20, %v2696_v18 }
 0x2f4   :  { %v2731_v55 = vpop.f32.mrf.mxu1 }
 0x2f6   :  { %v2732_v54 = vpop.f32.mrf.mxu1 }
 0x2f7   :  { %v2733_v27 = vadd.f32 %v2732_v54, %v2731_v55 }
 0x2f8   :  { %v2734_v31 = vpop.f32.mrf.mxu1 }
 0x2f9   :  { %v4793_v25 = vadd.f32 %v2733_v27, %v2689_v15 }
 0x2fa   :  { %v2735_v0 = vpop.f32.mrf.mxu1 }
 0x2fb   :  { %v2736_v5 = vadd.f32 %v2735_v0, %v2734_v31 }
 0x2fc   :  { %v2737_v34 = vpop.f32.mrf.mxu1 }
 0x2fd   :  { %v4795_v19 = vadd.f32 %v2736_v5, %v2692_v22 }
 0x2fe   :  { %v2738_v1 = vpop.f32.mrf.mxu1 }
 0x2ff   :  { %v2739_v60 = vadd.f32 %v2738_v1, %v2737_v34 }
 0x301   :  { %v2279_v7 = vadd.f32 %v2739_v60, %v2695_v2 }
 0x310   :  { %v2740_v12 = vpop.f32.mrf.mxu1 }
 0x312   :  { %v2741_v45 = vpop.f32.mrf.mxu1 }
 0x313   :  { %v2742_v17 = vadd.f32 %v2741_v45, %v2740_v12 }
 0x315   :  { %v2284_v62 = vadd.f32 %v2742_v17, %v2698_v36 }
 0x317   :  { %v2785_v14 = vpop.f32.mrf.mxu1 }
 0x318   :  { %v2369_v33 = vadd.f32 %v2785_v14, %v2284_v62 }
 0x319   :  { %v2363_v52 = vpop.f32.mrf.mxu1 }
 0x31a   :  { %v2479_v28 = vsel %vm2478_vm2, %v2369_v33, -inf  ;;  %v2364_v42 = vadd.f32 %v2363_v52, %v2279_v7  ;;  %v2420_v50 = vsel %vm2419_vm3, %v2369_v33, -inf  ;;  %v2782_v52 = vpop.f32.mrf.mxu0 }
 0x31b   :  { %v2480_v59 = vrot.slane %v2479_v28, 4 }
 0x31c   :  { %v2375_v30 = vsel %vm2374_vm4, %v2364_v42, -inf  ;;  %v2418_v53 = vsel %vm2417_vm5, %v2364_v42, -inf }
 0x31d   :  { %v2481_v11 = vmax.f32 %v2479_v28, %v2480_v59  ;;  %v2376_v24 = vrot.slane %v2375_v30, 4  ;;  %v2421_v9 = vmax.f32 %v2418_v53, %v2420_v50  ;;  %v2353_v28 = vpop.f32.mrf.mxu0  ;;  %v2359_v50 = vadd.f32 %v2782_v52, %v4795_v19 }
 0x31e   :  { %v2394_v53 = vstv %s4821_s0  ;;  %s2414_s0 = sld [smem:[#allocation3]] }
 0x31f   :  { %v2482_v43 = vrot.slane %v2481_v11, 2  ;;  %v2377_v48 = vmax.f32 %v2375_v30, %v2376_v24  ;;  %v2422_v40 = vrot.slane %v2421_v9, 4  ;;  %v2354_v24 = vadd.f32 %v2353_v28, %v4793_v25 }
 0x321   :  { %v2483_v46 = vmax.f32 %v2481_v11, %v2482_v43  ;;  %v2378_v56 = vrot.slane %v2377_v48, 2  ;;  %v2423_v26 = vmax.f32 %v2421_v9, %v2422_v40  ;;  %v2398_v11 = vstv %s2396_s26 }
 0x323   :  { %v2484_v58 = vrot.slane %v2483_v46, 1  ;;  %v2379_v6 = vmax.f32 %v2377_v48, %v2378_v56  ;;  %v2424_v8 = vrot.slane %v2423_v26, 2  ;;  %v2404_v48 = vpop.permute.xlu1 %2403 }
 0x325   :  { %v2485_v13 = vmax.f32 %v2483_v46, %v2484_v58  ;;  %v2380_v44 = vrot.slane %v2379_v6, 1  ;;  %v2425_v32 = vmax.f32 %v2423_v26, %v2424_v8  ;;  %v2451_v46 = vmul.f32 %v2394_v53, %v2359_v50 }
 0x326   :  { %v2395_v58 = vmul.f32 %v2394_v53, %v2354_v24  ;;  %v2504_v8 = vrot.slane %v2404_v48, 6 }
 0x327   :  { %v2486_v35 = vsub.f32 %v2369_v33, %v2485_v13  ;;  %v2381_v29 = vmax.f32 %v2379_v6, %v2380_v44  ;;  %v2426_v10 = vrot.slane %v2425_v32, 1 }
 0x329   :  { %v2487_v4 = vmul.f32 1.442695, %v2486_v35  ;;  %v2382_v23 = vsub.f32 %v2364_v42, %v2381_v29  ;;  %v2427_v51 = vmax.f32 %v2425_v32, %v2426_v10 }
 0x32b   :  { %2813 = vpow2.f32 %v2487_v4  ;;  %v2383_v37 = vmul.f32 1.442695, %v2382_v23  ;;  %v2428_v49 = vsub.f32 %v2364_v42, %v2427_v51  ;;  %v2429_v21 = vsub.f32 %v2369_v33, %v2427_v51 }
 0x32d   :  { %2815 = vpow2.f32 %v2383_v37  ;;  %v2430_v38 = vmul.f32 1.442695, %v2428_v49  ;;  %v2432_v57 = vmul.f32 1.442695, %v2429_v21  ;;  %v2458_v37 = vrot.slane %v2404_v48, 3 }
 0x32f   :  { %2817 = vpow2.f32 %v2430_v38 }
 0x330   :  { %2819 = vpow2.f32 %v2432_v57 }
 0x338   :  { %v2814_v3 = vpop.eup %2813 }
 0x339   :  { %v2490_v16 = vrot.slane %v2814_v3, 2 }
 0x33a   :  { %v2816_v47 = vpop.eup %2815 }
 0x33b   :  { %v2385_v15 = vsel %vm2374_vm4, %v2816_v47, 0.0  ;;  %v2492_v61 = vsel %vm2374_vm4, %v2490_v16, 0.0 }
 0x33c   :  { %v2818_v39 = vpop.eup %2817  ;;  %v2386_v22 = vrot.slane %v2385_v15, 4  ;;  %v2493_v55 = vrot.slane %v2492_v61, 4 }
 0x33d   :  { %v2820_v54 = vpop.eup %2819  ;;  %v2437_v27 = vrot.slane %v2818_v39, 5 }
 0x33e   :  { %v2387_v31 = vadd.f32 %v2386_v22, %v2385_v15  ;;  %v2438_v0 = vrot.slane %v2820_v54, 5  ;;  %v2494_v5 = vadd.f32 %v2493_v55, %v2492_v61 }
 0x340   :  { %v2439_v41 = vsel %vm2436_vm6, %v2437_v27, %v2438_v0  ;;  %v2495_v63 = vrot.slane %v2494_v5, 2  ;;  %v2388_v34 = vrot.slane %v2387_v31, 2 }
 0x341   :  { %v2441_v18 = vsel %vm2374_vm4, %v2439_v41, 0.0 }
 0x342   :  { %v2442_v1 = vrot.slane %v2441_v18, 4  ;;  %v2496_v20 = vadd.f32 %v2495_v63, %v2494_v5  ;;  %v2389_v12 = vadd.f32 %v2388_v34, %v2387_v31 }
 0x344   :  { %v2443_v36 = vadd.f32 %v2442_v1, %v2441_v18  ;;  %v2497_v45 = vrot.slane %v2496_v20, 1  ;;  %v2390_v17 = vrot.slane %v2389_v12, 1 }
 0x346   :  { %v2444_v2 = vrot.slane %v2443_v36, 2  ;;  %v2498_v60 = vadd.f32 %v2497_v45, %v2496_v20  ;;  %v2391_v62 = vadd.f32 %v2390_v17, %v2389_v12 }
 0x348   :  { %v2445_v14 = vadd.f32 %v2444_v2, %v2443_v36  ;;  %2821 = vrcp.f32 %v2498_v60  ;;  %v2415_v2 = vstv %s2414_s0  ;;  %v2476_v60 = vstv %s2653_s28 }
 0x349   :  { %2823 = vrcp.f32 %v2391_v62  ;;  %v2518_v62 = vstv %s2654_s29 }
 0x34a   :  { %v2446_v33 = vrot.slane %v2445_v14, 1 }
 0x34c   :  { %v2447_v7 = vadd.f32 %v2446_v33, %v2445_v14 }
 0x34e   :  { %2825 = vrcp.f32 %v2447_v7 }
 0x355   :  { %v2822_v42 = vpop.eup %2821 }
 0x356   :  { %v2824_v59 = vpop.eup %2823  ;;  %v2500_v30 = vmul.f32 %v2822_v42, %v2814_v3 }
 0x357   :  { %v2393_v9 = vmul.f32 %v2824_v59, %v2816_v47 }
 0x358   :  { %v2501_v43 = vmul.f32 %v2500_v30, %v2359_v50 }
 0x359   :  { %v2397_v40 = vmul.f32 %v2393_v9, %v2354_v24 }
 0x35a   :  { %v2502_v56 = vmul.f32 %v2501_v43, %v2398_v11 }
 0x35b   :  { %v2826_v26 = vpop.eup %2825  ;;  %v2399_v6 = vmul.f32 %v2398_v11, %v2397_v40 }
 0x35c   :  { %v2450_v13 = vmul.f32 %v2826_v26, %v2820_v54  ;;  %v2503_v19 = vadd.f32 %v2502_v56, %v2451_v46  ;;  %v2449_v44 = vmul.f32 %v2826_v26, %v2818_v39 }
 0x35d   :  { %v2400_v32 = vadd.f32 %v2399_v6, %v2395_v58 }
 0x35e   :  { %v2453_v35 = vmul.f32 %v2450_v13, %v2359_v50  ;;  %v2506_v29 = vmul.f32 %v2504_v8, %v2503_v19  ;;  %v2452_v10 = vmul.f32 %v2449_v44, %v2354_v24 }
 0x35f   :  { %v2406_v4 = vmul.f32 %v2404_v48, %v2400_v32 }
 0x360   :  { %v2455_v23 = vmul.f32 %v2453_v35, %v2398_v11  ;;  %v2508_v25 = vrot.slane %v2506_v29, 2  ;;  %v2454_v51 = vmul.f32 %v2452_v10, %v2398_v11 }
 0x361   :  { %v2407_v49 = vsel %vm2374_vm4, %v2406_v4, 0.0 }
 0x362   :  { %v2457_v21 = vadd.f32 %v2455_v23, %v2451_v46  ;;  %v2510_v38 = vsel %vm2374_vm4, %v2508_v25, 0.0  ;;  %v2408_v57 = vrot.slane %v2407_v49, 4  ;;  %v2456_v3 = vadd.f32 %v2454_v51, %v2395_v58 }
 0x363   :  { %v2511_v16 = vrot.slane %v2510_v38, 4 }
 0x364   :  { %v2461_v47 = vmul.f32 %v2458_v37, %v2457_v21  ;;  %v2409_v15 = vadd.f32 %v2408_v57, %v2407_v49  ;;  %v2460_v61 = vmul.f32 %v2458_v37, %v2456_v3 }
 0x365   :  { %v2512_v39 = vadd.f32 %v2511_v16, %v2510_v38 }
 0x366   :  { %v2465_v22 = vrot.slane %v2461_v47, 5  ;;  %v2410_v55 = vrot.slane %v2409_v15, 2  ;;  %v2464_v54 = vrot.slane %v2460_v61, 5 }
 0x367   :  { %v2513_v27 = vrot.slane %v2512_v39, 2 }
 0x368   :  { %v2466_v31 = vsel %vm2436_vm6, %v2464_v54, %v2465_v22  ;;  %v2411_v5 = vadd.f32 %v2410_v55, %v2409_v15 }
 0x369   :  { %v2468_v0 = vsel %vm2374_vm4, %v2466_v31, 0.0  ;;  %v2514_v63 = vadd.f32 %v2513_v27, %v2512_v39 }
 0x36a   :  { %v2469_v41 = vrot.slane %v2468_v0, 4  ;;  %v2412_v18 = vrot.slane %v2411_v5, 1 }
 0x36b   :  { %v2515_v20 = vrot.slane %v2514_v63, 1 }
 0x36c   :  { %v2470_v34 = vadd.f32 %v2469_v41, %v2468_v0  ;;  %v2413_v36 = vadd.f32 %v2412_v18, %v2411_v5 }
 0x36d   :  { %v2516_v17 = vadd.f32 %v2515_v20, %v2514_v63 }
 0x36e   :  { %v2471_v1 = vrot.slane %v2470_v34, 2  ;;  %v2416_v33 = vadd.f32 %v2415_v2, %v2413_v36 }
 0x36f   :  { %v2519_v52 = vadd.f32 %v2518_v62, %v2516_v17 }
 0x370   :  { %v2472_v12 = vadd.f32 %v2471_v1, %v2470_v34 }
 0x372   :  { %v2473_v45 = vrot.slane %v2472_v12, 1 }
 0x374   :  { %v2474_v14 = vadd.f32 %v2473_v45, %v2472_v12 }
 0x376   :  { %v2477_v7 = vadd.f32 %v2476_v60, %v2474_v14 }
 0x378   :  { %v2521_v28 = vsel %vm2520_vm7, %v2416_v33, %v2477_v7 }
 0x379   :  { %v2522_v42 = vsel %vm2419_vm3, %v2521_v28, %v2519_v52 }
 0x37a   :  { %v2523_v59 = vsel %vm2436_vm6, %v2522_v42, -inf }
 0x37b   :  { %v2524_v50 = vrot.slane %v2523_v59, 4 }
 0x37d   :  { %v2525_v30 = vmax.f32 %v2523_v59, %v2524_v50 }
 0x37f   :  { %v2526_v53 = vrot.slane %v2525_v30, 2 }
 0x381   :  { %v2527_v11 = vmax.f32 %v2525_v30, %v2526_v53 }
 0x383   :  { %v2528_v24 = vrot.slane %v2527_v11, 1 }
 0x385   :  { %v2529_v9 = vmax.f32 %v2527_v11, %v2528_v24 }
 0x387   :  { %v2530_v43 = vsub.f32 %v2522_v42, %v2529_v9 }
 0x389   :  { %v2531_v48 = vmul.f32 1.442695, %v2530_v43 }
 0x38b   :  { %2827 = vpow2.f32 %v2531_v48 }
 0x398   :  { %v2828_v40 = vpop.eup %2827 }
 0x399   :  { %v2533_v46 = vsel %vm2436_vm6, %v2828_v40, 0.0 }
 0x39a   :  { %v2534_v56 = vrot.slane %v2533_v46, 4 }
 0x39c   :  { %v2535_v26 = vadd.f32 %v2534_v56, %v2533_v46 }
 0x39e   :  { %v2536_v58 = vrot.slane %v2535_v26, 2 }
 0x3a0   :  { %v2537_v6 = vadd.f32 %v2536_v58, %v2535_v26 }
 0x3a2   :  { %v2538_v8 = vrot.slane %v2537_v6, 1 }
 0x3a4   :  { %v2539_v13 = vadd.f32 %v2538_v8, %v2537_v6 }
 0x3a6   :  { %2829 = vrcp.f32 %v2539_v13 }
 0x3b3   :  { %v2830_v19 = vpop.eup %2829 }
 0x3b4   :  { %v2541_v44 = vmul.f32 %v2830_v19, %v2828_v40 }
 0x3b6   :  { %2542 = vst [vmem:[#allocation6] sm:$0x7] %v2541_v44 }
 0x3b7   :  { %2854 = shalt.err (!%p2851_p9)
}
 0x3b8   :  { %2552 = dma.vmem_to_hbm [thread:$0]  %s2550_s8, 64, %s4828_s7, [#allocation4]  }
 0x3b9   :  { %2865 = dma.done.wait [#allocation4], 64  }
 0x3ba   :  { %2866 = vsyncadd [#allocation4], 4294967232 }
 0x3bb   :  { %2556 = vsyncpa [#allocation4], 1 }
 0x3bc   :  { %2557 = vsyncpa [#allocation5], 1 }

</bundles_post_ra>
